<compile_context>
chip_gen: v7x
topology: tpu7x:2x2x1
jax: 0.10.0
libtpu: 0.0.40
codegen_flags: <defaults>
</compile_context>

<pallas_src>
import functools

import jax
import jax.numpy as jnp
from jax.experimental import pallas as pl
from jax.experimental.pallas import tpu as pltpu


# ----------------------------------------------------------------------------
# tiling helpers
# ----------------------------------------------------------------------------
def _round_up(x, m):
    return ((x + m - 1) // m) * m


def _row_tile(m, max_tile=256):
    # MXU-friendly row tiles: 256 (v6e/v7x MXU depth) -> 128 -> 8-aligned remainder.
    for t in (max_tile, 128):
        if m >= t:
            return t
    return _round_up(max(m, 1), 8)


def _col_tile(n):
    # Prefer 512/256 output tiles for the 256-wide MXU of v6e/v7x (still fine on
    # v5e's 128-wide MXU); fall back to full width for small feature dims.
    for c in (512, 256, 128):
        if n % c == 0:
            return c
    return n


def _pad_rows(x, mp):
    m = x.shape[0]
    return x if m == mp else jnp.pad(x, ((0, mp - m), (0, 0)))


def _ce_vocab_tiling(vocab):
    """Vocab tile, #parallel vocab partitions (v7x dual TensorCore), padded vocab."""
    if vocab >= 4096:
        tv, n_parts = 1024, 2       # (1024, D) bf16 tiles, ~1.5 MiB per buffer
    else:
        tv, n_parts = _round_up(vocab, 256), 1
    v_pad = _round_up(vocab, tv * n_parts)
    return tv, n_parts, v_pad


# ----------------------------------------------------------------------------
# Kernel 1: fused LayerNorm + matmul + bias (+ optional GPT-2 "gelu_new")
# ----------------------------------------------------------------------------
def _ln_matmul_kernel(x_ref, g_ref, b_ref, w_ref, bias_ref, o_ref, y_ref, *,
                      activation):
    # LayerNorm is computed once per row tile (j == 0) and cached in a bf16 VMEM
    # scratch; every output-column tile j reuses it (x's block index is (i, 0), so
    # the DMA was already shared -- this removes the redundant VPU/EUP recompute).
    @pl.when(pl.program_id(1) == 0)
    def _():
        x = x_ref[...].astype(jnp.float32)                     # (tm, K) f32 residual
        mu = jnp.mean(x, axis=-1, keepdims=True)
        var = jnp.mean(jnp.square(x - mu), axis=-1, keepdims=True)
        y = (x - mu) * jax.lax.rsqrt(var + 1e-5)
        y_ref[...] = (y * g_ref[...] + b_ref[...]).astype(jnp.bfloat16)

    acc = jnp.dot(y_ref[...], w_ref[...],
                  preferred_element_type=jnp.float32) + bias_ref[...]
    if activation == "gelu_new":                               # GPT-2 tanh GELU (EUP)
        c = jnp.sqrt(jnp.float32(2.0 / jnp.pi))
        acc = 0.5 * acc * (1.0 + jnp.tanh(c * (acc + 0.044715 * acc * acc * acc)))
    o_ref[...] = acc.astype(o_ref.dtype)


def ln_matmul_bias(x, g, b, w, bias, activation=None):
    """act(LayerNorm(x) @ w + bias).  x: f32 [M,K], w: bf16 [K,N] -> bf16 [M,N]."""
    M, K = x.shape
    N = w.shape[1]
    tm = _row_tile(M)
    tn = _col_tile(N)
    Mp = _round_up(M, tm)
    xp = _pad_rows(x, Mp)
    # TODO(synk): each row tile re-streams the full (K, N) weight; an output-stationary
    # K-tiled variant would help only when M is much larger than one row tile.
    out = pl.pallas_call(
        functools.partial(_ln_matmul_kernel, activation=activation),
        out_shape=jax.ShapeDtypeStruct((Mp, N), jnp.bfloat16),
        grid=(Mp // tm, N // tn),
        in_specs=[
            pl.BlockSpec((tm, K), lambda i, j: (i, 0)),
            pl.BlockSpec((1, K), lambda i, j: (0, 0)),
            pl.BlockSpec((1, K), lambda i, j: (0, 0)),
            pl.BlockSpec((K, tn), lambda i, j: (0, j)),
            pl.BlockSpec((1, tn), lambda i, j: (0, j)),
        ],
        out_specs=pl.BlockSpec((tm, tn), lambda i, j: (i, j)),
        scratch_shapes=[pltpu.VMEM((tm, K), jnp.bfloat16)],
        compiler_params=pltpu.CompilerParams(
            dimension_semantics=("parallel", "arbitrary")),
    )(xp, g.reshape(1, K), b.reshape(1, K), w, bias.reshape(1, N))
    return out[:M]


# ----------------------------------------------------------------------------
# Kernel 2: matmul + bias with fused residual add
# ----------------------------------------------------------------------------
def _matmul_bias_res_kernel(x_ref, w_ref, b_ref, r_ref, o_ref):
    acc = jnp.dot(x_ref[...], w_ref[...], preferred_element_type=jnp.float32)
    o_ref[...] = (r_ref[...] + acc + b_ref[...]).astype(o_ref.dtype)


def matmul_bias_residual(x, w, bias, resid):
    """resid + x @ w + bias.  x: bf16 [M,K], w: bf16 [K,N], resid: f32 [M,N] -> f32."""
    M, K = x.shape
    N = w.shape[1]
    tm = _row_tile(M)
    tn = _col_tile(N)
    Mp = _round_up(M, tm)
    xp = _pad_rows(x, Mp)
    rp = _pad_rows(resid, Mp)
    out = pl.pallas_call(
        _matmul_bias_res_kernel,
        out_shape=jax.ShapeDtypeStruct((Mp, N), jnp.float32),
        grid=(Mp // tm, N // tn),
        in_specs=[
            pl.BlockSpec((tm, K), lambda i, j: (i, 0)),
            pl.BlockSpec((K, tn), lambda i, j: (0, j)),
            pl.BlockSpec((1, tn), lambda i, j: (0, j)),
            pl.BlockSpec((tm, tn), lambda i, j: (i, j)),
        ],
        out_specs=pl.BlockSpec((tm, tn), lambda i, j: (i, j)),
        compiler_params=pltpu.CompilerParams(
            dimension_semantics=("parallel", "parallel")),
    )(xp, w, bias.reshape(1, N), rp)
    return out[:M]


# ----------------------------------------------------------------------------
# Kernel 3: final LayerNorm (large row tiles; HBM-bandwidth bound)
# ----------------------------------------------------------------------------
def _layernorm_kernel(x_ref, g_ref, b_ref, o_ref):
    x = x_ref[...].astype(jnp.float32)
    mu = jnp.mean(x, axis=-1, keepdims=True)
    var = jnp.mean(jnp.square(x - mu), axis=-1, keepdims=True)
    y = (x - mu) * jax.lax.rsqrt(var + 1e-5)
    o_ref[...] = (y * g_ref[...] + b_ref[...]).astype(o_ref.dtype)


def layernorm(x, g, b, out_dtype=jnp.bfloat16):
    M, D = x.shape
    tm = _row_tile(M, max_tile=512)
    Mp = _round_up(M, tm)
    xp = _pad_rows(x, Mp)
    out = pl.pallas_call(
        _layernorm_kernel,
        out_shape=jax.ShapeDtypeStruct((Mp, D), out_dtype),
        grid=(Mp // tm,),
        in_specs=[
            pl.BlockSpec((tm, D), lambda i: (i, 0)),
            pl.BlockSpec((1, D), lambda i: (0, 0)),
            pl.BlockSpec((1, D), lambda i: (0, 0)),
        ],
        out_specs=pl.BlockSpec((tm, D), lambda i: (i, 0)),
        compiler_params=pltpu.CompilerParams(dimension_semantics=("parallel",)),
    )(xp, g.reshape(1, D), b.reshape(1, D))
    return out[:M]


# ----------------------------------------------------------------------------
# Kernel 4: per-batch multi-head attention on lane-dense (S, 3*D) QKV slabs
# ----------------------------------------------------------------------------
def _attention_kernel(qkv_ref, mask_ref, o_ref, *, n_heads, d_head):
    S = qkv_ref.shape[0]
    D = n_heads * d_head
    qkv = qkv_ref[...]                                        # (S, 3D) bf16, one load
    keep = mask_ref[...] > 0.5                                # (1, S) key keep mask
    row = jax.lax.broadcasted_iota(jnp.int32, (S, S), 0)
    col = jax.lax.broadcasted_iota(jnp.int32, (S, S), 1)
    allowed = jnp.logical_and(col <= row, keep)               # causal & pad mask, once
    scale = jnp.float32(1.0) / jnp.sqrt(jnp.float32(d_head))

    # TODO(synk): full (S, S) scores per head; long sequences would need a
    # flash-style streamed (online-softmax) reduction over K/V blocks.
    # TODO(synk): on v6e/v7x the d_head contraction uses a fraction of the MXU depth;
    # a 2-head block-diagonal matmul would raise it (irrelevant at tiny S).
    def head_ctx(h):
        q = qkv[:, h * d_head:(h + 1) * d_head]               # (S, Dh) bf16
        k = qkv[:, D + h * d_head:D + (h + 1) * d_head]
        v = qkv[:, 2 * D + h * d_head:2 * D + (h + 1) * d_head]
        s = jax.lax.dot_general(q, k, (((1,), (1,)), ((), ())),
                                preferred_element_type=jnp.float32) * scale
        s = jnp.where(allowed, s, -1e9)
        m = jnp.max(s, axis=-1, keepdims=True)
        e = jnp.exp(s - m)
        p = e * pl.reciprocal(jnp.sum(e, axis=-1, keepdims=True), approx=True)
        return jnp.dot(p.astype(jnp.bfloat16), v, preferred_element_type=jnp.float32)

    # Write head pairs straight into o_ref as 128-lane-aligned slabs: only two head
    # contexts + one score matrix stay live, and the stores are unmasked full-lane.
    h = 0
    while h + 1 < n_heads:
        pair = jnp.concatenate([head_ctx(h), head_ctx(h + 1)], axis=-1)
        o_ref[:, h * d_head:(h + 2) * d_head] = pair.astype(o_ref.dtype)
        h += 2
    if h < n_heads:
        o_ref[:, h * d_head:(h + 1) * d_head] = head_ctx(h).astype(o_ref.dtype)


def multi_head_attention(qkv, attn_keep, n_heads):
    """qkv: bf16 [B,S,3D]; attn_keep: f32 [B,1,S] (1=keep, 0=mask) -> bf16 [B,S,D]."""
    B, S, threeD = qkv.shape
    D = threeD // 3
    d_head = D // n_heads
    return pl.pallas_call(
        functools.partial(_attention_kernel, n_heads=n_heads, d_head=d_head),
        out_shape=jax.ShapeDtypeStruct((B, S, D), jnp.bfloat16),
        grid=(B,),
        in_specs=[
            pl.BlockSpec((None, S, threeD), lambda b: (b, 0, 0)),
            pl.BlockSpec((None, 1, S), lambda b: (b, 0, 0)),
        ],
        out_specs=pl.BlockSpec((None, S, D), lambda b: (b, 0, 0)),
        compiler_params=pltpu.CompilerParams(dimension_semantics=("parallel",)),
    )(qkv, attn_keep)


# ----------------------------------------------------------------------------
# Kernel 5: tied lm_head + cross-entropy partials, vocab-tiled online logsumexp.
# Grid = (vocab partition [parallel, engages both v7x TensorCores], vocab tile).
# The (1, M) accumulators live in the output refs (constant block index over j).
# ----------------------------------------------------------------------------
def _lmhead_ce_kernel(ht_ref, w_ref, tgt_ref, m_ref, s_ref, t_ref, *,
                      tv, vocab, tiles_per_part):
    p = pl.program_id(0)
    j = pl.program_id(1)

    @pl.when(j == 0)
    def _():
        m_ref[...] = jnp.full_like(m_ref, -1e30)
        s_ref[...] = jnp.zeros_like(s_ref)
        t_ref[...] = jnp.zeros_like(t_ref)

    # logits^T chunk: (tv, M) = w_tile @ hidden^T -- contraction on the natural MXU
    # axes (no per-tile transpose of the (tv, D) weight block in the vocab loop).
    logits = jnp.dot(w_ref[...], ht_ref[...],
                     preferred_element_type=jnp.float32)          # (tv, M) f32
    base = (p * tiles_per_part + j) * tv
    vid = jax.lax.broadcasted_iota(jnp.int32, logits.shape, 0) + base
    in_vocab = vid < vocab                                        # mask padded rows
    tgt = tgt_ref[...]                                            # (1, M) int32

    # logit of the true target token (matches at most once across all vocab tiles)
    t_ref[...] += jnp.sum(jnp.where(vid == tgt, logits, 0.0), axis=0, keepdims=True)

    # online logsumexp over the vocab axis; padded vocab rows contribute exactly 0
    lmask = jnp.where(in_vocab, logits, jnp.float32(-1e30))
    m_prev = m_ref[...]
    m_new = jnp.maximum(m_prev, jnp.max(lmask, axis=0, keepdims=True))
    e = jnp.where(in_vocab, jnp.exp(lmask - m_new), 0.0)
    s_ref[...] = s_ref[...] * jnp.exp(m_prev - m_new) + jnp.sum(e, axis=0,
                                                                keepdims=True)
    m_ref[...] = m_new


def lmhead_cross_entropy(hidden, wte_lm, flat_targets, n_triggers, vocab):
    """hidden: bf16 [n_triggers*num_targets*L, D]; wte_lm: bf16 [Vp, D] (vocab rows,
    zero-padded to the tile grid); flat_targets: int32 [M]. Returns f32 [n_triggers]."""
    M, D = hidden.shape
    tv, n_parts, v_pad = _ce_vocab_tiling(vocab)
    if wte_lm.shape[0] != v_pad:                    # defensive: pad if caller didn't
        wte_lm = jnp.pad(wte_lm, ((0, v_pad - wte_lm.shape[0]), (0, 0)))
    tiles_per_part = v_pad // (tv * n_parts)

    ht = hidden.T                                   # (D, M) bf16 -> lane-dense logits^T
    tgt = flat_targets.reshape(1, M).astype(jnp.int32)

    # TODO(synk): the constant-index ht/tgt inputs could be single-buffered
    # (pipeline_mode=pl.Buffered(1)) to trim VMEM further on v7x.
    m_p, s_p, t_p = pl.pallas_call(
        functools.partial(_lmhead_ce_kernel, tv=tv, vocab=vocab,
                          tiles_per_part=tiles_per_part),
        out_shape=(jax.ShapeDtypeStruct((n_parts, 1, M), jnp.float32),) * 3,
        grid=(n_parts, tiles_per_part),
        in_specs=[
            pl.BlockSpec((D, M), lambda p, j: (0, 0)),
            pl.BlockSpec((tv, D), lambda p, j: (p * tiles_per_part + j, 0)),
            pl.BlockSpec((1, M), lambda p, j: (0, 0)),
        ],
        out_specs=(pl.BlockSpec((None, 1, M), lambda p, j: (p, 0, 0)),) * 3,
        compiler_params=pltpu.CompilerParams(
            dimension_semantics=("parallel", "arbitrary"),
            vmem_limit_bytes=64 * 1024 * 1024),
    )(ht, wte_lm, tgt)

    # tiny JAX epilogue: merge per-partition (m, s, t) partials + per-trigger mean
    m_p, s_p, t_p = m_p[:, 0, :], s_p[:, 0, :], t_p[:, 0, :]      # (P, M)
    m_g = jnp.max(m_p, axis=0)                                    # (M,)
    s_g = jnp.sum(s_p * jnp.exp(m_p - m_g[None, :]), axis=0)
    lse = m_g + jnp.log(s_g)
    true_logit = jnp.sum(t_p, axis=0)

    tgt_flat = flat_targets.astype(jnp.int32)
    # TODO(synk): the reference hands -1 pads to F.cross_entropy(ignore_index=-100),
    # which is undefined in torch; here all negative targets are ignored.
    valid = jnp.logical_and(tgt_flat != -100, tgt_flat >= 0).astype(jnp.float32)
    per_row = (lse - true_logit) * valid
    rows_per_trigger = M // n_triggers
    num = jnp.sum(per_row.reshape(n_triggers, rows_per_trigger), axis=1)
    den = jnp.sum(valid.reshape(n_triggers, rows_per_trigger), axis=1)
    return num / jnp.maximum(den, 1.0)              # guard: all-padding trigger -> 0


# ----------------------------------------------------------------------------
# GPT-2 transformer (eval mode; dropout identity) built on the kernels above
# ----------------------------------------------------------------------------
def init_gpt2_params(key, vocab, d, n_layers, max_pos):
    std = 0.02
    keys = jax.random.split(key, 2 + n_layers)
    wte = jax.random.normal(keys[0], (vocab, d), jnp.float32) * std
    _, _, v_pad = _ce_vocab_tiling(vocab)
    params = {
        "wte": wte,                               # f32 for embedding lookups
        # bf16 tied lm_head weight, zero-padded ONCE to the CE vocab-tile grid
        # (padded rows are masked out inside the CE kernel).
        "wte_lm": jnp.pad(wte, ((0, v_pad - vocab), (0, 0))).astype(jnp.bfloat16),
        "wpe": jax.random.normal(keys[1], (max_pos, d), jnp.float32) * std,
        "ln_f_g": jnp.ones((d,), jnp.float32),
        "ln_f_b": jnp.zeros((d,), jnp.float32),
        "layers": [],
    }
    for l in range(n_layers):
        k = jax.random.split(keys[2 + l], 4)
        params["layers"].append({
            "ln1_g": jnp.ones((d,), jnp.float32), "ln1_b": jnp.zeros((d,), jnp.float32),
            "c_attn_w": (jax.random.normal(k[0], (d, 3 * d), jnp.float32) * std
                         ).astype(jnp.bfloat16),
            "c_attn_b": jnp.zeros((3 * d,), jnp.float32),
            "attn_proj_w": (jax.random.normal(k[1], (d, d), jnp.float32) * std
                            ).astype(jnp.bfloat16),
            "attn_proj_b": jnp.zeros((d,), jnp.float32),
            "ln2_g": jnp.ones((d,), jnp.float32), "ln2_b": jnp.zeros((d,), jnp.float32),
            "c_fc_w": (jax.random.normal(k[2], (d, 4 * d), jnp.float32) * std
                       ).astype(jnp.bfloat16),
            "c_fc_b": jnp.zeros((4 * d,), jnp.float32),
            "mlp_proj_w": (jax.random.normal(k[3], (4 * d, d), jnp.float32) * std
                           ).astype(jnp.bfloat16),
            "mlp_proj_b": jnp.zeros((d,), jnp.float32),
        })
    return params


def gpt2_transformer(params, inputs_embeds, attn_keep, n_heads):
    B, S, D = inputs_embeds.shape
    M = B * S
    x = (inputs_embeds + params["wpe"][:S][None, :, :]).reshape(M, D)   # f32 residual
    for layer in params["layers"]:
        # --- attention block: LN fused into c_attn, residual fused into proj ---
        qkv = ln_matmul_bias(x, layer["ln1_g"], layer["ln1_b"],
                             layer["c_attn_w"], layer["c_attn_b"])      # bf16 (M, 3D)
        a = multi_head_attention(qkv.reshape(B, S, 3 * D), attn_keep, n_heads)
        x = matmul_bias_residual(a.reshape(M, D), layer["attn_proj_w"],
                                 layer["attn_proj_b"], x)               # f32 (M, D)
        # --- MLP block: LN + GELU fused into c_fc, residual fused into proj ---
        h = ln_matmul_bias(x, layer["ln2_g"], layer["ln2_b"],
                           layer["c_fc_w"], layer["c_fc_b"], activation="gelu_new")
        x = matmul_bias_residual(h, layer["mlp_proj_w"], layer["mlp_proj_b"], x)
    hid = layernorm(x, params["ln_f_g"], params["ln_f_b"])              # bf16 (M, D)
    return hid.reshape(B, S, D)


# ----------------------------------------------------------------------------
# GPT2TargetLikelihood.forward
# ----------------------------------------------------------------------------
def gpt2_target_likelihood(params, triggers, targets, n_heads):
    """triggers: [num_triggers, T] int32; targets: [num_targets, L] int32 (-1 = pad).
    Returns per-trigger cross-entropy loss of the target tokens, shape [num_triggers]."""
    wte = params["wte"]
    vocab, D = wte.shape
    nT, Ttrig = triggers.shape
    num_targets, L = targets.shape

    pad_mask = (targets == -1)
    tgt_idx_for_emb = jnp.where(pad_mask, 1, targets)
    tgt_emb = wte[tgt_idx_for_emb]                                   # (num_targets, L, D)
    trig_emb = wte[triggers]                                         # (nT, Ttrig, D)

    trig_emb_b = jnp.broadcast_to(trig_emb[:, None], (nT, num_targets, Ttrig, D))
    tgt_emb_b = jnp.broadcast_to(tgt_emb[None], (nT, num_targets, L, D))
    S = Ttrig + L
    B = nT * num_targets
    lm_inpt = jnp.concatenate([trig_emb_b, tgt_emb_b], axis=2).reshape(B, S, D)

    mask_per_target = jnp.concatenate(
        [jnp.ones((num_targets, Ttrig), dtype=bool), jnp.logical_not(pad_mask)], axis=1)
    attn_keep = jnp.tile(mask_per_target, (nT, 1)).astype(jnp.float32).reshape(B, 1, S)

    hidden = gpt2_transformer(params, lm_inpt, attn_keep, n_heads)   # bf16 (B, S, D)

    # hidden states predicting the target tokens, all triggers batched together
    tgt_hidden = hidden[:, Ttrig - 1:-1, :].reshape(nT * num_targets * L, D)
    flat_targets = jnp.tile(targets.reshape(-1), (nT,))
    return lmhead_cross_entropy(tgt_hidden, params["wte_lm"], flat_targets, nT, vocab)


# ----------------------------------------------------------------------------
if __name__ == "__main__":
    VOCAB, HIDDEN, N_LAYERS, N_HEADS, MAX_POS = 256, 128, 2, 2, 32
    key = jax.random.PRNGKey(0)
    k_param, k_trig, k_tgt = jax.random.split(key, 3)
    params = init_gpt2_params(k_param, VOCAB, HIDDEN, N_LAYERS, MAX_POS)

    num_triggers, trigger_len = 2, 4
    num_targets, max_target_len = 3, 4
    triggers = jax.random.randint(
        k_trig, (num_triggers, trigger_len), 0, VOCAB, dtype=jnp.int32)
    targets = jax.random.randint(
        k_tgt, (num_targets, max_target_len), 0, VOCAB, dtype=jnp.int32)

    fwd = jax.jit(gpt2_target_likelihood, static_argnums=(3,))
    loss = jax.block_until_ready(fwd(params, triggers, targets, N_HEADS))
    assert loss.shape == (num_triggers,) and loss.dtype == jnp.float32
    assert bool(jnp.all(jnp.isfinite(loss)))
    print("KERNEL_OK")
</pallas_src>

<mosaic_0001>
module attributes {stable_mosaic.version = 11 : i64} {
  func.func @_ln_matmul_kernel(%arg0: i32, %arg1: i32, %arg2: memref<48x128xf32, #tpu.memory_space<vmem>>, %arg3: memref<1x128xf32, #tpu.memory_space<vmem>>, %arg4: memref<1x128xf32, #tpu.memory_space<vmem>>, %arg5: memref<128x128xbf16, #tpu.memory_space<vmem>>, %arg6: memref<1x128xf32, #tpu.memory_space<vmem>>, %arg7: memref<48x128xbf16, #tpu.memory_space<vmem>>, %arg8: memref<48x128xbf16, #tpu.memory_space<vmem>>) attributes {dimension_semantics = [#tpu.dimension_semantics<parallel>, #tpu.dimension_semantics<arbitrary>], iteration_bounds = array<i64: 1, 3>, scalar_prefetch = 0 : i64, scratch_operands = 1 : i64, tpu.core_type = #tpu.core_type<tc>, window_params = [{transform_indices = @transform_0, window_bounds = array<i64: 48, 128>}, {pipeline_mode = #tpu.pipeline_mode<synchronous>, transform_indices = @transform_1, window_bounds = array<i64: 1, 128>}, {pipeline_mode = #tpu.pipeline_mode<synchronous>, transform_indices = @transform_2, window_bounds = array<i64: 1, 128>}, {transform_indices = @transform_3, window_bounds = array<i64: 128, 128>}, {transform_indices = @transform_4, window_bounds = array<i64: 1, 128>}, {transform_indices = @transform_5, window_bounds = array<i64: 48, 128>}]} {
    %c0_i32 = arith.constant 0 : i32
    %0 = arith.cmpi eq, %arg1, %c0_i32 : i32
    %1 = arith.extui %0 : i1 to i32
    %c0_i32_0 = arith.constant 0 : i32
    %2 = arith.cmpi ne, %1, %c0_i32_0 : i32
    scf.if %2 {
      %c0_8 = arith.constant 0 : index
      %c0_9 = arith.constant 0 : index
      %11 = vector.load %arg2[%c0_8, %c0_9] : memref<48x128xf32, #tpu.memory_space<vmem>>, vector<48x128xf32>
      %cst_10 = arith.constant dense<0.000000e+00> : vector<48xf32>
      %12 = vector.multi_reduction <add>, %11, %cst_10 [1] : vector<48x128xf32> to vector<48xf32>
      %13 = vector.shape_cast %12 : vector<48xf32> to vector<48x1xf32>
      %cst_11 = arith.constant 1.280000e+02 : f32
      %14 = vector.broadcast %cst_11 : f32 to vector<48x1xf32>
      %15 = arith.divf %13, %14 : vector<48x1xf32>
      %16 = vector.broadcast %15 : vector<48x1xf32> to vector<48x128xf32>
      %17 = arith.subf %11, %16 : vector<48x128xf32>
      %18 = arith.mulf %17, %17 : vector<48x128xf32>
      %cst_12 = arith.constant dense<0.000000e+00> : vector<48xf32>
      %19 = vector.multi_reduction <add>, %18, %cst_12 [1] : vector<48x128xf32> to vector<48xf32>
      %20 = vector.shape_cast %19 : vector<48xf32> to vector<48x1xf32>
      %cst_13 = arith.constant 1.280000e+02 : f32
      %21 = vector.broadcast %cst_13 : f32 to vector<48x1xf32>
      %22 = arith.divf %20, %21 : vector<48x1xf32>
      %23 = vector.broadcast %15 : vector<48x1xf32> to vector<48x128xf32>
      %24 = arith.subf %11, %23 : vector<48x128xf32>
      %cst_14 = arith.constant 9.99999974E-6 : f32
      %25 = vector.broadcast %cst_14 : f32 to vector<48x1xf32>
      %26 = arith.addf %22, %25 : vector<48x1xf32>
      %27 = math.rsqrt %26 : vector<48x1xf32>
      %28 = vector.broadcast %27 : vector<48x1xf32> to vector<48x128xf32>
      %29 = arith.mulf %24, %28 : vector<48x128xf32>
      %c0_15 = arith.constant 0 : index
      %c0_16 = arith.constant 0 : index
      %30 = vector.load %arg3[%c0_15, %c0_16] : memref<1x128xf32, #tpu.memory_space<vmem>>, vector<1x128xf32>
      %31 = vector.broadcast %30 : vector<1x128xf32> to vector<48x128xf32>
      %32 = arith.mulf %29, %31 : vector<48x128xf32>
      %c0_17 = arith.constant 0 : index
      %c0_18 = arith.constant 0 : index
      %33 = vector.load %arg4[%c0_17, %c0_18] : memref<1x128xf32, #tpu.memory_space<vmem>>, vector<1x128xf32>
      %34 = vector.broadcast %33 : vector<1x128xf32> to vector<48x128xf32>
      %35 = arith.addf %32, %34 : vector<48x128xf32>
      %36 = arith.truncf %35 : vector<48x128xf32> to vector<48x128xbf16>
      %c0_19 = arith.constant 0 : index
      %c0_20 = arith.constant 0 : index
      %37 = vector.load %arg8[%c0_19, %c0_20] : memref<48x128xbf16, #tpu.memory_space<vmem>>, vector<48x128xbf16>
      tpu.vector_store %arg8[%c0_19, %c0_20], %36 {strides = array<i32>} : memref<48x128xbf16, #tpu.memory_space<vmem>>, vector<48x128xbf16>,
    } else {
    }
    %c0 = arith.constant 0 : index
    %c0_1 = arith.constant 0 : index
    %3 = vector.load %arg8[%c0, %c0_1] : memref<48x128xbf16, #tpu.memory_space<vmem>>, vector<48x128xbf16>
    %c0_2 = arith.constant 0 : index
    %c0_3 = arith.constant 0 : index
    %4 = vector.load %arg5[%c0_2, %c0_3] : memref<128x128xbf16, #tpu.memory_space<vmem>>, vector<128x128xbf16>
    %cst = arith.constant dense<0.000000e+00> : vector<48x128xf32>
    %5 = tpu.matmul %3, %4, %cst {dimension_numbers = #tpu.dot_dimension_numbers<[1], [0], [0], [1], [0, 0, 1, 1], [], []>} : vector<48x128xbf16>, vector<128x128xbf16>, vector<48x128xf32> -> vector<48x128xf32>
    %c0_4 = arith.constant 0 : index
    %c0_5 = arith.constant 0 : index
    %6 = vector.load %arg6[%c0_4, %c0_5] : memref<1x128xf32, #tpu.memory_space<vmem>>, vector<1x128xf32>
    %7 = vector.broadcast %6 : vector<1x128xf32> to vector<48x128xf32>
    %8 = arith.addf %5, %7 : vector<48x128xf32>
    %9 = arith.truncf %8 : vector<48x128xf32> to vector<48x128xbf16>
    %c0_6 = arith.constant 0 : index
    %c0_7 = arith.constant 0 : index
    %10 = vector.load %arg7[%c0_6, %c0_7] : memref<48x128xbf16, #tpu.memory_space<vmem>>, vector<48x128xbf16>
    tpu.vector_store %arg7[%c0_6, %c0_7], %9 {strides = array<i32>} : memref<48x128xbf16, #tpu.memory_space<vmem>>, vector<48x128xbf16>,
    return
  }
  func.func @transform_0(%arg0: i32, %arg1: i32) -> (i32, i32) {
    %c0_i32 = arith.constant 0 : i32
    %c0_i32_0 = arith.constant 0 : i32
    return %arg0, %c0_i32 : i32, i32
  }
  func.func @transform_1(%arg0: i32, %arg1: i32) -> (i32, i32) {
    %c0_i32 = arith.constant 0 : i32
    %c0_i32_0 = arith.constant 0 : i32
    %c0_i32_1 = arith.constant 0 : i32
    return %c0_i32, %c0_i32_0 : i32, i32
  }
  func.func @transform_2(%arg0: i32, %arg1: i32) -> (i32, i32) {
    %c0_i32 = arith.constant 0 : i32
    %c0_i32_0 = arith.constant 0 : i32
    %c0_i32_1 = arith.constant 0 : i32
    return %c0_i32, %c0_i32_0 : i32, i32
  }
  func.func @transform_3(%arg0: i32, %arg1: i32) -> (i32, i32) {
    %c0_i32 = arith.constant 0 : i32
    %c0_i32_0 = arith.constant 0 : i32
    return %c0_i32, %arg1 : i32, i32
  }
  func.func @transform_4(%arg0: i32, %arg1: i32) -> (i32, i32) {
    %c0_i32 = arith.constant 0 : i32
    %c0_i32_0 = arith.constant 0 : i32
    return %c0_i32, %arg1 : i32, i32
  }
  func.func @transform_5(%arg0: i32, %arg1: i32) -> (i32, i32) {
    %c0_i32 = arith.constant 0 : i32
    return %arg0, %arg1 : i32, i32
  }
}

module attributes {stable_mosaic.version = 11 : i64} {
  func.func @_attention_kernel(%arg0: i32, %arg1: memref<1x8x384xbf16, #tpu.memory_space<vmem>>, %arg2: memref<1x1x8xf32, #tpu.memory_space<vmem>>, %arg3: memref<1x8x128xbf16, #tpu.memory_space<vmem>>) attributes {dimension_semantics = [#tpu.dimension_semantics<parallel>], iteration_bounds = array<i64: 6>, scalar_prefetch = 0 : i64, scratch_operands = 0 : i64, tpu.core_type = #tpu.core_type<tc>, window_params = [{transform_indices = @transform_0, window_bounds = array<i64: 1, 8, 384>}, {transform_indices = @transform_1, window_bounds = array<i64: 1, 1, 8>}, {transform_indices = @transform_2, window_bounds = array<i64: 1, 8, 128>}]} {
    %c0 = arith.constant 0 : index
    %c0_0 = arith.constant 0 : index
    %c0_1 = arith.constant 0 : index
    %0 = vector.load %arg1[%c0, %c0_0, %c0_1] : memref<1x8x384xbf16, #tpu.memory_space<vmem>>, vector<1x8x384xbf16>
    %1 = vector.shape_cast %0 : vector<1x8x384xbf16> to vector<8x384xbf16>
    %c0_2 = arith.constant 0 : index
    %c0_3 = arith.constant 0 : index
    %c0_4 = arith.constant 0 : index
    %2 = vector.load %arg2[%c0_2, %c0_3, %c0_4] : memref<1x1x8xf32, #tpu.memory_space<vmem>>, vector<1x1x8xf32>
    %3 = vector.shape_cast %2 : vector<1x1x8xf32> to vector<1x8xf32>
    %cst = arith.constant 5.000000e-01 : f32
    %4 = vector.broadcast %cst : f32 to vector<1x8xf32>
    %5 = arith.cmpf ogt, %3, %4 : vector<1x8xf32>
    %6 = tpu.iota {dimensions = array<i32: 0>} : vector<8x8xi32>
    %7 = tpu.iota {dimensions = array<i32: 1>} : vector<8x8xi32>
    %8 = arith.cmpi sle, %7, %6 : vector<8x8xi32>
    %9 = vector.broadcast %5 : vector<1x8xi1> to vector<8x8xi1>
    %10 = arith.andi %8, %9 : vector<8x8xi1>
    %cst_5 = arith.constant 6.400000e+01 : f32
    %11 = math.sqrt %cst_5 : f32
    %cst_6 = arith.constant 1.000000e+00 : f32
    %12 = arith.divf %cst_6, %11 : f32
    %13 = vector.extract_strided_slice %1 {offsets = [0, 0], sizes = [8, 64], strides = [1, 1]} : vector<8x384xbf16> to vector<8x64xbf16>
    %14 = vector.extract_strided_slice %1 {offsets = [0, 128], sizes = [8, 64], strides = [1, 1]} : vector<8x384xbf16> to vector<8x64xbf16>
    %15 = vector.extract_strided_slice %1 {offsets = [0, 256], sizes = [8, 64], strides = [1, 1]} : vector<8x384xbf16> to vector<8x64xbf16>
    %cst_7 = arith.constant dense<0.000000e+00> : vector<8x8xf32>
    %16 = tpu.matmul %13, %14, %cst_7 {dimension_numbers = #tpu.dot_dimension_numbers<[1], [1], [0], [0], [0, 0, 1, 0], [], []>} : vector<8x64xbf16>, vector<8x64xbf16>, vector<8x8xf32> -> vector<8x8xf32>
    %17 = vector.broadcast %12 : f32 to vector<8x8xf32>
    %18 = arith.mulf %16, %17 : vector<8x8xf32>
    %cst_8 = arith.constant -1.000000e+09 : f32
    %19 = vector.broadcast %cst_8 : f32 to vector<8x8xf32>
    %20 = arith.select %10, %18, %19 : vector<8x8xi1>, vector<8x8xf32>
    %cst_9 = arith.constant dense<0xFF800000> : vector<8xf32>
    %21 = vector.multi_reduction <maximumf>, %20, %cst_9 [1] : vector<8x8xf32> to vector<8xf32>
    %22 = vector.shape_cast %21 : vector<8xf32> to vector<8x1xf32>
    %23 = vector.broadcast %22 : vector<8x1xf32> to vector<8x8xf32>
    %24 = arith.subf %20, %23 : vector<8x8xf32>
    %25 = math.exp %24 : vector<8x8xf32>
    %cst_10 = arith.constant dense<0.000000e+00> : vector<8xf32>
    %26 = vector.multi_reduction <add>, %25, %cst_10 [1] : vector<8x8xf32> to vector<8xf32>
    %27 = vector.shape_cast %26 : vector<8xf32> to vector<8x1xf32>
    %28 = tpu.reciprocal %27 {approx = true} : vector<8x1xf32> -> vector<8x1xf32>
    %29 = vector.broadcast %28 : vector<8x1xf32> to vector<8x8xf32>
    %30 = arith.mulf %25, %29 : vector<8x8xf32>
    %31 = arith.truncf %30 : vector<8x8xf32> to vector<8x8xbf16>
    %cst_11 = arith.constant dense<0.000000e+00> : vector<8x64xf32>
    %32 = tpu.matmul %31, %15, %cst_11 {dimension_numbers = #tpu.dot_dimension_numbers<[1], [0], [0], [1], [0, 0, 1, 1], [], []>} : vector<8x8xbf16>, vector<8x64xbf16>, vector<8x64xf32> -> vector<8x64xf32>
    %33 = vector.extract_strided_slice %1 {offsets = [0, 64], sizes = [8, 64], strides = [1, 1]} : vector<8x384xbf16> to vector<8x64xbf16>
    %34 = vector.extract_strided_slice %1 {offsets = [0, 192], sizes = [8, 64], strides = [1, 1]} : vector<8x384xbf16> to vector<8x64xbf16>
    %35 = vector.extract_strided_slice %1 {offsets = [0, 320], sizes = [8, 64], strides = [1, 1]} : vector<8x384xbf16> to vector<8x64xbf16>
    %cst_12 = arith.constant dense<0.000000e+00> : vector<8x8xf32>
    %36 = tpu.matmul %33, %34, %cst_12 {dimension_numbers = #tpu.dot_dimension_numbers<[1], [1], [0], [0], [0, 0, 1, 0], [], []>} : vector<8x64xbf16>, vector<8x64xbf16>, vector<8x8xf32> -> vector<8x8xf32>
    %37 = vector.broadcast %12 : f32 to vector<8x8xf32>
    %38 = arith.mulf %36, %37 : vector<8x8xf32>
    %cst_13 = arith.constant -1.000000e+09 : f32
    %39 = vector.broadcast %cst_13 : f32 to vector<8x8xf32>
    %40 = arith.select %10, %38, %39 : vector<8x8xi1>, vector<8x8xf32>
    %cst_14 = arith.constant dense<0xFF800000> : vector<8xf32>
    %41 = vector.multi_reduction <maximumf>, %40, %cst_14 [1] : vector<8x8xf32> to vector<8xf32>
    %42 = vector.shape_cast %41 : vector<8xf32> to vector<8x1xf32>
    %43 = vector.broadcast %42 : vector<8x1xf32> to vector<8x8xf32>
    %44 = arith.subf %40, %43 : vector<8x8xf32>
    %45 = math.exp %44 : vector<8x8xf32>
    %cst_15 = arith.constant dense<0.000000e+00> : vector<8xf32>
    %46 = vector.multi_reduction <add>, %45, %cst_15 [1] : vector<8x8xf32> to vector<8xf32>
    %47 = vector.shape_cast %46 : vector<8xf32> to vector<8x1xf32>
    %48 = tpu.reciprocal %47 {approx = true} : vector<8x1xf32> -> vector<8x1xf32>
    %49 = vector.broadcast %48 : vector<8x1xf32> to vector<8x8xf32>
    %50 = arith.mulf %45, %49 : vector<8x8xf32>
    %51 = arith.truncf %50 : vector<8x8xf32> to vector<8x8xbf16>
    %cst_16 = arith.constant dense<0.000000e+00> : vector<8x64xf32>
    %52 = tpu.matmul %51, %35, %cst_16 {dimension_numbers = #tpu.dot_dimension_numbers<[1], [0], [0], [1], [0, 0, 1, 1], [], []>} : vector<8x8xbf16>, vector<8x64xbf16>, vector<8x64xf32> -> vector<8x64xf32>
    %53 = tpu.concatenate %32, %52 in 1 : vector<8x64xf32>, vector<8x64xf32> -> vector<8x128xf32>
    %54 = arith.truncf %53 : vector<8x128xf32> to vector<8x128xbf16>
    %c0_17 = arith.constant 0 : index
    %c0_18 = arith.constant 0 : index
    %c0_19 = arith.constant 0 : index
    %55 = vector.load %arg3[%c0_17, %c0_18, %c0_19] : memref<1x8x128xbf16, #tpu.memory_space<vmem>>, vector<1x8x128xbf16>
    %56 = vector.shape_cast %55 : vector<1x8x128xbf16> to vector<8x128xbf16>
    %57 = vector.shape_cast %54 : vector<8x128xbf16> to vector<1x8x128xbf16>
    tpu.vector_store %arg3[%c0_17, %c0_18, %c0_19], %57 {strides = array<i32>} : memref<1x8x128xbf16, #tpu.memory_space<vmem>>, vector<1x8x128xbf16>,
    return
  }
  func.func @transform_0(%arg0: i32) -> (i32, i32, i32) {
    %c0_i32 = arith.constant 0 : i32
    %c0_i32_0 = arith.constant 0 : i32
    %c0_i32_1 = arith.constant 0 : i32
    return %arg0, %c0_i32, %c0_i32_0 : i32, i32, i32
  }
  func.func @transform_1(%arg0: i32) -> (i32, i32, i32) {
    %c0_i32 = arith.constant 0 : i32
    %c0_i32_0 = arith.constant 0 : i32
    %c0_i32_1 = arith.constant 0 : i32
    return %arg0, %c0_i32, %c0_i32_0 : i32, i32, i32
  }
  func.func @transform_2(%arg0: i32) -> (i32, i32, i32) {
    %c0_i32 = arith.constant 0 : i32
    %c0_i32_0 = arith.constant 0 : i32
    %c0_i32_1 = arith.constant 0 : i32
    return %arg0, %c0_i32, %c0_i32_0 : i32, i32, i32
  }
}

module attributes {stable_mosaic.version = 11 : i64} {
  func.func @_matmul_bias_res_kernel(%arg0: i32, %arg1: i32, %arg2: memref<48x128xbf16, #tpu.memory_space<vmem>>, %arg3: memref<128x128xbf16, #tpu.memory_space<vmem>>, %arg4: memref<1x128xf32, #tpu.memory_space<vmem>>, %arg5: memref<48x128xf32, #tpu.memory_space<vmem>>, %arg6: memref<48x128xf32, #tpu.memory_space<vmem>>) attributes {dimension_semantics = [#tpu.dimension_semantics<parallel>, #tpu.dimension_semantics<parallel>], iteration_bounds = array<i64: 1, 1>, scalar_prefetch = 0 : i64, scratch_operands = 0 : i64, tpu.core_type = #tpu.core_type<tc>, window_params = [{transform_indices = @transform_0, window_bounds = array<i64: 48, 128>}, {transform_indices = @transform_1, window_bounds = array<i64: 128, 128>}, {transform_indices = @transform_2, window_bounds = array<i64: 1, 128>}, {transform_indices = @transform_3, window_bounds = array<i64: 48, 128>}, {transform_indices = @transform_4, window_bounds = array<i64: 48, 128>}]} {
    %c0 = arith.constant 0 : index
    %c0_0 = arith.constant 0 : index
    %0 = vector.load %arg2[%c0, %c0_0] : memref<48x128xbf16, #tpu.memory_space<vmem>>, vector<48x128xbf16>
    %c0_1 = arith.constant 0 : index
    %c0_2 = arith.constant 0 : index
    %1 = vector.load %arg3[%c0_1, %c0_2] : memref<128x128xbf16, #tpu.memory_space<vmem>>, vector<128x128xbf16>
    %cst = arith.constant dense<0.000000e+00> : vector<48x128xf32>
    %2 = tpu.matmul %0, %1, %cst {dimension_numbers = #tpu.dot_dimension_numbers<[1], [0], [0], [1], [0, 0, 1, 1], [], []>} : vector<48x128xbf16>, vector<128x128xbf16>, vector<48x128xf32> -> vector<48x128xf32>
    %c0_3 = arith.constant 0 : index
    %c0_4 = arith.constant 0 : index
    %3 = vector.load %arg5[%c0_3, %c0_4] : memref<48x128xf32, #tpu.memory_space<vmem>>, vector<48x128xf32>
    %4 = arith.addf %3, %2 : vector<48x128xf32>
    %c0_5 = arith.constant 0 : index
    %c0_6 = arith.constant 0 : index
    %5 = vector.load %arg4[%c0_5, %c0_6] : memref<1x128xf32, #tpu.memory_space<vmem>>, vector<1x128xf32>
    %6 = vector.broadcast %5 : vector<1x128xf32> to vector<48x128xf32>
    %7 = arith.addf %4, %6 : vector<48x128xf32>
    %c0_7 = arith.constant 0 : index
    %c0_8 = arith.constant 0 : index
    %8 = vector.load %arg6[%c0_7, %c0_8] : memref<48x128xf32, #tpu.memory_space<vmem>>, vector<48x128xf32>
    tpu.vector_store %arg6[%c0_7, %c0_8], %7 {strides = array<i32>} : memref<48x128xf32, #tpu.memory_space<vmem>>, vector<48x128xf32>,
    return
  }
  func.func @transform_0(%arg0: i32, %arg1: i32) -> (i32, i32) {
    %c0_i32 = arith.constant 0 : i32
    %c0_i32_0 = arith.constant 0 : i32
    return %arg0, %c0_i32 : i32, i32
  }
  func.func @transform_1(%arg0: i32, %arg1: i32) -> (i32, i32) {
    %c0_i32 = arith.constant 0 : i32
    %c0_i32_0 = arith.constant 0 : i32
    return %c0_i32, %arg1 : i32, i32
  }
  func.func @transform_2(%arg0: i32, %arg1: i32) -> (i32, i32) {
    %c0_i32 = arith.constant 0 : i32
    %c0_i32_0 = arith.constant 0 : i32
    return %c0_i32, %arg1 : i32, i32
  }
  func.func @transform_3(%arg0: i32, %arg1: i32) -> (i32, i32) {
    %c0_i32 = arith.constant 0 : i32
    return %arg0, %arg1 : i32, i32
  }
  func.func @transform_4(%arg0: i32, %arg1: i32) -> (i32, i32) {
    %c0_i32 = arith.constant 0 : i32
    return %arg0, %arg1 : i32, i32
  }
}

module attributes {stable_mosaic.version = 11 : i64} {
  func.func @_ln_matmul_kernel(%arg0: i32, %arg1: i32, %arg2: memref<48x128xf32, #tpu.memory_space<vmem>>, %arg3: memref<1x128xf32, #tpu.memory_space<vmem>>, %arg4: memref<1x128xf32, #tpu.memory_space<vmem>>, %arg5: memref<128x512xbf16, #tpu.memory_space<vmem>>, %arg6: memref<1x512xf32, #tpu.memory_space<vmem>>, %arg7: memref<48x512xbf16, #tpu.memory_space<vmem>>, %arg8: memref<48x128xbf16, #tpu.memory_space<vmem>>) attributes {dimension_semantics = [#tpu.dimension_semantics<parallel>, #tpu.dimension_semantics<arbitrary>], iteration_bounds = array<i64: 1, 1>, scalar_prefetch = 0 : i64, scratch_operands = 1 : i64, tpu.core_type = #tpu.core_type<tc>, window_params = [{transform_indices = @transform_0, window_bounds = array<i64: 48, 128>}, {pipeline_mode = #tpu.pipeline_mode<synchronous>, transform_indices = @transform_1, window_bounds = array<i64: 1, 128>}, {pipeline_mode = #tpu.pipeline_mode<synchronous>, transform_indices = @transform_2, window_bounds = array<i64: 1, 128>}, {transform_indices = @transform_3, window_bounds = array<i64: 128, 512>}, {transform_indices = @transform_4, window_bounds = array<i64: 1, 512>}, {transform_indices = @transform_5, window_bounds = array<i64: 48, 512>}]} {
    %c0_i32 = arith.constant 0 : i32
    %0 = arith.cmpi eq, %arg1, %c0_i32 : i32
    %1 = arith.extui %0 : i1 to i32
    %c0_i32_0 = arith.constant 0 : i32
    %2 = arith.cmpi ne, %1, %c0_i32_0 : i32
    scf.if %2 {
      %c0_12 = arith.constant 0 : index
      %c0_13 = arith.constant 0 : index
      %25 = vector.load %arg2[%c0_12, %c0_13] : memref<48x128xf32, #tpu.memory_space<vmem>>, vector<48x128xf32>
      %cst_14 = arith.constant dense<0.000000e+00> : vector<48xf32>
      %26 = vector.multi_reduction <add>, %25, %cst_14 [1] : vector<48x128xf32> to vector<48xf32>
      %27 = vector.shape_cast %26 : vector<48xf32> to vector<48x1xf32>
      %cst_15 = arith.constant 1.280000e+02 : f32
      %28 = vector.broadcast %cst_15 : f32 to vector<48x1xf32>
      %29 = arith.divf %27, %28 : vector<48x1xf32>
      %30 = vector.broadcast %29 : vector<48x1xf32> to vector<48x128xf32>
      %31 = arith.subf %25, %30 : vector<48x128xf32>
      %32 = arith.mulf %31, %31 : vector<48x128xf32>
      %cst_16 = arith.constant dense<0.000000e+00> : vector<48xf32>
      %33 = vector.multi_reduction <add>, %32, %cst_16 [1] : vector<48x128xf32> to vector<48xf32>
      %34 = vector.shape_cast %33 : vector<48xf32> to vector<48x1xf32>
      %cst_17 = arith.constant 1.280000e+02 : f32
      %35 = vector.broadcast %cst_17 : f32 to vector<48x1xf32>
      %36 = arith.divf %34, %35 : vector<48x1xf32>
      %37 = vector.broadcast %29 : vector<48x1xf32> to vector<48x128xf32>
      %38 = arith.subf %25, %37 : vector<48x128xf32>
      %cst_18 = arith.constant 9.99999974E-6 : f32
      %39 = vector.broadcast %cst_18 : f32 to vector<48x1xf32>
      %40 = arith.addf %36, %39 : vector<48x1xf32>
      %41 = math.rsqrt %40 : vector<48x1xf32>
      %42 = vector.broadcast %41 : vector<48x1xf32> to vector<48x128xf32>
      %43 = arith.mulf %38, %42 : vector<48x128xf32>
      %c0_19 = arith.constant 0 : index
      %c0_20 = arith.constant 0 : index
      %44 = vector.load %arg3[%c0_19, %c0_20] : memref<1x128xf32, #tpu.memory_space<vmem>>, vector<1x128xf32>
      %45 = vector.broadcast %44 : vector<1x128xf32> to vector<48x128xf32>
      %46 = arith.mulf %43, %45 : vector<48x128xf32>
      %c0_21 = arith.constant 0 : index
      %c0_22 = arith.constant 0 : index
      %47 = vector.load %arg4[%c0_21, %c0_22] : memref<1x128xf32, #tpu.memory_space<vmem>>, vector<1x128xf32>
      %48 = vector.broadcast %47 : vector<1x128xf32> to vector<48x128xf32>
      %49 = arith.addf %46, %48 : vector<48x128xf32>
      %50 = arith.truncf %49 : vector<48x128xf32> to vector<48x128xbf16>
      %c0_23 = arith.constant 0 : index
      %c0_24 = arith.constant 0 : index
      %51 = vector.load %arg8[%c0_23, %c0_24] : memref<48x128xbf16, #tpu.memory_space<vmem>>, vector<48x128xbf16>
      tpu.vector_store %arg8[%c0_23, %c0_24], %50 {strides = array<i32>} : memref<48x128xbf16, #tpu.memory_space<vmem>>, vector<48x128xbf16>,
    } else {
    }
    %c0 = arith.constant 0 : index
    %c0_1 = arith.constant 0 : index
    %3 = vector.load %arg8[%c0, %c0_1] : memref<48x128xbf16, #tpu.memory_space<vmem>>, vector<48x128xbf16>
    %c0_2 = arith.constant 0 : index
    %c0_3 = arith.constant 0 : index
    %4 = vector.load %arg5[%c0_2, %c0_3] : memref<128x512xbf16, #tpu.memory_space<vmem>>, vector<128x512xbf16>
    %cst = arith.constant dense<0.000000e+00> : vector<48x512xf32>
    %5 = tpu.matmul %3, %4, %cst {dimension_numbers = #tpu.dot_dimension_numbers<[1], [0], [0], [1], [0, 0, 1, 1], [], []>} : vector<48x128xbf16>, vector<128x512xbf16>, vector<48x512xf32> -> vector<48x512xf32>
    %c0_4 = arith.constant 0 : index
    %c0_5 = arith.constant 0 : index
    %6 = vector.load %arg6[%c0_4, %c0_5] : memref<1x512xf32, #tpu.memory_space<vmem>>, vector<1x512xf32>
    %7 = vector.broadcast %6 : vector<1x512xf32> to vector<48x512xf32>
    %8 = arith.addf %5, %7 : vector<48x512xf32>
    %cst_6 = arith.constant 0.636619746 : f32
    %9 = math.sqrt %cst_6 : f32
    %cst_7 = arith.constant 5.000000e-01 : f32
    %10 = vector.broadcast %cst_7 : f32 to vector<48x512xf32>
    %11 = arith.mulf %10, %8 : vector<48x512xf32>
    %cst_8 = arith.constant 4.471500e-02 : f32
    %12 = vector.broadcast %cst_8 : f32 to vector<48x512xf32>
    %13 = arith.mulf %12, %8 : vector<48x512xf32>
    %14 = arith.mulf %13, %8 : vector<48x512xf32>
    %15 = arith.mulf %14, %8 : vector<48x512xf32>
    %16 = arith.addf %8, %15 : vector<48x512xf32>
    %17 = vector.broadcast %9 : f32 to vector<48x512xf32>
    %18 = arith.mulf %17, %16 : vector<48x512xf32>
    %19 = math.tanh %18 : vector<48x512xf32>
    %cst_9 = arith.constant 1.000000e+00 : f32
    %20 = vector.broadcast %cst_9 : f32 to vector<48x512xf32>
    %21 = arith.addf %20, %19 : vector<48x512xf32>
    %22 = arith.mulf %11, %21 : vector<48x512xf32>
    %23 = arith.truncf %22 : vector<48x512xf32> to vector<48x512xbf16>
    %c0_10 = arith.constant 0 : index
    %c0_11 = arith.constant 0 : index
    %24 = vector.load %arg7[%c0_10, %c0_11] : memref<48x512xbf16, #tpu.memory_space<vmem>>, vector<48x512xbf16>
    tpu.vector_store %arg7[%c0_10, %c0_11], %23 {strides = array<i32>} : memref<48x512xbf16, #tpu.memory_space<vmem>>, vector<48x512xbf16>,
    return
  }
  func.func @transform_0(%arg0: i32, %arg1: i32) -> (i32, i32) {
    %c0_i32 = arith.constant 0 : i32
    %c0_i32_0 = arith.constant 0 : i32
    return %arg0, %c0_i32 : i32, i32
  }
  func.func @transform_1(%arg0: i32, %arg1: i32) -> (i32, i32) {
    %c0_i32 = arith.constant 0 : i32
    %c0_i32_0 = arith.constant 0 : i32
    %c0_i32_1 = arith.constant 0 : i32
    return %c0_i32, %c0_i32_0 : i32, i32
  }
  func.func @transform_2(%arg0: i32, %arg1: i32) -> (i32, i32) {
    %c0_i32 = arith.constant 0 : i32
    %c0_i32_0 = arith.constant 0 : i32
    %c0_i32_1 = arith.constant 0 : i32
    return %c0_i32, %c0_i32_0 : i32, i32
  }
  func.func @transform_3(%arg0: i32, %arg1: i32) -> (i32, i32) {
    %c0_i32 = arith.constant 0 : i32
    %c0_i32_0 = arith.constant 0 : i32
    return %c0_i32, %arg1 : i32, i32
  }
  func.func @transform_4(%arg0: i32, %arg1: i32) -> (i32, i32) {
    %c0_i32 = arith.constant 0 : i32
    %c0_i32_0 = arith.constant 0 : i32
    return %c0_i32, %arg1 : i32, i32
  }
  func.func @transform_5(%arg0: i32, %arg1: i32) -> (i32, i32) {
    %c0_i32 = arith.constant 0 : i32
    return %arg0, %arg1 : i32, i32
  }
}

module attributes {stable_mosaic.version = 11 : i64} {
  func.func @_layernorm_kernel(%arg0: i32, %arg1: memref<48x128xf32, #tpu.memory_space<vmem>>, %arg2: memref<1x128xf32, #tpu.memory_space<vmem>>, %arg3: memref<1x128xf32, #tpu.memory_space<vmem>>, %arg4: memref<48x128xbf16, #tpu.memory_space<vmem>>) attributes {dimension_semantics = [#tpu.dimension_semantics<parallel>], iteration_bounds = array<i64: 1>, scalar_prefetch = 0 : i64, scratch_operands = 0 : i64, tpu.core_type = #tpu.core_type<tc>, window_params = [{transform_indices = @transform_0, window_bounds = array<i64: 48, 128>}, {pipeline_mode = #tpu.pipeline_mode<synchronous>, transform_indices = @transform_1, window_bounds = array<i64: 1, 128>}, {pipeline_mode = #tpu.pipeline_mode<synchronous>, transform_indices = @transform_2, window_bounds = array<i64: 1, 128>}, {transform_indices = @transform_3, window_bounds = array<i64: 48, 128>}]} {
    %c0 = arith.constant 0 : index
    %c0_0 = arith.constant 0 : index
    %0 = vector.load %arg1[%c0, %c0_0] : memref<48x128xf32, #tpu.memory_space<vmem>>, vector<48x128xf32>
    %cst = arith.constant dense<0.000000e+00> : vector<48xf32>
    %1 = vector.multi_reduction <add>, %0, %cst [1] : vector<48x128xf32> to vector<48xf32>
    %2 = vector.shape_cast %1 : vector<48xf32> to vector<48x1xf32>
    %cst_1 = arith.constant 1.280000e+02 : f32
    %3 = vector.broadcast %cst_1 : f32 to vector<48x1xf32>
    %4 = arith.divf %2, %3 : vector<48x1xf32>
    %5 = vector.broadcast %4 : vector<48x1xf32> to vector<48x128xf32>
    %6 = arith.subf %0, %5 : vector<48x128xf32>
    %7 = arith.mulf %6, %6 : vector<48x128xf32>
    %cst_2 = arith.constant dense<0.000000e+00> : vector<48xf32>
    %8 = vector.multi_reduction <add>, %7, %cst_2 [1] : vector<48x128xf32> to vector<48xf32>
    %9 = vector.shape_cast %8 : vector<48xf32> to vector<48x1xf32>
    %cst_3 = arith.constant 1.280000e+02 : f32
    %10 = vector.broadcast %cst_3 : f32 to vector<48x1xf32>
    %11 = arith.divf %9, %10 : vector<48x1xf32>
    %12 = vector.broadcast %4 : vector<48x1xf32> to vector<48x128xf32>
    %13 = arith.subf %0, %12 : vector<48x128xf32>
    %cst_4 = arith.constant 9.99999974E-6 : f32
    %14 = vector.broadcast %cst_4 : f32 to vector<48x1xf32>
    %15 = arith.addf %11, %14 : vector<48x1xf32>
    %16 = math.rsqrt %15 : vector<48x1xf32>
    %17 = vector.broadcast %16 : vector<48x1xf32> to vector<48x128xf32>
    %18 = arith.mulf %13, %17 : vector<48x128xf32>
    %c0_5 = arith.constant 0 : index
    %c0_6 = arith.constant 0 : index
    %19 = vector.load %arg2[%c0_5, %c0_6] : memref<1x128xf32, #tpu.memory_space<vmem>>, vector<1x128xf32>
    %20 = vector.broadcast %19 : vector<1x128xf32> to vector<48x128xf32>
    %21 = arith.mulf %18, %20 : vector<48x128xf32>
    %c0_7 = arith.constant 0 : index
    %c0_8 = arith.constant 0 : index
    %22 = vector.load %arg3[%c0_7, %c0_8] : memref<1x128xf32, #tpu.memory_space<vmem>>, vector<1x128xf32>
    %23 = vector.broadcast %22 : vector<1x128xf32> to vector<48x128xf32>
    %24 = arith.addf %21, %23 : vector<48x128xf32>
    %25 = arith.truncf %24 : vector<48x128xf32> to vector<48x128xbf16>
    %c0_9 = arith.constant 0 : index
    %c0_10 = arith.constant 0 : index
    %26 = vector.load %arg4[%c0_9, %c0_10] : memref<48x128xbf16, #tpu.memory_space<vmem>>, vector<48x128xbf16>
    tpu.vector_store %arg4[%c0_9, %c0_10], %25 {strides = array<i32>} : memref<48x128xbf16, #tpu.memory_space<vmem>>, vector<48x128xbf16>,
    return
  }
  func.func @transform_0(%arg0: i32) -> (i32, i32) {
    %c0_i32 = arith.constant 0 : i32
    %c0_i32_0 = arith.constant 0 : i32
    return %arg0, %c0_i32 : i32, i32
  }
  func.func @transform_1(%arg0: i32) -> (i32, i32) {
    %c0_i32 = arith.constant 0 : i32
    %c0_i32_0 = arith.constant 0 : i32
    %c0_i32_1 = arith.constant 0 : i32
    return %c0_i32, %c0_i32_0 : i32, i32
  }
  func.func @transform_2(%arg0: i32) -> (i32, i32) {
    %c0_i32 = arith.constant 0 : i32
    %c0_i32_0 = arith.constant 0 : i32
    %c0_i32_1 = arith.constant 0 : i32
    return %c0_i32, %c0_i32_0 : i32, i32
  }
  func.func @transform_3(%arg0: i32) -> (i32, i32) {
    %c0_i32 = arith.constant 0 : i32
    %c0_i32_0 = arith.constant 0 : i32
    return %arg0, %c0_i32 : i32, i32
  }
}

module attributes {stable_mosaic.version = 11 : i64} {
  func.func @_matmul_bias_res_kernel(%arg0: i32, %arg1: i32, %arg2: memref<48x512xbf16, #tpu.memory_space<vmem>>, %arg3: memref<512x128xbf16, #tpu.memory_space<vmem>>, %arg4: memref<1x128xf32, #tpu.memory_space<vmem>>, %arg5: memref<48x128xf32, #tpu.memory_space<vmem>>, %arg6: memref<48x128xf32, #tpu.memory_space<vmem>>) attributes {dimension_semantics = [#tpu.dimension_semantics<parallel>, #tpu.dimension_semantics<parallel>], iteration_bounds = array<i64: 1, 1>, scalar_prefetch = 0 : i64, scratch_operands = 0 : i64, tpu.core_type = #tpu.core_type<tc>, window_params = [{transform_indices = @transform_0, window_bounds = array<i64: 48, 512>}, {transform_indices = @transform_1, window_bounds = array<i64: 512, 128>}, {transform_indices = @transform_2, window_bounds = array<i64: 1, 128>}, {transform_indices = @transform_3, window_bounds = array<i64: 48, 128>}, {transform_indices = @transform_4, window_bounds = array<i64: 48, 128>}]} {
    %c0 = arith.constant 0 : index
    %c0_0 = arith.constant 0 : index
    %0 = vector.load %arg2[%c0, %c0_0] : memref<48x512xbf16, #tpu.memory_space<vmem>>, vector<48x512xbf16>
    %c0_1 = arith.constant 0 : index
    %c0_2 = arith.constant 0 : index
    %1 = vector.load %arg3[%c0_1, %c0_2] : memref<512x128xbf16, #tpu.memory_space<vmem>>, vector<512x128xbf16>
    %cst = arith.constant dense<0.000000e+00> : vector<48x128xf32>
    %2 = tpu.matmul %0, %1, %cst {dimension_numbers = #tpu.dot_dimension_numbers<[1], [0], [0], [1], [0, 0, 1, 1], [], []>} : vector<48x512xbf16>, vector<512x128xbf16>, vector<48x128xf32> -> vector<48x128xf32>
    %c0_3 = arith.constant 0 : index
    %c0_4 = arith.constant 0 : index
    %3 = vector.load %arg5[%c0_3, %c0_4] : memref<48x128xf32, #tpu.memory_space<vmem>>, vector<48x128xf32>
    %4 = arith.addf %3, %2 : vector<48x128xf32>
    %c0_5 = arith.constant 0 : index
    %c0_6 = arith.constant 0 : index
    %5 = vector.load %arg4[%c0_5, %c0_6] : memref<1x128xf32, #tpu.memory_space<vmem>>, vector<1x128xf32>
    %6 = vector.broadcast %5 : vector<1x128xf32> to vector<48x128xf32>
    %7 = arith.addf %4, %6 : vector<48x128xf32>
    %c0_7 = arith.constant 0 : index
    %c0_8 = arith.constant 0 : index
    %8 = vector.load %arg6[%c0_7, %c0_8] : memref<48x128xf32, #tpu.memory_space<vmem>>, vector<48x128xf32>
    tpu.vector_store %arg6[%c0_7, %c0_8], %7 {strides = array<i32>} : memref<48x128xf32, #tpu.memory_space<vmem>>, vector<48x128xf32>,
    return
  }
  func.func @transform_0(%arg0: i32, %arg1: i32) -> (i32, i32) {
    %c0_i32 = arith.constant 0 : i32
    %c0_i32_0 = arith.constant 0 : i32
    return %arg0, %c0_i32 : i32, i32
  }
  func.func @transform_1(%arg0: i32, %arg1: i32) -> (i32, i32) {
    %c0_i32 = arith.constant 0 : i32
    %c0_i32_0 = arith.constant 0 : i32
    return %c0_i32, %arg1 : i32, i32
  }
  func.func @transform_2(%arg0: i32, %arg1: i32) -> (i32, i32) {
    %c0_i32 = arith.constant 0 : i32
    %c0_i32_0 = arith.constant 0 : i32
    return %c0_i32, %arg1 : i32, i32
  }
  func.func @transform_3(%arg0: i32, %arg1: i32) -> (i32, i32) {
    %c0_i32 = arith.constant 0 : i32
    return %arg0, %arg1 : i32, i32
  }
  func.func @transform_4(%arg0: i32, %arg1: i32) -> (i32, i32) {
    %c0_i32 = arith.constant 0 : i32
    return %arg0, %arg1 : i32, i32
  }
}

module attributes {stable_mosaic.version = 11 : i64} {
  func.func @_lmhead_ce_kernel(%arg0: i32, %arg1: i32, %arg2: memref<128x24xbf16, #tpu.memory_space<vmem>>, %arg3: memref<256x128xbf16, #tpu.memory_space<vmem>>, %arg4: memref<1x24xi32, #tpu.memory_space<vmem>>, %arg5: memref<1x1x24xf32, #tpu.memory_space<vmem>>, %arg6: memref<1x1x24xf32, #tpu.memory_space<vmem>>, %arg7: memref<1x1x24xf32, #tpu.memory_space<vmem>>) attributes {dimension_semantics = [#tpu.dimension_semantics<parallel>, #tpu.dimension_semantics<arbitrary>], iteration_bounds = array<i64: 1, 1>, scalar_prefetch = 0 : i64, scratch_operands = 0 : i64, tpu.core_type = #tpu.core_type<tc>, window_params = [{pipeline_mode = #tpu.pipeline_mode<synchronous>, transform_indices = @transform_0, window_bounds = array<i64: 128, 24>}, {transform_indices = @transform_1, window_bounds = array<i64: 256, 128>}, {pipeline_mode = #tpu.pipeline_mode<synchronous>, transform_indices = @transform_2, window_bounds = array<i64: 1, 24>}, {transform_indices = @transform_3, window_bounds = array<i64: 1, 1, 24>}, {transform_indices = @transform_4, window_bounds = array<i64: 1, 1, 24>}, {transform_indices = @transform_5, window_bounds = array<i64: 1, 1, 24>}]} {
    %c0_i32 = arith.constant 0 : i32
    %0 = arith.cmpi eq, %arg1, %c0_i32 : i32
    %1 = arith.extui %0 : i1 to i32
    %c0_i32_0 = arith.constant 0 : i32
    %2 = arith.cmpi ne, %1, %c0_i32_0 : i32
    scf.if %2 {
      %cst_31 = arith.constant -1.000000e+30 : f32
      %53 = vector.broadcast %cst_31 : f32 to vector<1x24xf32>
      %c0_32 = arith.constant 0 : index
      %c0_33 = arith.constant 0 : index
      %c0_34 = arith.constant 0 : index
      %54 = vector.load %arg5[%c0_32, %c0_33, %c0_34] : memref<1x1x24xf32, #tpu.memory_space<vmem>>, vector<1x1x24xf32>
      %55 = vector.shape_cast %54 : vector<1x1x24xf32> to vector<1x24xf32>
      %56 = vector.shape_cast %53 : vector<1x24xf32> to vector<1x1x24xf32>
      tpu.vector_store %arg5[%c0_32, %c0_33, %c0_34], %56 {strides = array<i32>} : memref<1x1x24xf32, #tpu.memory_space<vmem>>, vector<1x1x24xf32>,
      %cst_35 = arith.constant 0.000000e+00 : f32
      %57 = vector.broadcast %cst_35 : f32 to vector<1x24xf32>
      %c0_36 = arith.constant 0 : index
      %c0_37 = arith.constant 0 : index
      %c0_38 = arith.constant 0 : index
      %58 = vector.load %arg6[%c0_36, %c0_37, %c0_38] : memref<1x1x24xf32, #tpu.memory_space<vmem>>, vector<1x1x24xf32>
      %59 = vector.shape_cast %58 : vector<1x1x24xf32> to vector<1x24xf32>
      %60 = vector.shape_cast %57 : vector<1x24xf32> to vector<1x1x24xf32>
      tpu.vector_store %arg6[%c0_36, %c0_37, %c0_38], %60 {strides = array<i32>} : memref<1x1x24xf32, #tpu.memory_space<vmem>>, vector<1x1x24xf32>,
      %cst_39 = arith.constant 0.000000e+00 : f32
      %61 = vector.broadcast %cst_39 : f32 to vector<1x24xf32>
      %c0_40 = arith.constant 0 : index
      %c0_41 = arith.constant 0 : index
      %c0_42 = arith.constant 0 : index
      %62 = vector.load %arg7[%c0_40, %c0_41, %c0_42] : memref<1x1x24xf32, #tpu.memory_space<vmem>>, vector<1x1x24xf32>
      %63 = vector.shape_cast %62 : vector<1x1x24xf32> to vector<1x24xf32>
      %64 = vector.shape_cast %61 : vector<1x24xf32> to vector<1x1x24xf32>
      tpu.vector_store %arg7[%c0_40, %c0_41, %c0_42], %64 {strides = array<i32>} : memref<1x1x24xf32, #tpu.memory_space<vmem>>, vector<1x1x24xf32>,
    } else {
    }
    %c0 = arith.constant 0 : index
    %c0_1 = arith.constant 0 : index
    %3 = vector.load %arg3[%c0, %c0_1] : memref<256x128xbf16, #tpu.memory_space<vmem>>, vector<256x128xbf16>
    %c0_2 = arith.constant 0 : index
    %c0_3 = arith.constant 0 : index
    %4 = vector.load %arg2[%c0_2, %c0_3] : memref<128x24xbf16, #tpu.memory_space<vmem>>, vector<128x24xbf16>
    %cst = arith.constant dense<0.000000e+00> : vector<256x24xf32>
    %5 = tpu.matmul %3, %4, %cst {dimension_numbers = #tpu.dot_dimension_numbers<[1], [0], [0], [1], [0, 0, 1, 1], [], []>} : vector<256x128xbf16>, vector<128x24xbf16>, vector<256x24xf32> -> vector<256x24xf32>
    %c1_i32 = arith.constant 1 : i32
    %6 = arith.muli %arg0, %c1_i32 : i32
    %7 = arith.addi %6, %arg1 : i32
    %c256_i32 = arith.constant 256 : i32
    %8 = arith.muli %7, %c256_i32 : i32
    %9 = tpu.iota {dimensions = array<i32: 0>} : vector<256x24xi32>
    %10 = vector.broadcast %8 : i32 to vector<256x24xi32>
    %11 = arith.addi %9, %10 : vector<256x24xi32>
    %c256_i32_4 = arith.constant 256 : i32
    %12 = vector.broadcast %c256_i32_4 : i32 to vector<256x24xi32>
    %13 = arith.cmpi slt, %11, %12 : vector<256x24xi32>
    %c0_5 = arith.constant 0 : index
    %c0_6 = arith.constant 0 : index
    %14 = vector.load %arg4[%c0_5, %c0_6] : memref<1x24xi32, #tpu.memory_space<vmem>>, vector<1x24xi32>
    %c0_7 = arith.constant 0 : index
    %c0_8 = arith.constant 0 : index
    %c0_9 = arith.constant 0 : index
    %15 = vector.load %arg7[%c0_7, %c0_8, %c0_9] : memref<1x1x24xf32, #tpu.memory_space<vmem>>, vector<1x1x24xf32>
    %16 = vector.shape_cast %15 : vector<1x1x24xf32> to vector<1x24xf32>
    %17 = vector.broadcast %14 : vector<1x24xi32> to vector<256x24xi32>
    %18 = arith.cmpi eq, %11, %17 : vector<256x24xi32>
    %cst_10 = arith.constant 0.000000e+00 : f32
    %19 = vector.broadcast %cst_10 : f32 to vector<256x24xf32>
    %20 = arith.select %18, %5, %19 : vector<256x24xi1>, vector<256x24xf32>
    %cst_11 = arith.constant dense<0.000000e+00> : vector<24xf32>
    %21 = vector.multi_reduction <add>, %20, %cst_11 [0] : vector<256x24xf32> to vector<24xf32>
    %22 = vector.shape_cast %21 : vector<24xf32> to vector<1x24xf32>
    %23 = arith.addf %16, %22 : vector<1x24xf32>
    %c0_12 = arith.constant 0 : index
    %c0_13 = arith.constant 0 : index
    %c0_14 = arith.constant 0 : index
    %24 = vector.load %arg7[%c0_12, %c0_13, %c0_14] : memref<1x1x24xf32, #tpu.memory_space<vmem>>, vector<1x1x24xf32>
    %25 = vector.shape_cast %24 : vector<1x1x24xf32> to vector<1x24xf32>
    %26 = vector.shape_cast %23 : vector<1x24xf32> to vector<1x1x24xf32>
    tpu.vector_store %arg7[%c0_12, %c0_13, %c0_14], %26 {strides = array<i32>} : memref<1x1x24xf32, #tpu.memory_space<vmem>>, vector<1x1x24xf32>,
    %cst_15 = arith.constant -1.000000e+30 : f32
    %27 = vector.broadcast %cst_15 : f32 to vector<256x24xf32>
    %28 = arith.select %13, %5, %27 : vector<256x24xi1>, vector<256x24xf32>
    %c0_16 = arith.constant 0 : index
    %c0_17 = arith.constant 0 : index
    %c0_18 = arith.constant 0 : index
    %29 = vector.load %arg5[%c0_16, %c0_17, %c0_18] : memref<1x1x24xf32, #tpu.memory_space<vmem>>, vector<1x1x24xf32>
    %30 = vector.shape_cast %29 : vector<1x1x24xf32> to vector<1x24xf32>
    %cst_19 = arith.constant dense<0xFF800000> : vector<24xf32>
    %31 = vector.multi_reduction <maximumf>, %28, %cst_19 [0] : vector<256x24xf32> to vector<24xf32>
    %32 = vector.shape_cast %31 : vector<24xf32> to vector<1x24xf32>
    %33 = arith.maximumf %30, %32 : vector<1x24xf32>
    %34 = vector.broadcast %33 : vector<1x24xf32> to vector<256x24xf32>
    %35 = arith.subf %28, %34 : vector<256x24xf32>
    %36 = math.exp %35 : vector<256x24xf32>
    %cst_20 = arith.constant 0.000000e+00 : f32
    %37 = vector.broadcast %cst_20 : f32 to vector<256x24xf32>
    %38 = arith.select %13, %36, %37 : vector<256x24xi1>, vector<256x24xf32>
    %c0_21 = arith.constant 0 : index
    %c0_22 = arith.constant 0 : index
    %c0_23 = arith.constant 0 : index
    %39 = vector.load %arg6[%c0_21, %c0_22, %c0_23] : memref<1x1x24xf32, #tpu.memory_space<vmem>>, vector<1x1x24xf32>
    %40 = vector.shape_cast %39 : vector<1x1x24xf32> to vector<1x24xf32>
    %41 = arith.subf %30, %33 : vector<1x24xf32>
    %42 = math.exp %41 : vector<1x24xf32>
    %43 = arith.mulf %40, %42 : vector<1x24xf32>
    %cst_24 = arith.constant dense<0.000000e+00> : vector<24xf32>
    %44 = vector.multi_reduction <add>, %38, %cst_24 [0] : vector<256x24xf32> to vector<24xf32>
    %45 = vector.shape_cast %44 : vector<24xf32> to vector<1x24xf32>
    %46 = arith.addf %43, %45 : vector<1x24xf32>
    %c0_25 = arith.constant 0 : index
    %c0_26 = arith.constant 0 : index
    %c0_27 = arith.constant 0 : index
    %47 = vector.load %arg6[%c0_25, %c0_26, %c0_27] : memref<1x1x24xf32, #tpu.memory_space<vmem>>, vector<1x1x24xf32>
    %48 = vector.shape_cast %47 : vector<1x1x24xf32> to vector<1x24xf32>
    %49 = vector.shape_cast %46 : vector<1x24xf32> to vector<1x1x24xf32>
    tpu.vector_store %arg6[%c0_25, %c0_26, %c0_27], %49 {strides = array<i32>} : memref<1x1x24xf32, #tpu.memory_space<vmem>>, vector<1x1x24xf32>,
    %c0_28 = arith.constant 0 : index
    %c0_29 = arith.constant 0 : index
    %c0_30 = arith.constant 0 : index
    %50 = vector.load %arg5[%c0_28, %c0_29, %c0_30] : memref<1x1x24xf32, #tpu.memory_space<vmem>>, vector<1x1x24xf32>
    %51 = vector.shape_cast %50 : vector<1x1x24xf32> to vector<1x24xf32>
    %52 = vector.shape_cast %33 : vector<1x24xf32> to vector<1x1x24xf32>
    tpu.vector_store %arg5[%c0_28, %c0_29, %c0_30], %52 {strides = array<i32>} : memref<1x1x24xf32, #tpu.memory_space<vmem>>, vector<1x1x24xf32>,
    return
  }
  func.func @transform_0(%arg0: i32, %arg1: i32) -> (i32, i32) {
    %c0_i32 = arith.constant 0 : i32
    %c0_i32_0 = arith.constant 0 : i32
    %c0_i32_1 = arith.constant 0 : i32
    return %c0_i32, %c0_i32_0 : i32, i32
  }
  func.func @transform_1(%arg0: i32, %arg1: i32) -> (i32, i32) {
    %c1_i32 = arith.constant 1 : i32
    %0 = arith.muli %arg0, %c1_i32 : i32
    %1 = arith.addi %0, %arg1 : i32
    %c0_i32 = arith.constant 0 : i32
    %c0_i32_0 = arith.constant 0 : i32
    return %1, %c0_i32 : i32, i32
  }
  func.func @transform_2(%arg0: i32, %arg1: i32) -> (i32, i32) {
    %c0_i32 = arith.constant 0 : i32
    %c0_i32_0 = arith.constant 0 : i32
    %c0_i32_1 = arith.constant 0 : i32
    return %c0_i32, %c0_i32_0 : i32, i32
  }
  func.func @transform_3(%arg0: i32, %arg1: i32) -> (i32, i32, i32) {
    %c0_i32 = arith.constant 0 : i32
    %c0_i32_0 = arith.constant 0 : i32
    %c0_i32_1 = arith.constant 0 : i32
    return %arg0, %c0_i32, %c0_i32_0 : i32, i32, i32
  }
  func.func @transform_4(%arg0: i32, %arg1: i32) -> (i32, i32, i32) {
    %c0_i32 = arith.constant 0 : i32
    %c0_i32_0 = arith.constant 0 : i32
    %c0_i32_1 = arith.constant 0 : i32
    return %arg0, %c0_i32, %c0_i32_0 : i32, i32, i32
  }
  func.func @transform_5(%arg0: i32, %arg1: i32) -> (i32, i32, i32) {
    %c0_i32 = arith.constant 0 : i32
    %c0_i32_0 = arith.constant 0 : i32
    %c0_i32_1 = arith.constant 0 : i32
    return %arg0, %c0_i32, %c0_i32_0 : i32, i32, i32
  }
}

</mosaic_0001>

<bundles_post_ra>
// kernel: gpt2_target_likelihood.12
= control target key start
LH: loop header
LB: loop body
LE: loop exit
PB: predicated region body
PF: predicated region fallthrough
CT: control target
= control target key end

     0   :  { %s1047_s18 = smov 0   ;;  %s1049_s19 = smov 0   ;;  %s1199_s0 = inlined_call_operand.vmem [shape: f32[48,128], index: 0, kind: input, shape index: {}]   ;;  %s1200_s1 = inlined_call_operand.vmem [shape: f32[1,128], index: 1, kind: input, shape index: {}]   ;;  %s1201_s2 = inlined_call_operand.vmem [shape: f32[1,128], index: 2, kind: input, shape index: {}]   ;;  %s1202_s3 = inlined_call_operand.vmem [shape: bf16[128,384], index: 3, kind: input, shape index: {}]   ;;  %s1203_s4 = inlined_call_operand.vmem [shape: f32[1,384], index: 4, kind: input, shape index: {}]   ;;  %s1204_s5 = inlined_call_operand.vmem [shape: bf16[48,384], index: 5, kind: output, shape index: {}]  }
   0x1   :  { %s1051_s20 = smov 0   ;;  %s1053_s21 = smov 0  }
   0x2   :  { %s1055_s22 = smov 0  }
   0x3 LB: > { %s24_s23 = sadd.s32 1, %s1009_s21  ;;  %s804_s24 = sadd.s32 4294967295, %s1013_s22   ;;  %s1013_s22 = sphi %s1055_s22, %s15_s22   ;;  %s1009_s21 = sphi %s1053_s21, %s1209_s21   ;;  %s1005_s20 = sphi %s1051_s20, %s1208_s20   ;;  %s1001_s19 = sphi %s1049_s19, %s1207_s19   ;;  %s997_s18 = sphi %s1047_s18, %s1206_s18  }
   0x4   : > { %p25_p0 = scmp.ge.s32.totalorder %s24_s23, 3  ;;  %p109_p1 = scmp.ne.s32.totalorder %s1001_s19, %s997_s18 }
   0x5   : > { %p110_p2 = scmp.eq.s32.totalorder %s1013_s22, 0  ;;  %p167_p4 = scmp.eq.s32.totalorder %s804_s24, 2 }
   0x6   : > { %s1211_s23 = smov (%p25_p0, %s24_s23), 0  ;;  %s102_s26 = sadd.s32 1, %s1001_s19 }
   0x7   : > { %p111_p3 = por %p110_p2, %p109_p1  ;;  %s99_s25 = ssub.s32 %s1009_s21, %s1211_s23 }
   0x8   : > { %p100_p5 = scmp.eq.s32.totalorder %s99_s25, 0  ;;  %p1082_p6 = por %p167_p4, %p109_p1 }
   0x9   : > { %p808_p7 = scmp.ge.s32.totalorder %s1013_s22, 3 }
   0xa   : > { %s1087_s28 = scalar_select %p100_p5, %s1001_s19, %s102_s26  }
   0xb   : > { %204 = sbr.rel (%p808_p7) target bundleno = 32 (0x20), region = 28 }
  0x12   : > { %207 = sbr.rel (!%p111_p3) target bundleno = 32 (0x20), region = 32  ;;  %s209_s29 = sand.u32 (%p111_p3), 1, %s1001_s19  }
  0x13   : > { %s810_s30 = sshll.u32 (%p111_p3), %s1009_s21, 2  ;;  %s809_s6 = sshll.u32 (%p111_p3), %s209_s29, 6 }
  0x14   : > { %s1095_s9 = scalar_lea.vmem (%p111_p3), %s1202_s3, %s810_s30  ;;  %s211_s10 = scalar_lea.vmem (%p111_p3), [#allocation3], %s809_s6 }
  0x15   : > { %v229_v0 = vld [vmem:[%s1095_s9] sm:$0xf] (%p111_p3)  ;;  %v231_v1 = vld [vmem:[%s1095_s9 + $0xc] sm:$0xf] (%p111_p3)  ;;  %v233_v2 = vld [vmem:[%s1095_s9 + $0x18] sm:$0xf] (%p111_p3) }
  0x16   : > { %230 = vst [vmem:[%s211_s10] sm:$0xf] (%p111_p3), %v229_v0  ;;  %232 = vst [vmem:[%s211_s10 + $0x4] sm:$0xf] (%p111_p3), %v231_v1  ;;  %v235_v3 = vld [vmem:[%s1095_s9 + $0x24] sm:$0xf] (%p111_p3) }
  0x17   : > { %v237_v4 = vld [vmem:[%s1095_s9 + $0x30] sm:$0xf] (%p111_p3)  ;;  %234 = vst [vmem:[%s211_s10 + $0x8] sm:$0xf] (%p111_p3), %v233_v2  ;;  %236 = vst [vmem:[%s211_s10 + $0xc] sm:$0xf] (%p111_p3), %v235_v3 }
  0x18   : > { %238 = vst [vmem:[%s211_s10 + $0x10] sm:$0xf] (%p111_p3), %v237_v4  ;;  %v239_v5 = vld [vmem:[%s1095_s9 + $0x3c] sm:$0xf] (%p111_p3)  ;;  %v241_v6 = vld [vmem:[%s1095_s9 + $0x48] sm:$0xf] (%p111_p3) }
  0x19   : > { %v243_v7 = vld [vmem:[%s1095_s9 + $0x54] sm:$0xf]  ;;  %240 = vst [vmem:[%s211_s10 + $0x14] sm:$0xf] %v239_v5  ;;  %242 = vst [vmem:[%s211_s10 + $0x18] sm:$0xf] %v241_v6 }
  0x1a   : > { %244 = vst [vmem:[%s211_s10 + $0x1c] sm:$0xf] %v243_v7  ;;  %v245_v8 = vld [vmem:[%s1095_s9 + $0x60] sm:$0xf]  ;;  %v247_v9 = vld [vmem:[%s1095_s9 + $0x6c] sm:$0xf] }
  0x1b   : > { %v249_v10 = vld [vmem:[%s1095_s9 + $0x78] sm:$0xf]  ;;  %246 = vst [vmem:[%s211_s10 + $0x20] sm:$0xf] %v245_v8  ;;  %248 = vst [vmem:[%s211_s10 + $0x24] sm:$0xf] %v247_v9 }
  0x1c   : > { %250 = vst [vmem:[%s211_s10 + $0x28] sm:$0xf] %v249_v10  ;;  %v251_v11 = vld [vmem:[%s1095_s9 + $0x84] sm:$0xf]  ;;  %v253_v12 = vld [vmem:[%s1095_s9 + $0x90] sm:$0xf] }
  0x1d   : > { %v255_v13 = vld [vmem:[%s1095_s9 + $0x9c] sm:$0xf]  ;;  %252 = vst [vmem:[%s211_s10 + $0x2c] sm:$0xf] %v251_v11  ;;  %254 = vst [vmem:[%s211_s10 + $0x30] sm:$0xf] %v253_v12 }
  0x1e   : > { %256 = vst [vmem:[%s211_s10 + $0x34] sm:$0xf] %v255_v13  ;;  %v257_v14 = vld [vmem:[%s1095_s9 + $0xa8] sm:$0xf]  ;;  %v259_v15 = vld [vmem:[%s1095_s9 + $0xb4] sm:$0xf] }
  0x1f   : > { %258 = vst [vmem:[%s211_s10 + $0x38] sm:$0xf] %v257_v14  ;;  %260 = vst [vmem:[%s211_s10 + $0x3c] sm:$0xf] %v259_v15 }
  0x20 PF: > { %p811_p8 = scmp.ge.s32.totalorder %s1013_s22, 1  ;;  %p320_p9 = scmp.lt.s32.totalorder %s1013_s22, 4 }
  0x22   : > { %p321_p10 = pnand %p811_p8, %p320_p9 }
  0x23   : > { %s327_s11 = sand.u32 (!%p321_p10), 1, %s997_s18   ;;  %p367_p11 = scmp.lt.s32.totalorder (!%p321_p10), %s1005_s20, 2 }
  0x24   : > { %324 = sbr.rel (%p321_p10) target bundleno = 639 (0x27f), region = 77  ;;  %s812_s12 = sshll.u32 (!%p321_p10), %s327_s11, 6 }
  0x25   : > { %s912_s13 = smul.u32 (!%p321_p10), 24, %s327_s11  ;;  %s1124_s24 = scalar_lea.vmem (!%p321_p10), [#allocation3], %s812_s12 }
  0x26   : > { %p813_p12 = scmp.ne.s32.totalorder (!%p321_p10), %s1005_s20, 0 }
  0x27   : > { %s1126_s25 = scalar_lea.vmem (!%p321_p10), [#allocation4], %s912_s13 }
  0x2b   : > { %s1118_s14 = scalar_select %p367_p11, %s1005_s20, 2 }
  0x2c   : > { %375 = sbr.rel (%p813_p12) target bundleno = 371 (0x173), region = 85  ;;  %v376_v16 = vld [vmem:[%s1199_s0] sm:$0xff] (!%p813_p12)  ;;  %v378_v17 = vld [vmem:[%s1199_s0 + $0x10] sm:$0xff] (!%p813_p12)  ;;  %v377_v18 = vld [vmem:[%s1199_s0 + $0x8] sm:$0xff] (!%p813_p12) }
  0x2d   : > { %s369_s17 = scalar_lea.vmem %s1203_s4, %s1118_s14  ;;  %382 = vadd.xlane.f32.xlu0 (!%p813_p12), %v376_v16  ;;  %386 = vadd.xlane.f32.xlu1 (!%p813_p12), %v378_v17  ;;  %v379_v19 = vld [vmem:[%s1199_s0 + $0x18] sm:$0xff] (!%p813_p12)  ;;  %v380_v20 = vld [vmem:[%s1199_s0 + $0x20] sm:$0xff] (!%p813_p12)  ;;  %v381_v21 = vld [vmem:[%s1199_s0 + $0x28] sm:$0xff] (!%p813_p12) }
  0x2e   : > { %v814_v2 = vld [vmem:[%s1200_s1] ss:$0 sm:$0xff] (!%p813_p12) }
  0x2f   : > { %v815_v7 = vld [vmem:[%s1201_s2] ss:$0 sm:$0xff] (!%p813_p12) }
  0x31   : > { %384 = vadd.xlane.f32.xlu0 (!%p813_p12), %v377_v18  ;;  %388 = vadd.xlane.f32.xlu1 (!%p813_p12), %v379_v19 }
  0x35   : > { %390 = vadd.xlane.f32.xlu0 %v380_v20  ;;  %392 = vadd.xlane.f32.xlu1 %v381_v21 }
  0xba   : > { %v383_v22 = vpop.xlane.xlu0 %382  ;;  %v387_v23 = vpop.xlane.xlu1 %386 }
  0xbb   : > { %v395_v24 = vmul.f32 0.0078125, %v383_v22  ;;  %v397_v25 = vmul.f32 0.0078125, %v387_v23 }
  0xbd   : > { %v401_v26 = vsub.f32 %v376_v16, %v395_v24  ;;  %v403_v27 = vsub.f32 %v378_v17, %v397_v25 }
  0xbe   : > { %v385_v28 = vpop.xlane.xlu0 %384  ;;  %v389_v29 = vpop.xlane.xlu1 %388 }
  0xbf   : > { %v396_v30 = vmul.f32 0.0078125, %v385_v28  ;;  %v407_v31 = vmul.f32 %v401_v26, %v401_v26  ;;  %v398_v32 = vmul.f32 0.0078125, %v389_v29  ;;  %v409_v35 = vmul.f32 %v403_v27, %v403_v27 }
  0xc1   : > { %v402_v33 = vsub.f32 %v377_v18, %v396_v30  ;;  %413 = vadd.xlane.f32.xlu0 %v407_v31  ;;  %v404_v34 = vsub.f32 %v379_v19, %v398_v32 }
  0xc2   : > { %v391_v36 = vpop.xlane.xlu0 %390  ;;  %v393_v37 = vpop.xlane.xlu1 %392 }
  0xc3   : > { %v399_v38 = vmul.f32 0.0078125, %v391_v36  ;;  %v408_v39 = vmul.f32 %v402_v33, %v402_v33  ;;  %v400_v40 = vmul.f32 0.0078125, %v393_v37  ;;  %v410_v43 = vmul.f32 %v404_v34, %v404_v34 }
  0xc5   : > { %v405_v41 = vsub.f32 %v380_v20, %v399_v38  ;;  %417 = vadd.xlane.f32.xlu0 %v409_v35  ;;  %415 = vadd.xlane.f32.xlu1 %v408_v39  ;;  %v406_v42 = vsub.f32 %v381_v21, %v400_v40 }
  0xc7   : > { %v411_v44 = vmul.f32 %v405_v41, %v405_v41  ;;  %v412_v45 = vmul.f32 %v406_v42, %v406_v42 }
  0xc9   : > { %419 = vadd.xlane.f32.xlu1 %v410_v43  ;;  %421 = vadd.xlane.f32.xlu0 %v411_v44 }
  0xcd   : > { %423 = vadd.xlane.f32.xlu1 %v412_v45 }
 0x14e   : > { %v414_v46 = vpop.xlane.xlu0 %413 }
 0x14f   : > { %v425_v47 = vmul.f32 0.0078125, %v414_v46 }
 0x151   : > { %v431_v48 = vadd.f32 1e-05, %v425_v47 }
 0x152   : > { %v416_v49 = vpop.xlane.xlu1 %415  ;;  %v418_v50 = vpop.xlane.xlu0 %417 }
 0x153   : > { %955 = vrsqrt.f32 %v431_v48  ;;  %v426_v51 = vmul.f32 0.0078125, %v416_v49  ;;  %v427_v52 = vmul.f32 0.0078125, %v418_v50 }
 0x155   : > { %v432_v53 = vadd.f32 1e-05, %v426_v51  ;;  %v433_v54 = vadd.f32 1e-05, %v427_v52 }
 0x156   : > { %v420_v55 = vpop.xlane.xlu1 %419  ;;  %v422_v56 = vpop.xlane.xlu0 %421 }
 0x157   : > { %957 = vrsqrt.f32 %v432_v53  ;;  %v428_v57 = vmul.f32 0.0078125, %v420_v55  ;;  %v429_v58 = vmul.f32 0.0078125, %v422_v56 }
 0x158   : > { %959 = vrsqrt.f32 %v433_v54 }
 0x159   : > { %v434_v59 = vadd.f32 1e-05, %v428_v57  ;;  %v435_v60 = vadd.f32 1e-05, %v429_v58 }
 0x15a   : > { %v424_v61 = vpop.xlane.xlu1 %423 }
 0x15b   : > { %961 = vrsqrt.f32 %v434_v59  ;;  %v430_v62 = vmul.f32 0.0078125, %v424_v61 }
 0x15c   : > { %963 = vrsqrt.f32 %v435_v60 }
 0x15d   : > { %v956_v63 = vpop.eup %955  ;;  %v436_v0 = vadd.f32 1e-05, %v430_v62 }
 0x15e   : > { %v443_v1 = vmul.f32 %v956_v63, %v401_v26 }
 0x15f   : > { %965 = vrsqrt.f32 %v436_v0 }
 0x160   : > { %v456_v5 = vmul.f32 %v814_v2, %v443_v1 }
 0x161   : > { %v958_v3 = vpop.eup %957 }
 0x162   : > { %v960_v4 = vpop.eup %959  ;;  %v444_v6 = vmul.f32 %v958_v3, %v402_v33  ;;  %v469_v12 = vadd.f32 %v815_v7, %v456_v5 }
 0x163   : > { %v445_v8 = vmul.f32 %v960_v4, %v403_v27 }
 0x164   : > { %v457_v9 = vmul.f32 %v814_v2, %v444_v6 }
 0x165   : > { %v962_v10 = vpop.eup %961  ;;  %v458_v14 = vmul.f32 %v814_v2, %v445_v8 }
 0x166   : > { %v964_v11 = vpop.eup %963  ;;  %v470_v13 = vadd.f32 %v815_v7, %v457_v9  ;;  %v446_v15 = vmul.f32 %v962_v10, %v404_v34 }
 0x167   : > { %v447_v16 = vmul.f32 %v964_v11, %v405_v41  ;;  %v471_v20 = vadd.f32 %v815_v7, %v458_v14 }
 0x168   : > { %v475_v17 = vpack.c.bf16 %v470_v13, %v469_v12  ;;  %v459_v18 = vmul.f32 %v814_v2, %v446_v15 }
 0x169   : > { %v966_v19 = vpop.eup %965  ;;  %v460_v22 = vmul.f32 %v814_v2, %v447_v16 }
 0x16a   : > { %478 = vst [vmem:[#allocation2] sm:$0xff] %v475_v17  ;;  %v472_v21 = vadd.f32 %v815_v7, %v459_v18  ;;  %v448_v23 = vmul.f32 %v966_v19, %v406_v42 }
 0x16b   : > { %v473_v26 = vadd.f32 %v815_v7, %v460_v22 }
 0x16c   : > { %v476_v24 = vpack.c.bf16 %v472_v21, %v471_v20  ;;  %v461_v25 = vmul.f32 %v814_v2, %v448_v23 }
 0x16e   : > { %479 = vst [vmem:[#allocation2 + $0x8] sm:$0xff] %v476_v24  ;;  %v474_v27 = vadd.f32 %v815_v7, %v461_v25 }
 0x170   : > { %v477_v28 = vpack.c.bf16 %v474_v27, %v473_v26 }
 0x172   : > { %480 = vst [vmem:[#allocation2 + $0x10] sm:$0xff] %v477_v28 }
 0x173 PF: > { %v967_v29 = vld [vmem:[%s1124_s24] sm:$0xff]   ;;  %v1015_v30 = vmov 0.0   ;;  %v968_v31 = vld [vmem:[%s1124_s24 + $0x8] sm:$0xff]   ;;  %vm1016_vm0 = vmmov 0   ;;  %v969_v32 = vld [vmem:[%s1124_s24 + $0x10] sm:$0xff]   ;;  %s831_s14 = sshll.u32 (%p1082_p6), %s1005_s20, 2 }
 0x174   : > { %896 = vmatprep.subr.bf16.mxu1 %v1015_v30  ;;  %868 = vmatprep.subr.bf16.mxu0 %v1015_v30  ;;  %v970_v33 = vld [vmem:[%s1124_s24 + $0x18] sm:$0xff]   ;;  %v971_v34 = vld [vmem:[%s1124_s24 + $0x20] sm:$0xff]   ;;  %v972_v35 = vld [vmem:[%s1124_s24 + $0x28] sm:$0xff]   ;;  %s653_s6 = scalar_lea.vmem (%p1082_p6), %s1204_s5, %s831_s14 }
 0x175   : > { %904 = vmatpush3.bf16.msra.mxu1 %v967_v29  ;;  %869 = vmatpush3.bf16.msra.mxu0 %v967_v29  ;;  %v973_v36 = vld [vmem:[%s1124_s24 + $0x30] sm:$0xff]   ;;  %v974_v37 = vld [vmem:[%s1124_s24 + $0x38] sm:$0xff]   ;;  %v481_v39 = vld [vmem:[#allocation2] sm:$0xff] }
 0x176   : > { %897 = vmatprep.subr.bf16.mxu1 %v1015_v30  ;;  %870 = vmatprep.subr.bf16.mxu0 %v1015_v30  ;;  %v482_v38 = vld [vmem:[#allocation2 + $0x8] sm:$0xff]  ;;  %v816_v41 = vld [vmem:[%s369_s17] ss:$0 sm:$0xff] }
 0x177   : > { %888 = vmatprep.mubr.msk.bf16.mxu1 %vm1016_vm0, %v1015_v30  ;;  %884 = vmatprep.mubr.msk.bf16.mxu0 %vm1016_vm0, %v1015_v30 }
 0x179   : > { %905 = vmatpush3.bf16.msra.mxu1 %v968_v31  ;;  %871 = vmatpush3.bf16.msra.mxu0 %v968_v31  ;;  %v483_v40 = vld [vmem:[#allocation2 + $0x10] sm:$0xff] }
 0x17a   : > { %898 = vmatprep.subr.bf16.mxu1 %v1015_v30  ;;  %872 = vmatprep.subr.bf16.mxu0 %v1015_v30 }
 0x17d   : > { %906 = vmatpush3.bf16.msra.mxu1 %v969_v32  ;;  %873 = vmatpush3.bf16.msra.mxu0 %v969_v32 }
 0x17e   : > { %899 = vmatprep.subr.bf16.mxu1 %v1015_v30  ;;  %874 = vmatprep.subr.bf16.mxu0 %v1015_v30 }
 0x181   : > { %907 = vmatpush3.bf16.msra.mxu1 %v970_v33  ;;  %875 = vmatpush3.bf16.msra.mxu0 %v970_v33 }
 0x182   : > { %900 = vmatprep.subr.bf16.mxu1 %v1015_v30  ;;  %876 = vmatprep.subr.bf16.mxu0 %v1015_v30 }
 0x185   : > { %908 = vmatpush3.bf16.msra.mxu1 %v971_v34  ;;  %877 = vmatpush3.bf16.msra.mxu0 %v971_v34 }
 0x186   : > { %901 = vmatprep.subr.bf16.mxu1 %v1015_v30  ;;  %878 = vmatprep.subr.bf16.mxu0 %v1015_v30 }
 0x189   : > { %909 = vmatpush3.bf16.msra.mxu1 %v972_v35  ;;  %879 = vmatpush3.bf16.msra.mxu0 %v972_v35 }
 0x18a   : > { %902 = vmatprep.subr.bf16.mxu1 %v1015_v30  ;;  %880 = vmatprep.subr.bf16.mxu0 %v1015_v30 }
 0x18d   : > { %910 = vmatpush3.bf16.msra.mxu1 %v973_v36  ;;  %881 = vmatpush3.bf16.msra.mxu0 %v973_v36 }
 0x18e   : > { %903 = vmatprep.subr.bf16.mxu1 %v1015_v30  ;;  %882 = vmatprep.subr.bf16.mxu0 %v1015_v30 }
 0x191   : > { %911 = vmatpush3.bf16.msra.mxu1 %v974_v37  ;;  %883 = vmatpush3.bf16.msra.mxu0 %v974_v37 }
 0x194   : > { %889 = vmatmul.mubr.bf16.vlgmr.msra.gmra.mrb[0].mxu1 %v482_v38  ;;  %885 = vmatmul.mubr.bf16.vlgmr.msra.gmra.mrb[0].mxu0 %v481_v39 }
 0x195   : > { %892 = vmatprep.mubr.msk.bf16.mxu1 %vm1016_vm0, %v1015_v30 }
 0x19c   : > { %893 = vmatmul.mubr.bf16.gmra.mrb[4].mxu1 %v483_v40 }
 0x267   : > { %v597_v42 = vpop.f32.mrb[0].mxu1  ;;  %v589_v43 = vpop.f32.mrb[0].mxu0 }
 0x268   : > { %v890_v44 = vpop.f32.mrb[1].mxu1  ;;  %v590_v45 = vadd.f32 %v816_v41, %v589_v43  ;;  %v886_v46 = vpop.f32.mrb[1].mxu0  ;;  %v598_v49 = vadd.f32 %v816_v41, %v597_v42 }
 0x269   : > { %v600_v47 = vpop.f32.mrb[2].mxu1  ;;  %v592_v48 = vpop.f32.mrb[2].mxu0 }
 0x26a   : > { %v601_v50 = vadd.f32 %v816_v41, %v600_v47  ;;  %v891_v51 = vpop.f32.mrb[3].mxu1  ;;  %v593_v52 = vadd.f32 %v816_v41, %v592_v48  ;;  %v887_v53 = vpop.f32.mrb[3].mxu0 }
 0x26c   : > { %v848_v54 = vpack.c.bf16 %v601_v50, %v598_v49  ;;  %v843_v55 = vpack.c.bf16 %v593_v52, %v590_v45 }
 0x26e   : > { %855 = vst [vmem:[%s1126_s25 + $0x8] sm:$0xff] %v848_v54   ;;  %844 = vst [vmem:[%s1126_s25] sm:$0xff] %v843_v55  }
 0x26f   : > { %v605_v56 = vpop.f32.mrb[4].mxu1 }
 0x270   : > { %v894_v57 = vpop.f32.mrb[5].mxu1  ;;  %v606_v59 = vadd.f32 %v816_v41, %v605_v56  ;;  %648 = sbr.rel (!%p1082_p6) target bundleno = 639 (0x27f), region = 89 }
 0x271   : > { %v608_v58 = vpop.f32.mrb[6].mxu1 }
 0x272   : > { %v609_v60 = vadd.f32 %v816_v41, %v608_v58  ;;  %v895_v61 = vpop.f32.mrb[7].mxu1 }
 0x274   : > { %v853_v62 = vpack.c.bf16 %v609_v60, %v606_v59 }
 0x275   : > { %v669_v63 = vld [vmem:[%s1126_s25] sm:$0xf] (%p1082_p6)  ;;  %v671_v0 = vld [vmem:[%s1126_s25 + $0x4] sm:$0xf] (%p1082_p6)  ;;  %v673_v1 = vld [vmem:[%s1126_s25 + $0x8] sm:$0xf] (%p1082_p6) }
 0x276   : > { %856 = vst [vmem:[%s1126_s25 + $0x10] sm:$0xff] %v853_v62   ;;  %v675_v2 = vld [vmem:[%s1126_s25 + $0xc] sm:$0xf] (%p1082_p6)  ;;  %670 = vst [vmem:[%s653_s6] sm:$0xf] (%p1082_p6), %v669_v63 }
 0x277   : > { %672 = vst [vmem:[%s653_s6 + $0xc] sm:$0xf] %v671_v0  ;;  %674 = vst [vmem:[%s653_s6 + $0x18] sm:$0xf] %v673_v1 }
 0x278   : > { %676 = vst [vmem:[%s653_s6 + $0x24] sm:$0xf] %v675_v2 }
 0x27d   : > { %v677_v3 = vld [vmem:[%s1126_s25 + $0x10] sm:$0xf]  ;;  %v679_v4 = vld [vmem:[%s1126_s25 + $0x14] sm:$0xf] }
 0x27e   : > { %678 = vst [vmem:[%s653_s6 + $0x30] sm:$0xf] %v677_v3  ;;  %680 = vst [vmem:[%s653_s6 + $0x3c] sm:$0xf] %v679_v4 }
 0x27f PF: > { %s15_s22 = sadd.s32 1, %s1013_s22   ;;  %s1206_s18 = smov %s1001_s19 }
 0x280   : > { %p12_p13 = scmp.ge.s32.totalorder %s15_s22, 5   ;;  %s1207_s19 = smov %s1087_s28 }
 0x281   : > { %s1208_s20 = smov %s1009_s21  ;;  %s1209_s21 = smov %s1211_s23 }
 0x282   :  { %14 = sbr.rel (!%p12_p13) target bundleno = 3 (0x3), region = 167 }

// kernel: gpt2_target_likelihood.13
= control target key start
LH: loop header
LB: loop body
LE: loop exit
PB: predicated region body
PF: predicated region fallthrough
CT: control target
= control target key end

     0   :  { %s570_s9 = smov 0   ;;  %s636_s0 = inlined_call_operand.vmem [shape: bf16[6,8,384], index: 0, kind: input, shape index: {}]   ;;  %s637_s1 = inlined_call_operand.vmem [shape: f32[6,1,8], index: 1, kind: input, shape index: {}]   ;;  %s638_s2 = inlined_call_operand.vmem [shape: bf16[6,8,128], index: 2, kind: output, shape index: {}]  }
   0x1 LB: > { %s471_s10 = sadd.s32 4294967295, %s549_s9   ;;  %p475_p0 = scmp.ge.s32.totalorder %s549_s9, 1  ;;  %s549_s9 = sphi %s570_s9, %s12_s9  }
   0x2   : > { %p120_p1 = scmp.lt.s32.totalorder %s549_s9, 7 }
   0x4   : > { %p121_p2 = pnand %p475_p0, %p120_p1 }
   0x5   : > { %p144_p3 = scmp.lt.s32.totalorder (!%p121_p2), %s471_s10, 5  ;;  %v551_v0 = vmov (!%p121_p2), 0.0   ;;  %vm552_vm0 = vmmov (!%p121_p2), 0   ;;  %vm176_vm1 = vcmask (!%p121_p2), 523264   ;;  %v161_v4 = vlaneseq (!%p121_p2)  ;;  %s554_s18 = smov (!%p121_p2), 64  }
   0x6   : > { %124 = sbr.rel (%p121_p2) target bundleno = 1429 (0x595), region = 28  ;;  %495 = vmatprep.subr.bf16.mxu0 (!%p121_p2), %v551_v0  ;;  %497 = vmatprep.mubr.msk.bf16.mxu0 (!%p121_p2), %vm552_vm0, %v551_v0  ;;  %v553_v8 = vmov (!%p121_p2), 0   ;;  %vm225_vm6 = vcmask (!%p121_p2), 64512   ;;  %vm241_vm7 = vcmask (!%p121_p2), 1043456  }
   0x7   : > { %501 = vmatprep.subr.bf16.mxu1 (!%p121_p2), %v551_v0  ;;  %503 = vmatprep.mubr.msk.bf16.mxu1 (!%p121_p2), %vm552_vm0, %v551_v0  ;;  %v162_v6 = vshrl.u32 (!%p121_p2), %v161_v4, 7  ;;  %v164_v10 = vand.u32 (!%p121_p2), 127, %v161_v4 }
   0x9   : > { %v169_v7 = vsub.s32 (!%p121_p2), 0, %v162_v6  ;;  %vm165_vm3 = vcmp.le.s32.totalorder (!%p121_p2), %v164_v10, %v162_v6 }
   0xd   : > { %s642_s10 = smov (!%p144_p3, %s471_s10), 5 }
   0xe   : > { %s519_s11 = smul.u32 12, %s642_s10  ;;  %s151_s17 = scalar_lea.vmem %s637_s1, %s642_s10 }
   0xf   : > { %v159_v5 = vld [vmem:[%s151_s17] sm:$0x1]  ;;  %s477_s19 = sshll.u32 %s642_s10, 2 }
  0x10   : > { %s590_s14 = scalar_lea.vmem %s636_s0, %s519_s11  ;;  %vm160_vm2 = vcmp.gt.f32.partialorder %v159_v5, 0.5  ;;  %s155_s22 = scalar_lea.vmem %s638_s2, %s477_s19 }
  0x11   : > { %v157_v1 = vld [vmem:[%s590_s14] sm:$0xff]  ;;  %v166_v9 = vsel %vm160_vm2, 1, %v553_v8  ;;  %v158_v26 = vld [vmem:[%s590_s14 + $0x8] sm:$0xf] }
  0x12   : > { %v478_v2 = vcombine.high %v157_v1, %v157_v1  ;;  %v170_v11 = vrot.slane %v166_v9, %v169_v7  ;;  %v481_v20 = vcombine.low %v157_v1, %v157_v1  ;;  %v243_v27 = vsel %vm241_vm7, %v158_v26, 0 }
  0x13   : > { %502 = vmatpush3.bf16.msra.mxu1 %v243_v27  ;;  %v483_v46 = vcombine.low %v158_v26, %v158_v26 }
  0x14   : > { %v181_v3 = vsel %vm176_vm1, %v478_v2, 0  ;;  %vm171_vm4 = vcmp.eq.s32.totalorder %v170_v11, 1  ;;  %289 = vrot.lane.b32.xlu1 %v478_v2, %s554_s18  ;;  %507 = vmatprep.subr.bf16.mxu1 %v551_v0 }
  0x15   : > { %496 = vmatpush3.bf16.xpose.msra.mxu0 %v181_v3  ;;  %vm602_vm5 = vmand %vm165_vm3, %vm171_vm4 }
  0x16   : > { %513 = vmatprep.subr.bf16.mxu0 %v551_v0 }
  0x18   : > { %287 = vrot.lane.b32.xlu1 %v481_v20, %s554_s18 }
  0x1c   : > { %498 = vmatmul.mubr.msk.bf16.vlgmr.msra.gmra.mrb[0].mxu0 %vm176_vm1, %v157_v1 }
  0x1d   : > { %515 = vmatprep.mubr.msk.bf16.mxu0 %vm552_vm0, %v551_v0 }
  0x86   : > { %v290_v30 = vpop.permute.xlu1 %289 }
  0x87   : > { %v295_v32 = vsel %vm176_vm1, %v290_v30, 0 }
  0x8a   : > { %v288_v34 = vpop.permute.xlu1 %287 }
  0xef   : > { %v217_v12 = vpop.f32.mrb[0].mxu0 }
  0xf0   : > { %v223_v14 = vmul.f32 0.125, %v217_v12  ;;  %v499_v15 = vpop.f32.mrb[1].mxu0 }
  0xf1   : > { %v220_v16 = vpop.f32.mrb[2].mxu0 }
  0xf2   : > { %v500_v17 = vpop.f32.mrb[3].mxu0  ;;  %v224_v18 = vsel %vm602_vm5, %v223_v14, -1e+09 }
  0xf3   : > { %v226_v19 = vsel %vm225_vm6, %v224_v18, -inf }
  0xf4   : > { %227 = vmax.xlane.f32.xlu0 %v226_v19 }
 0x181   : > { %v228_v21 = vpop.xlane.xlu0 %227 }
 0x182   : > { %v229_v22 = vsub.f32 %v224_v18, %v228_v21 }
 0x184   : > { %v230_v23 = vmul.f32 1.442695, %v229_v22 }
 0x186   : > { %535 = vpow2.f32 %v230_v23 }
 0x190   : > { %v536_v24 = vpop.eup %535 }
 0x191   : > { %v232_v25 = vsel %vm225_vm6, %v536_v24, 0.0 }
 0x192   : > { %233 = vadd.xlane.f32.xlu0 %v232_v25 }
 0x21f   : > { %v234_v28 = vpop.xlane.xlu0 %233 }
 0x220   : > { %537 = vrcp.f32 %v234_v28 }
 0x22a   : > { %v538_v29 = vpop.eup %537 }
 0x22b   : > { %v236_v31 = vmul.f32 %v538_v29, %v536_v24 }
 0x22d   : > { %v237_v33 = vpack.c.bf16 %v236_v31, %v236_v31 }
 0x22f   : > { %504 = vmatmul.mubr.msk.bf16.vlgmr.msra.gmra.mrb[0].mxu1 %vm225_vm6, %v237_v33 }
 0x230   : > { %508 = vmatpush3.bf16.xpose.msra.mxu1 %v295_v32  ;;  %509 = vmatprep.mubr.msk.bf16.mxu1 %vm552_vm0, %v551_v0 }
 0x237   : > { %510 = vmatmul.mubr.msk.bf16.vlgmr.msra.gmra.mrb[4].mxu1 %vm176_vm1, %v288_v34 }
 0x302   : > { %v279_v35 = vpop.f32.mrb[0].mxu1 }
 0x303   : > { %v505_v36 = vpop.f32.mrb[1].mxu1 }
 0x304   : > { %v282_v37 = vpop.f32.mrb[2].mxu1 }
 0x305   : > { %v506_v38 = vpop.f32.mrb[3].mxu1 }
 0x30a   : > { %v331_v39 = vpop.f32.mrb[4].mxu1 }
 0x30b   : > { %v337_v40 = vmul.f32 0.125, %v331_v39  ;;  %v511_v41 = vpop.f32.mrb[5].mxu1 }
 0x30c   : > { %v334_v42 = vpop.f32.mrb[6].mxu1 }
 0x30d   : > { %v512_v43 = vpop.f32.mrb[7].mxu1  ;;  %v338_v44 = vsel %vm602_vm5, %v337_v40, -1e+09 }
 0x30e   : > { %v339_v45 = vsel %vm225_vm6, %v338_v44, -inf }
 0x30f   : > { %340 = vmax.xlane.f32.xlu0 %v339_v45 }
 0x325   : > { %354 = vrot.lane.b32.xlu0 %v483_v46, %s554_s18 }
 0x39c   : > { %v341_v47 = vpop.xlane.xlu0 %340 }
 0x39d   : > { %v342_v48 = vsub.f32 %v338_v44, %v341_v47 }
 0x39f   : > { %v343_v49 = vmul.f32 1.442695, %v342_v48 }
 0x3a0   : > { %v355_v52 = vpop.permute.xlu0 %354 }
 0x3a1   : > { %539 = vpow2.f32 %v343_v49  ;;  %v360_v53 = vsel %vm241_vm7, %v355_v52, 0 }
 0x3a2   : > { %514 = vmatpush3.bf16.msra.mxu0 %v360_v53 }
 0x3ab   : > { %v540_v50 = vpop.eup %539 }
 0x3ac   : > { %v345_v51 = vsel %vm225_vm6, %v540_v50, 0.0 }
 0x3ad   : > { %346 = vadd.xlane.f32.xlu1 %v345_v51 }
 0x43a   : > { %v347_v54 = vpop.xlane.xlu1 %346 }
 0x43b   : > { %541 = vrcp.f32 %v347_v54 }
 0x445   : > { %v542_v55 = vpop.eup %541 }
 0x446   : > { %v349_v56 = vmul.f32 %v542_v55, %v540_v50 }
 0x448   : > { %v350_v57 = vpack.c.bf16 %v349_v56, %v349_v56 }
 0x44a   : > { %516 = vmatmul.mubr.msk.bf16.vlgmr.msra.gmra.mrb[4].mxu0 %vm225_vm6, %v350_v57 }
 0x51d   : > { %v396_v58 = vpop.f32.mrb[4].mxu0 }
 0x51e   : > { %403 = vrot.lane.b32.xlu0 %v396_v58, %s554_s18  ;;  %v517_v59 = vpop.f32.mrb[5].mxu0 }
 0x51f   : > { %v399_v60 = vpop.f32.mrb[6].mxu0 }
 0x520   : > { %v518_v61 = vpop.f32.mrb[7].mxu0 }
 0x590   : > { %v404_v62 = vpop.permute.xlu0 %403 }
 0x591   : > { %v406_v63 = vsel %vm176_vm1, %v279_v35, %v404_v62 }
 0x592   : > { %v407_v0 = vpack.c.bf16 %v406_v63, %v406_v63 }
 0x594   : > { %408 = vst [vmem:[%s155_s22] sm:$0xf] %v407_v0 }
 0x595 PF: > { %s12_s9 = sadd.s32 1, %s549_s9  }
 0x596   : > { %p9_p4 = scmp.ge.s32.totalorder %s12_s9, 8  }
 0x598   :  { %11 = sbr.rel (!%p9_p4) target bundleno = 1 (0x1), region = 61 }

// kernel: gpt2_target_likelihood.14
= control target key start
LH: loop header
LB: loop body
LE: loop exit
PB: predicated region body
PF: predicated region fallthrough
CT: control target
= control target key end

     0   :  { %v278_v0 = vmov 0.0   ;;  %vm279_vm0 = vmmov 0   ;;  %s380_s1 = inlined_call_operand.vmem [shape: bf16[128,128], index: 1, kind: input, shape index: {}]   ;;  %s381_s0 = inlined_call_operand.vmem [shape: bf16[48,128], index: 0, kind: input, shape index: {}]   ;;  %s382_s3 = inlined_call_operand.vmem [shape: f32[48,128], index: 3, kind: input, shape index: {}]   ;;  %s383_s2 = inlined_call_operand.vmem [shape: f32[1,128], index: 2, kind: input, shape index: {}]   ;;  %s384_s4 = inlined_call_operand.vmem [shape: f32[48,128], index: 4, kind: output, shape index: {}]  }
   0x1   :  { %249 = vmatprep.subr.bf16.mxu1 %v278_v0  ;;  %v267_v1 = vld [vmem:[%s380_s1] sm:$0xff]   ;;  %221 = vmatprep.subr.bf16.mxu0 %v278_v0  ;;  %v268_v2 = vld [vmem:[%s380_s1 + $0x8] sm:$0xff]   ;;  %v269_v3 = vld [vmem:[%s380_s1 + $0x10] sm:$0xff]  }
   0x2   :  { %241 = vmatprep.mubr.msk.bf16.mxu1 %vm279_vm0, %v278_v0  ;;  %237 = vmatprep.mubr.msk.bf16.mxu0 %vm279_vm0, %v278_v0  ;;  %v270_v4 = vld [vmem:[%s380_s1 + $0x18] sm:$0xff]   ;;  %v271_v5 = vld [vmem:[%s380_s1 + $0x20] sm:$0xff]   ;;  %v272_v6 = vld [vmem:[%s380_s1 + $0x28] sm:$0xff]  }
   0x3   :  { %257 = vmatpush3.bf16.msra.mxu1 %v267_v1  ;;  %222 = vmatpush3.bf16.msra.mxu0 %v267_v1  ;;  %v273_v7 = vld [vmem:[%s380_s1 + $0x30] sm:$0xff]   ;;  %v274_v8 = vld [vmem:[%s380_s1 + $0x38] sm:$0xff]   ;;  %v275_v9 = vld [vmem:[%s381_s0 + $0x8] sm:$0xff]  }
   0x4   :  { %250 = vmatprep.subr.bf16.mxu1 %v278_v0  ;;  %223 = vmatprep.subr.bf16.mxu0 %v278_v0  ;;  %v276_v10 = vld [vmem:[%s381_s0] sm:$0xff]   ;;  %v277_v11 = vld [vmem:[%s381_s0 + $0x10] sm:$0xff]   ;;  %v166_v16 = vld [vmem:[%s382_s3 + $0x18] sm:$0xff] }
   0x5   :  { %v165_v12 = vld [vmem:[%s382_s3 + $0x10] sm:$0xff]  ;;  %v163_v13 = vld [vmem:[%s382_s3] sm:$0xff]  ;;  %v164_v18 = vld [vmem:[%s382_s3 + $0x8] sm:$0xff] }
   0x6   :  { %v209_v15 = vld [vmem:[%s383_s2] ss:$0 sm:$0xff]  ;;  %v168_v35 = vld [vmem:[%s382_s3 + $0x28] sm:$0xff] }
   0x7   :  { %258 = vmatpush3.bf16.msra.mxu1 %v268_v2  ;;  %224 = vmatpush3.bf16.msra.mxu0 %v268_v2  ;;  %v167_v33 = vld [vmem:[%s382_s3 + $0x20] sm:$0xff] }
   0x8   :  { %251 = vmatprep.subr.bf16.mxu1 %v278_v0  ;;  %225 = vmatprep.subr.bf16.mxu0 %v278_v0 }
   0xb   :  { %259 = vmatpush3.bf16.msra.mxu1 %v269_v3  ;;  %226 = vmatpush3.bf16.msra.mxu0 %v269_v3 }
   0xc   :  { %252 = vmatprep.subr.bf16.mxu1 %v278_v0  ;;  %227 = vmatprep.subr.bf16.mxu0 %v278_v0 }
   0xf   :  { %260 = vmatpush3.bf16.msra.mxu1 %v270_v4  ;;  %228 = vmatpush3.bf16.msra.mxu0 %v270_v4 }
  0x10   :  { %253 = vmatprep.subr.bf16.mxu1 %v278_v0  ;;  %229 = vmatprep.subr.bf16.mxu0 %v278_v0 }
  0x13   :  { %261 = vmatpush3.bf16.msra.mxu1 %v271_v5  ;;  %230 = vmatpush3.bf16.msra.mxu0 %v271_v5 }
  0x14   :  { %254 = vmatprep.subr.bf16.mxu1 %v278_v0  ;;  %231 = vmatprep.subr.bf16.mxu0 %v278_v0 }
  0x17   :  { %262 = vmatpush3.bf16.msra.mxu1 %v272_v6  ;;  %232 = vmatpush3.bf16.msra.mxu0 %v272_v6 }
  0x18   :  { %255 = vmatprep.subr.bf16.mxu1 %v278_v0  ;;  %233 = vmatprep.subr.bf16.mxu0 %v278_v0 }
  0x1b   :  { %263 = vmatpush3.bf16.msra.mxu1 %v273_v7  ;;  %234 = vmatpush3.bf16.msra.mxu0 %v273_v7 }
  0x1c   :  { %256 = vmatprep.subr.bf16.mxu1 %v278_v0  ;;  %235 = vmatprep.subr.bf16.mxu0 %v278_v0 }
  0x1f   :  { %264 = vmatpush3.bf16.msra.mxu1 %v274_v8  ;;  %236 = vmatpush3.bf16.msra.mxu0 %v274_v8 }
  0x22   :  { %242 = vmatmul.mubr.bf16.vlgmr.msra.gmra.mrb[0].mxu1 %v275_v9  ;;  %238 = vmatmul.mubr.bf16.vlgmr.msra.gmra.mrb[0].mxu0 %v276_v10 }
  0x23   :  { %245 = vmatprep.mubr.msk.bf16.mxu1 %vm279_vm0, %v278_v0 }
  0x2a   :  { %246 = vmatmul.mubr.bf16.gmra.mrb[4].mxu1 %v277_v11 }
  0xf5   :  { %v148_v14 = vpop.f32.mrb[0].mxu1  ;;  %v140_v17 = vpop.f32.mrb[0].mxu0 }
  0xf6   :  { %v171_v19 = vadd.f32 %v165_v12, %v148_v14  ;;  %v243_v20 = vpop.f32.mrb[1].mxu1  ;;  %v169_v21 = vadd.f32 %v163_v13, %v140_v17  ;;  %v239_v22 = vpop.f32.mrb[1].mxu0 }
  0xf7   :  { %v151_v23 = vpop.f32.mrb[2].mxu1  ;;  %v143_v24 = vpop.f32.mrb[2].mxu0 }
  0xf8   :  { %v184_v25 = vadd.f32 %v209_v15, %v171_v19  ;;  %v172_v26 = vadd.f32 %v166_v16, %v151_v23  ;;  %v244_v27 = vpop.f32.mrb[3].mxu1  ;;  %v182_v28 = vadd.f32 %v209_v15, %v169_v21  ;;  %v170_v29 = vadd.f32 %v164_v18, %v143_v24  ;;  %v240_v30 = vpop.f32.mrb[3].mxu0 }
  0xfa   :  { %190 = vst [vmem:[%s384_s4 + $0x10] sm:$0xff] %v184_v25  ;;  %v185_v31 = vadd.f32 %v209_v15, %v172_v26  ;;  %188 = vst [vmem:[%s384_s4] sm:$0xff] %v182_v28  ;;  %v183_v32 = vadd.f32 %v209_v15, %v170_v29 }
  0xfc   :  { %191 = vst [vmem:[%s384_s4 + $0x18] sm:$0xff] %v185_v31  ;;  %189 = vst [vmem:[%s384_s4 + $0x8] sm:$0xff] %v183_v32 }
  0xfd   :  { %v156_v34 = vpop.f32.mrb[4].mxu1 }
  0xfe   :  { %v173_v36 = vadd.f32 %v167_v33, %v156_v34  ;;  %v247_v37 = vpop.f32.mrb[5].mxu1 }
  0xff   :  { %v159_v38 = vpop.f32.mrb[6].mxu1 }
 0x100   :  { %v186_v39 = vadd.f32 %v209_v15, %v173_v36  ;;  %v174_v40 = vadd.f32 %v168_v35, %v159_v38  ;;  %v248_v41 = vpop.f32.mrb[7].mxu1 }
 0x102   :  { %192 = vst [vmem:[%s384_s4 + $0x20] sm:$0xff] %v186_v39  ;;  %v187_v42 = vadd.f32 %v209_v15, %v174_v40 }
 0x104   :  { %193 = vst [vmem:[%s384_s4 + $0x28] sm:$0xff] %v187_v42 }

// kernel: gpt2_target_likelihood.15
= control target key start
LH: loop header
LB: loop body
LE: loop exit
PB: predicated region body
PF: predicated region fallthrough
CT: control target
= control target key end

     0   :  { %v944_v60 = vmov 0   ;;  %s1392_s0 = inlined_call_operand.vmem [shape: f32[48,128], index: 0, kind: input, shape index: {}]   ;;  %s1393_s3 = inlined_call_operand.vmem [shape: bf16[128,512], index: 3, kind: input, shape index: {}]   ;;  %s1394_s1 = inlined_call_operand.vmem [shape: f32[1,128], index: 1, kind: input, shape index: {}]   ;;  %s1395_s2 = inlined_call_operand.vmem [shape: f32[1,128], index: 2, kind: input, shape index: {}]   ;;  %s1396_s4 = inlined_call_operand.vmem [shape: f32[1,512], index: 4, kind: input, shape index: {}]   ;;  %s1397_s5 = inlined_call_operand.vmem [shape: bf16[48,512], index: 5, kind: output, shape index: {}]  }
   0x1   :  { %v25_v0 = vld [vmem:[%s1392_s0] sm:$0xff]  ;;  %v27_v1 = vld [vmem:[%s1392_s0 + $0x10] sm:$0xff]  ;;  %v26_v2 = vld [vmem:[%s1392_s0 + $0x8] sm:$0xff]  ;;  %379 = vmatprep.mubr.bf16.mxu0 %v944_v60  ;;  %442 = vmatprep.mubr.bf16.mxu1 %v944_v60 }
   0x2   :  { %31 = vadd.xlane.f32.xlu0 %v25_v0  ;;  %35 = vadd.xlane.f32.xlu1 %v27_v1  ;;  %v28_v3 = vld [vmem:[%s1392_s0 + $0x18] sm:$0xff]  ;;  %v29_v4 = vld [vmem:[%s1392_s0 + $0x20] sm:$0xff]  ;;  %v30_v5 = vld [vmem:[%s1392_s0 + $0x28] sm:$0xff] }
   0x3   :  { %v836_v6 = vld [vmem:[%s1393_s3 + $0x4] ss:$16 sps:$4 sm:$0xff]   ;;  %v838_v7 = vld [vmem:[%s1393_s3 + $0xc] ss:$16 sps:$4 sm:$0xff]   ;;  %v840_v8 = vld [vmem:[%s1393_s3] ss:$16 sps:$4 sm:$0xff]  }
   0x4   :  { %347 = vmatprep.subr.bf16.mxu0 %v836_v6  ;;  %v841_v9 = vld [vmem:[%s1393_s3 + $0x8] ss:$16 sps:$4 sm:$0xff]   ;;  %410 = vmatprep.subr.bf16.mxu1 %v838_v7  ;;  %v842_v10 = vld [vmem:[%s1393_s3 + $0x24] ss:$16 sps:$4 sm:$0xff]   ;;  %v844_v11 = vld [vmem:[%s1393_s3 + $0x2c] ss:$16 sps:$4 sm:$0xff]  }
   0x5   :  { %348 = vmatpush1.bf16.msra.mxu0 %v840_v8  ;;  %411 = vmatpush1.bf16.msra.mxu1 %v841_v9  ;;  %v846_v36 = vld [vmem:[%s1393_s3 + $0x20] ss:$16 sps:$4 sm:$0xff]   ;;  %v847_v37 = vld [vmem:[%s1393_s3 + $0x28] ss:$16 sps:$4 sm:$0xff]   ;;  %v848_v38 = vld [vmem:[%s1393_s3 + $0x44] ss:$16 sps:$4 sm:$0xff]  }
   0x6   :  { %33 = vadd.xlane.f32.xlu0 %v26_v2  ;;  %37 = vadd.xlane.f32.xlu1 %v28_v3  ;;  %v850_v39 = vld [vmem:[%s1393_s3 + $0x4c] ss:$16 sps:$4 sm:$0xff]   ;;  %v852_v40 = vld [vmem:[%s1393_s3 + $0x40] ss:$16 sps:$4 sm:$0xff]   ;;  %v853_v41 = vld [vmem:[%s1393_s3 + $0x48] ss:$16 sps:$4 sm:$0xff]  }
   0x7   :  { %349 = vmatprep.subr.bf16.mxu0 %v842_v10  ;;  %412 = vmatprep.subr.bf16.mxu1 %v844_v11  ;;  %v854_v42 = vld [vmem:[%s1393_s3 + $0x64] ss:$16 sps:$4 sm:$0xff]   ;;  %v856_v43 = vld [vmem:[%s1393_s3 + $0x6c] ss:$16 sps:$4 sm:$0xff]   ;;  %v858_v44 = vld [vmem:[%s1393_s3 + $0x60] ss:$16 sps:$4 sm:$0xff]  }
   0x8   :  { %v859_v45 = vld [vmem:[%s1393_s3 + $0x68] ss:$16 sps:$4 sm:$0xff]   ;;  %v860_v46 = vld [vmem:[%s1393_s3 + $0x84] ss:$16 sps:$4 sm:$0xff]   ;;  %v862_v47 = vld [vmem:[%s1393_s3 + $0x8c] ss:$16 sps:$4 sm:$0xff]  }
   0x9   :  { %350 = vmatpush1.bf16.msra.mxu0 %v846_v36  ;;  %413 = vmatpush1.bf16.msra.mxu1 %v847_v37  ;;  %v864_v48 = vld [vmem:[%s1393_s3 + $0x80] ss:$16 sps:$4 sm:$0xff]   ;;  %v865_v49 = vld [vmem:[%s1393_s3 + $0x88] ss:$16 sps:$4 sm:$0xff]   ;;  %v866_v50 = vld [vmem:[%s1393_s3 + $0xa4] ss:$16 sps:$4 sm:$0xff]  }
   0xa   :  { %39 = vadd.xlane.f32.xlu0 %v29_v4  ;;  %41 = vadd.xlane.f32.xlu1 %v30_v5  ;;  %v868_v51 = vld [vmem:[%s1393_s3 + $0xac] ss:$16 sps:$4 sm:$0xff]   ;;  %v870_v52 = vld [vmem:[%s1393_s3 + $0xa0] ss:$16 sps:$4 sm:$0xff]   ;;  %v871_v53 = vld [vmem:[%s1393_s3 + $0xa8] ss:$16 sps:$4 sm:$0xff]  }
   0xb   :  { %351 = vmatprep.subr.bf16.mxu0 %v848_v38  ;;  %414 = vmatprep.subr.bf16.mxu1 %v850_v39  ;;  %v872_v54 = vld [vmem:[%s1393_s3 + $0xc4] ss:$16 sps:$4 sm:$0xff]   ;;  %v874_v55 = vld [vmem:[%s1393_s3 + $0xcc] ss:$16 sps:$4 sm:$0xff]   ;;  %v876_v56 = vld [vmem:[%s1393_s3 + $0xc0] ss:$16 sps:$4 sm:$0xff]  }
   0xc   :  { %v877_v57 = vld [vmem:[%s1393_s3 + $0xc8] ss:$16 sps:$4 sm:$0xff]   ;;  %v878_v58 = vld [vmem:[%s1393_s3 + $0xe4] ss:$16 sps:$4 sm:$0xff]   ;;  %v880_v59 = vld [vmem:[%s1393_s3 + $0xec] ss:$16 sps:$4 sm:$0xff]  }
   0xd   :  { %352 = vmatpush1.bf16.msra.mxu0 %v852_v40  ;;  %415 = vmatpush1.bf16.msra.mxu1 %v853_v41  ;;  %v882_v61 = vld [vmem:[%s1393_s3 + $0xe0] ss:$16 sps:$4 sm:$0xff]   ;;  %v883_v62 = vld [vmem:[%s1393_s3 + $0xe8] ss:$16 sps:$4 sm:$0xff]  }
   0xe   :  { %353 = vmatprep.subr.bf16.mxu0 %v854_v42  ;;  %416 = vmatprep.subr.bf16.mxu1 %v856_v43 }
  0x11   :  { %354 = vmatpush1.bf16.msra.mxu0 %v858_v44  ;;  %417 = vmatpush1.bf16.msra.mxu1 %v859_v45 }
  0x12   :  { %355 = vmatprep.subr.bf16.mxu0 %v860_v46  ;;  %418 = vmatprep.subr.bf16.mxu1 %v862_v47 }
  0x15   :  { %356 = vmatpush1.bf16.msra.mxu0 %v864_v48  ;;  %419 = vmatpush1.bf16.msra.mxu1 %v865_v49  ;;  %v167_v48 = vlaneseq }
  0x16   :  { %357 = vmatprep.subr.bf16.mxu0 %v866_v50  ;;  %420 = vmatprep.subr.bf16.mxu1 %v868_v51 }
  0x17   :  { %v168_v49 = vshrl.u32 %v167_v48, 7 }
  0x19   :  { %358 = vmatpush1.bf16.msra.mxu0 %v870_v52  ;;  %421 = vmatpush1.bf16.msra.mxu1 %v871_v53  ;;  %v177_v50 = vsub.s32 2, %v168_v49  ;;  %v173_v51 = vsub.s32 1, %v168_v49  ;;  %v181_v52 = vsub.s32 3, %v168_v49 }
  0x1a   :  { %359 = vmatprep.subr.bf16.mxu0 %v872_v54  ;;  %422 = vmatprep.subr.bf16.mxu1 %v874_v55 }
  0x1d   :  { %360 = vmatpush1.bf16.msra.mxu0 %v876_v56  ;;  %423 = vmatpush1.bf16.msra.mxu1 %v877_v57 }
  0x1e   :  { %361 = vmatprep.subr.bf16.mxu0 %v878_v58  ;;  %424 = vmatprep.subr.bf16.mxu1 %v880_v59 }
  0x21   :  { %362 = vmatpush1.bf16.msra.mxu0 %v882_v61  ;;  %425 = vmatpush1.bf16.msra.mxu1 %v883_v62 }
  0x8f   :  { %v32_v12 = vpop.xlane.xlu0 %31  ;;  %v36_v13 = vpop.xlane.xlu1 %35 }
  0x90   :  { %v44_v14 = vmul.f32 0.0078125, %v32_v12  ;;  %v46_v15 = vmul.f32 0.0078125, %v36_v13 }
  0x92   :  { %v1011_v16 = vsub.f32 %v25_v0, %v44_v14  ;;  %v1013_v17 = vsub.f32 %v27_v1, %v46_v15 }
  0x93   :  { %v34_v18 = vpop.xlane.xlu0 %33  ;;  %v38_v19 = vpop.xlane.xlu1 %37 }
  0x94   :  { %v45_v20 = vmul.f32 0.0078125, %v34_v18  ;;  %v56_v21 = vmul.f32 %v1011_v16, %v1011_v16  ;;  %v47_v22 = vmul.f32 0.0078125, %v38_v19  ;;  %v58_v25 = vmul.f32 %v1013_v17, %v1013_v17 }
  0x96   :  { %v1017_v23 = vsub.f32 %v26_v2, %v45_v20  ;;  %62 = vadd.xlane.f32.xlu0 %v56_v21  ;;  %v1019_v24 = vsub.f32 %v28_v3, %v47_v22  ;;  %v777_v21 = vld [vmem:[%s1394_s1] ss:$0 sm:$0xff] }
  0x97   :  { %v40_v26 = vpop.xlane.xlu0 %39  ;;  %v42_v27 = vpop.xlane.xlu1 %41 }
  0x98   :  { %v48_v28 = vmul.f32 0.0078125, %v40_v26  ;;  %v57_v29 = vmul.f32 %v1017_v23, %v1017_v23  ;;  %v49_v30 = vmul.f32 0.0078125, %v42_v27  ;;  %v59_v33 = vmul.f32 %v1019_v24, %v1019_v24 }
  0x9a   :  { %v1025_v31 = vsub.f32 %v29_v4, %v48_v28  ;;  %66 = vadd.xlane.f32.xlu0 %v58_v25  ;;  %64 = vadd.xlane.f32.xlu1 %v57_v29  ;;  %v1027_v32 = vsub.f32 %v30_v5, %v49_v30  ;;  %v778_v28 = vld [vmem:[%s1395_s2] ss:$0 sm:$0xff] }
  0x9c   :  { %v60_v34 = vmul.f32 %v1025_v31, %v1025_v31  ;;  %v61_v35 = vmul.f32 %v1027_v32, %v1027_v32 }
  0x9e   :  { %68 = vadd.xlane.f32.xlu1 %v59_v33  ;;  %70 = vadd.xlane.f32.xlu0 %v60_v34 }
  0xa2   :  { %72 = vadd.xlane.f32.xlu1 %v61_v35 }
 0x123   :  { %v63_v63 = vpop.xlane.xlu0 %62 }
 0x124   :  { %v74_v0 = vmul.f32 0.0078125, %v63_v63 }
 0x126   :  { %v80_v1 = vadd.f32 1e-05, %v74_v0 }
 0x127   :  { %v65_v2 = vpop.xlane.xlu1 %64  ;;  %v67_v3 = vpop.xlane.xlu0 %66 }
 0x128   :  { %884 = vrsqrt.f32 %v80_v1  ;;  %v75_v4 = vmul.f32 0.0078125, %v65_v2  ;;  %v76_v5 = vmul.f32 0.0078125, %v67_v3 }
 0x12a   :  { %v81_v6 = vadd.f32 1e-05, %v75_v4  ;;  %v82_v7 = vadd.f32 1e-05, %v76_v5 }
 0x12b   :  { %v69_v8 = vpop.xlane.xlu1 %68  ;;  %v71_v9 = vpop.xlane.xlu0 %70 }
 0x12c   :  { %886 = vrsqrt.f32 %v81_v6  ;;  %v77_v10 = vmul.f32 0.0078125, %v69_v8  ;;  %v78_v12 = vmul.f32 0.0078125, %v71_v9 }
 0x12d   :  { %888 = vrsqrt.f32 %v82_v7 }
 0x12e   :  { %v83_v11 = vadd.f32 1e-05, %v77_v10  ;;  %v84_v18 = vadd.f32 1e-05, %v78_v12 }
 0x12f   :  { %v73_v13 = vpop.xlane.xlu1 %72 }
 0x130   :  { %890 = vrsqrt.f32 %v83_v11  ;;  %v79_v14 = vmul.f32 0.0078125, %v73_v13 }
 0x132   :  { %v885_v15 = vpop.eup %884  ;;  %v85_v19 = vadd.f32 1e-05, %v79_v14 }
 0x133   :  { %v92_v20 = vmul.f32 %v885_v15, %v1011_v16 }
 0x134   :  { %892 = vrsqrt.f32 %v85_v19 }
 0x135   :  { %894 = vrsqrt.f32 %v84_v18  ;;  %v105_v26 = vmul.f32 %v777_v21, %v92_v20 }
 0x136   :  { %v887_v22 = vpop.eup %886 }
 0x137   :  { %v93_v25 = vmul.f32 %v887_v22, %v1017_v23  ;;  %v889_v27 = vpop.eup %888  ;;  %v118_v33 = vadd.f32 %v778_v28, %v105_v26 }
 0x138   :  { %v94_v16 = vmul.f32 %v889_v27, %v1013_v17 }
 0x139   :  { %v106_v29 = vmul.f32 %v777_v21, %v93_v25 }
 0x13a   :  { %v891_v30 = vpop.eup %890  ;;  %v107_v23 = vmul.f32 %v777_v21, %v94_v16 }
 0x13b   :  { %v119_v34 = vadd.f32 %v778_v28, %v106_v29  ;;  %v95_v35 = vmul.f32 %v891_v30, %v1019_v24 }
 0x13c   :  { %v120_v42 = vadd.f32 %v778_v28, %v107_v23 }
 0x13d   :  { %v124_v36 = vpack.c.bf16 %v119_v34, %v118_v33  ;;  %v108_v37 = vmul.f32 %v777_v21, %v95_v35 }
 0x13e   :  { %v893_v38 = vpop.eup %892 }
 0x13f   :  { %380 = vmatmul.mubr.bf16.vlgmr.msra.gmra.mrb[0].mxu0 %v124_v36  ;;  %443 = vmatmul.mubr.bf16.vlgmr.msra.gmra.mrb[0].mxu1 %v124_v36  ;;  %v895_v39 = vpop.eup %894  ;;  %v121_v40 = vadd.f32 %v778_v28, %v108_v37  ;;  %v97_v41 = vmul.f32 %v893_v38, %v1027_v32  ;;  %v169_v32 = vsub.s32 0, %v168_v49 }
 0x140   :  { %389 = vmatprep.mubr.bf16.mxu0 %v944_v60  ;;  %452 = vmatprep.mubr.bf16.mxu1 %v944_v60  ;;  %v96_v43 = vmul.f32 %v895_v39, %v1025_v31  ;;  %v165_v31 = vld [vmem:[%s1396_s4] sm:$0xf] }
 0x141   :  { %v125_v17 = vpack.c.bf16 %v121_v40, %v120_v42  ;;  %v110_v44 = vmul.f32 %v777_v21, %v97_v41  ;;  %v1134_v53 = vrot.slane %v165_v31, %v169_v32  ;;  %v1136_v54 = vrot.slane %v165_v31, %v177_v50 }
 0x142   :  { %v109_v24 = vmul.f32 %v777_v21, %v96_v43  ;;  %v1138_v55 = vrot.slane %v165_v31, %v173_v51  ;;  %v1140_v56 = vrot.slane %v165_v31, %v181_v52 }
 0x143   :  { %v123_v45 = vadd.f32 %v778_v28, %v110_v44 }
 0x144   :  { %v122_v46 = vadd.f32 %v778_v28, %v109_v24 }
 0x146   :  { %v126_v47 = vpack.c.bf16 %v123_v45, %v122_v46 }
 0x147   :  { %390 = vmatmul.mubr.bf16.gmra.mrb[4].mxu0 %v125_v17  ;;  %453 = vmatmul.mubr.bf16.gmra.mrb[4].mxu1 %v125_v17 }
 0x148   :  { %399 = vmatprep.mubr.bf16.mxu0 %v944_v60  ;;  %462 = vmatprep.mubr.bf16.mxu1 %v944_v60 }
 0x14f   :  { %400 = vmatmul.mubr.bf16.gmra.mrb[8].mxu0 %v126_v47  ;;  %463 = vmatmul.mubr.bf16.gmra.mrb[8].mxu1 %v126_v47 }
 0x212   :  { %v381_v57 = vpop.f32.mrb[0].mxu0  ;;  %v444_v58 = vpop.f32.mrb[0].mxu1 }
 0x213   :  { %v382_v59 = vadd.f32 %v381_v57, %v1134_v53  ;;  %v445_v60 = vadd.f32 %v444_v58, %v1136_v54  ;;  %v383_v61 = vpop.f32.mrb[1].mxu0  ;;  %v446_v62 = vpop.f32.mrb[1].mxu1 }
 0x214   :  { %v1145_v63 = vadd.f32 %v383_v61, %v1138_v55  ;;  %v1148_v0 = vadd.f32 %v446_v62, %v1140_v56  ;;  %v385_v1 = vpop.f32.mrb[2].mxu0  ;;  %v448_v2 = vpop.f32.mrb[2].mxu1 }
 0x215   :  { %v497_v3 = vmul.f32 0.044715, %v382_v59  ;;  %v499_v4 = vmul.f32 0.044715, %v445_v60  ;;  %v1153_v9 = vadd.f32 %v385_v1, %v1134_v53  ;;  %v1156_v10 = vadd.f32 %v448_v2, %v1136_v54  ;;  %v387_v11 = vpop.f32.mrb[3].mxu0  ;;  %v450_v12 = vpop.f32.mrb[3].mxu1 }
 0x216   :  { %v498_v5 = vmul.f32 0.044715, %v1145_v63  ;;  %v500_v6 = vmul.f32 0.044715, %v1148_v0  ;;  %v1161_v15 = vadd.f32 %v387_v11, %v1138_v55  ;;  %v1169_v33 = vadd.f32 %v450_v12, %v1140_v56 }
 0x217   :  { %v521_v7 = vmul.f32 %v497_v3, %v382_v59  ;;  %v523_v8 = vmul.f32 %v499_v4, %v445_v60  ;;  %v501_v20 = vmul.f32 0.044715, %v1153_v9  ;;  %v503_v25 = vmul.f32 0.044715, %v1156_v10 }
 0x218   :  { %v522_v13 = vmul.f32 %v498_v5, %v1145_v63  ;;  %v524_v14 = vmul.f32 %v500_v6, %v1148_v0  ;;  %v502_v38 = vmul.f32 0.044715, %v1161_v15  ;;  %v1177_v40 = vmul.f32 0.5, %v382_v59 }
 0x219   :  { %v545_v18 = vmul.f32 %v521_v7, %v382_v59  ;;  %v547_v19 = vmul.f32 %v523_v8, %v445_v60  ;;  %v525_v30 = vmul.f32 %v501_v20, %v1153_v9  ;;  %v527_v37 = vmul.f32 %v503_v25, %v1156_v10 }
 0x21a   :  { %v546_v21 = vmul.f32 %v522_v13, %v1145_v63  ;;  %v548_v22 = vmul.f32 %v524_v14, %v1148_v0  ;;  %v391_v26 = vpop.f32.mrb[4].mxu0  ;;  %v454_v27 = vpop.f32.mrb[4].mxu1  ;;  %v526_v46 = vmul.f32 %v502_v38, %v1161_v15  ;;  %v504_v49 = vmul.f32 0.044715, %v1169_v33 }
 0x21b   :  { %v569_v28 = vadd.f32 %v545_v18, %v382_v59  ;;  %v571_v29 = vadd.f32 %v547_v19, %v445_v60  ;;  %v393_v34 = vpop.f32.mrb[5].mxu0  ;;  %v456_v16 = vpop.f32.mrb[5].mxu1  ;;  %v549_v43 = vmul.f32 %v525_v30, %v1153_v9  ;;  %v551_v45 = vmul.f32 %v527_v37, %v1156_v10 }
 0x21c   :  { %v570_v35 = vadd.f32 %v546_v21, %v1145_v63  ;;  %v572_v36 = vadd.f32 %v548_v22, %v1148_v0  ;;  %v395_v23 = vpop.f32.mrb[6].mxu0  ;;  %v1175_v39 = vpop.f32.mrb[6].mxu1  ;;  %v1189_v32 = vadd.f32 %v391_v26, %v1134_v53  ;;  %v550_v31 = vmul.f32 %v526_v46, %v1161_v15 }
 0x21d   :  { %v593_v41 = vmul.f32 0.7978845, %v569_v28  ;;  %v595_v42 = vmul.f32 0.7978845, %v571_v29  ;;  %v1180_v17 = vpop.f32.mrb[7].mxu0  ;;  %v1184_v47 = vpop.f32.mrb[7].mxu1  ;;  %v573_v48 = vadd.f32 %v549_v43, %v1153_v9  ;;  %v575_v50 = vadd.f32 %v551_v45, %v1156_v10 }
 0x21e   :  { %v594_v44 = vmul.f32 0.7978845, %v570_v35  ;;  %v596_v24 = vmul.f32 0.7978845, %v572_v36  ;;  %v1194_v51 = vadd.f32 %v454_v27, %v1136_v54  ;;  %v475_v52 = vmul.f32 0.5, %v445_v60 }
 0x21f   :  { %896 = vtanh.f32 %v593_v41  ;;  %v597_v57 = vmul.f32 0.7978845, %v573_v48  ;;  %v528_v58 = vmul.f32 %v504_v49, %v1169_v33  ;;  %v599_v59 = vmul.f32 0.7978845, %v575_v50 }
 0x220   :  { %898 = vtanh.f32 %v595_v42  ;;  %v574_v61 = vadd.f32 %v550_v31, %v1161_v15  ;;  %v505_v62 = vmul.f32 0.044715, %v1189_v32  ;;  %v474_v3 = vmul.f32 0.5, %v1145_v63 }
 0x221   :  { %900 = vtanh.f32 %v594_v44  ;;  %v552_v4 = vmul.f32 %v528_v58, %v1169_v33  ;;  %v507_v60 = vmul.f32 0.044715, %v1194_v51  ;;  %v1212_v11 = vadd.f32 %v393_v34, %v1138_v55 }
 0x222   :  { %902 = vtanh.f32 %v596_v24  ;;  %v1199_v1 = vpop.f32.mrb[8].mxu0  ;;  %v1201_v2 = vpop.f32.mrb[8].mxu1  ;;  %v598_v7 = vmul.f32 0.7978845, %v574_v61  ;;  %v529_v8 = vmul.f32 %v505_v62, %v1189_v32  ;;  %v1221_v18 = vadd.f32 %v456_v16, %v1140_v56 }
 0x223   :  { %904 = vtanh.f32 %v597_v57  ;;  %v1206_v5 = vpop.f32.mrb[9].mxu0  ;;  %v1208_v6 = vpop.f32.mrb[9].mxu1  ;;  %v576_v63 = vadd.f32 %v552_v4, %v1169_v33  ;;  %v531_v14 = vmul.f32 %v507_v60, %v1194_v51  ;;  %v1224_v19 = vadd.f32 %v395_v23, %v1134_v53 }
 0x224   :  { %906 = vtanh.f32 %v599_v59  ;;  %v1214_v12 = vpop.f32.mrb[10].mxu0  ;;  %v1216_v13 = vpop.f32.mrb[10].mxu1  ;;  %v476_v22 = vmul.f32 0.5, %v1148_v0  ;;  %v553_v25 = vmul.f32 %v529_v8, %v1189_v32  ;;  %v506_v26 = vmul.f32 0.044715, %v1212_v11 }
 0x225   :  { %v1226_v20 = vpop.f32.mrb[11].mxu0  ;;  %v1228_v21 = vpop.f32.mrb[11].mxu1  ;;  %908 = vtanh.f32 %v598_v7  ;;  %v477_v27 = vmul.f32 0.5, %v1153_v9  ;;  %v600_v28 = vmul.f32 0.7978845, %v576_v63  ;;  %v555_v29 = vmul.f32 %v531_v14, %v1194_v51 }
 0x226   :  { %v508_v30 = vmul.f32 0.044715, %v1221_v18  ;;  %v479_v34 = vmul.f32 0.5, %v1156_v10  ;;  %v577_v16 = vadd.f32 %v553_v25, %v1189_v32  ;;  %v530_v35 = vmul.f32 %v506_v26, %v1212_v11 }
 0x227   :  { %v509_v0 = vmul.f32 0.044715, %v1224_v19  ;;  %v478_v37 = vmul.f32 0.5, %v1161_v15  ;;  %910 = vtanh.f32 %v600_v28  ;;  %v579_v38 = vadd.f32 %v555_v29, %v1194_v51 }
 0x228   :  { %v532_v9 = vmul.f32 %v508_v30, %v1221_v18  ;;  %v601_v42 = vmul.f32 0.7978845, %v577_v16  ;;  %v554_v43 = vmul.f32 %v530_v35, %v1212_v11  ;;  %v1248_v15 = vadd.f32 %v1175_v39, %v1136_v54 }
 0x229   :  { %v897_v36 = vpop.eup %896  ;;  %v533_v10 = vmul.f32 %v509_v0, %v1224_v19  ;;  %v603_v45 = vmul.f32 0.7978845, %v579_v38  ;;  %v480_v63 = vmul.f32 0.5, %v1169_v33  ;;  %v1268_v35 = vadd.f32 %v1184_v47, %v1140_v56 }
 0x22a   :  { %v899_v23 = vpop.eup %898  ;;  %v641_v41 = vadd.f32 1.0, %v897_v36  ;;  %v556_v46 = vmul.f32 %v532_v9, %v1221_v18  ;;  %912 = vtanh.f32 %v601_v42  ;;  %v578_v31 = vadd.f32 %v554_v43, %v1212_v11 }
 0x22b   :  { %v901_v44 = vpop.eup %900  ;;  %v643_v24 = vadd.f32 1.0, %v899_v23  ;;  %914 = vtanh.f32 %v603_v45  ;;  %v557_v39 = vmul.f32 %v533_v10, %v1224_v19  ;;  %v511_v14 = vmul.f32 0.044715, %v1248_v15 }
 0x22c   :  { %v903_v48 = vpop.eup %902  ;;  %v665_v49 = vmul.f32 %v641_v41, %v1177_v40  ;;  %v642_v50 = vadd.f32 1.0, %v901_v44  ;;  %v580_v61 = vadd.f32 %v556_v46, %v1221_v18  ;;  %v602_v7 = vmul.f32 0.7978845, %v578_v31 }
 0x22d   :  { %v905_v57 = vpop.eup %904  ;;  %v667_v58 = vmul.f32 %v643_v24, %v475_v52  ;;  %v644_v59 = vadd.f32 1.0, %v903_v48  ;;  %v581_v52 = vadd.f32 %v557_v39, %v1224_v19  ;;  %v535_v33 = vmul.f32 %v511_v14, %v1248_v15 }
 0x22e   :  { %v907_v62 = vpop.eup %906  ;;  %v666_v4 = vmul.f32 %v642_v50, %v474_v3  ;;  %v645_v60 = vadd.f32 1.0, %v905_v57  ;;  %v604_v40 = vmul.f32 0.7978845, %v580_v61  ;;  %916 = vtanh.f32 %v602_v7 }
 0x22f   :  { %v668_v8 = vmul.f32 %v644_v59, %v476_v22  ;;  %v909_v25 = vpop.eup %908  ;;  %v647_v28 = vadd.f32 1.0, %v907_v62  ;;  %v481_v3 = vmul.f32 0.5, %v1189_v32  ;;  %v1264_v22 = vadd.f32 %v1180_v17, %v1138_v55 }
 0x230   :  { %v823_v26 = vpack.c.bf16 %v666_v4, %v665_v49  ;;  %v669_v30 = vmul.f32 %v645_v60, %v477_v27  ;;  %v646_v16 = vadd.f32 1.0, %v909_v25  ;;  %918 = vtanh.f32 %v604_v40 }
 0x231   :  { %v824_v29 = vpack.c.bf16 %v668_v8, %v667_v58  ;;  %v911_v0 = vpop.eup %910  ;;  %v483_v36 = vmul.f32 0.5, %v1194_v51  ;;  %v605_v38 = vmul.f32 0.7978845, %v581_v52  ;;  %v1276_v32 = vadd.f32 %v1199_v1, %v1134_v53 }
 0x232   :  { %761 = vst [vmem:[%s1397_s5] sm:$0xff] %v823_v26  ;;  %v670_v27 = vmul.f32 %v646_v16, %v478_v37  ;;  %v671_v9 = vmul.f32 %v647_v28, %v479_v34  ;;  %v648_v17 = vadd.f32 1.0, %v911_v0  ;;  %v482_v23 = vmul.f32 0.5, %v1212_v11 }
 0x233   :  { %762 = vst [vmem:[%s1397_s5 + $0x8] sm:$0xff] %v824_v29  ;;  %v559_v47 = vmul.f32 %v535_v33, %v1248_v15  ;;  %v510_v42 = vmul.f32 0.044715, %v1264_v22  ;;  %v512_v43 = vmul.f32 0.044715, %v1268_v35  ;;  %v1284_v37 = vadd.f32 %v1201_v2, %v1136_v54 }
 0x234   :  { %v825_v41 = vpack.c.bf16 %v670_v27, %v669_v30  ;;  %v913_v51 = vpop.eup %912  ;;  %v672_v10 = vmul.f32 %v648_v17, %v480_v63  ;;  %v513_v34 = vmul.f32 0.044715, %v1276_v32  ;;  %v1290_v11 = vadd.f32 %v1206_v5, %v1138_v55 }
 0x235   :  { %v583_v1 = vadd.f32 %v559_v47, %v1248_v15  ;;  %v915_v44 = vpop.eup %914  ;;  %v649_v24 = vadd.f32 1.0, %v913_v51  ;;  %920 = vtanh.f32 %v605_v38  ;;  %v534_v2 = vmul.f32 %v510_v42, %v1264_v22 }
 0x236   :  { %763 = vst [vmem:[%s1397_s5 + $0x10] sm:$0xff] %v825_v41  ;;  %v536_v45 = vmul.f32 %v512_v43, %v1268_v35  ;;  %v826_v46 = vpack.c.bf16 %v672_v10, %v671_v9  ;;  %v651_v48 = vadd.f32 1.0, %v915_v44  ;;  %v537_v50 = vmul.f32 %v513_v34, %v1276_v32 }
 0x237   :  { %v607_v49 = vmul.f32 0.7978845, %v583_v1  ;;  %v484_v31 = vmul.f32 0.5, %v1221_v18  ;;  %v558_v5 = vmul.f32 %v534_v2, %v1264_v22  ;;  %v515_v58 = vmul.f32 0.044715, %v1284_v37 }
 0x238   :  { %v560_v57 = vmul.f32 %v536_v45, %v1268_v35  ;;  %v917_v59 = vpop.eup %916  ;;  %764 = vst [vmem:[%s1397_s5 + $0x18] sm:$0xff] %v826_v46  ;;  %v673_v61 = vmul.f32 %v649_v24, %v481_v3  ;;  %v675_v62 = vmul.f32 %v651_v48, %v483_v36  ;;  %v561_v4 = vmul.f32 %v537_v50, %v1276_v32 }
 0x239   :  { %922 = vtanh.f32 %v607_v49  ;;  %v650_v7 = vadd.f32 1.0, %v917_v59  ;;  %v582_v18 = vadd.f32 %v558_v5, %v1264_v22  ;;  %v539_v8 = vmul.f32 %v515_v58, %v1284_v37 }
 0x23a   :  { %v919_v60 = vpop.eup %918  ;;  %v584_v39 = vadd.f32 %v560_v57, %v1268_v35  ;;  %v585_v40 = vadd.f32 %v561_v4, %v1276_v32  ;;  %v514_v14 = vmul.f32 0.044715, %v1290_v11  ;;  %v1313_v25 = vadd.f32 %v1208_v6, %v1140_v56 }
 0x23b   :  { %v652_v63 = vadd.f32 1.0, %v919_v60  ;;  %v674_v26 = vmul.f32 %v650_v7, %v482_v23  ;;  %v606_v28 = vmul.f32 0.7978845, %v582_v18  ;;  %v563_v29 = vmul.f32 %v539_v8, %v1284_v37 }
 0x23c   :  { %v608_v52 = vmul.f32 0.7978845, %v584_v39  ;;  %v609_v16 = vmul.f32 0.7978845, %v585_v40  ;;  %v538_v3 = vmul.f32 %v514_v14, %v1290_v11  ;;  %v516_v6 = vmul.f32 0.044715, %v1313_v25 }
 0x23d   :  { %v676_v30 = vmul.f32 %v652_v63, %v484_v31  ;;  %v827_v33 = vpack.c.bf16 %v674_v26, %v673_v61  ;;  %924 = vtanh.f32 %v606_v28  ;;  %v587_v0 = vadd.f32 %v563_v29, %v1284_v37 }
 0x23e   :  { %926 = vtanh.f32 %v608_v52  ;;  %v562_v36 = vmul.f32 %v538_v3, %v1290_v11  ;;  %v1325_v17 = vadd.f32 %v1214_v12, %v1134_v53  ;;  %v540_v47 = vmul.f32 %v516_v6, %v1313_v25 }
 0x23f   :  { %v828_v27 = vpack.c.bf16 %v676_v30, %v675_v62  ;;  %v921_v38 = vpop.eup %920  ;;  %765 = vst [vmem:[%s1397_s5 + $0x20] sm:$0xff] %v827_v33  ;;  %928 = vtanh.f32 %v609_v16  ;;  %v611_v9 = vmul.f32 0.7978845, %v587_v0  ;;  %v1334_v41 = vadd.f32 %v1216_v13, %v1136_v54 }
 0x240   :  { %v586_v23 = vadd.f32 %v562_v36, %v1290_v11  ;;  %v1338_v42 = vadd.f32 %v1226_v20, %v1138_v55  ;;  %v517_v43 = vmul.f32 0.044715, %v1325_v17  ;;  %v1343_v53 = vadd.f32 %v1228_v21, %v1140_v56 }
 0x241   :  { %766 = vst [vmem:[%s1397_s5 + $0x28] sm:$0xff] %v828_v27  ;;  %930 = vtanh.f32 %v611_v9  ;;  %v564_v10 = vmul.f32 %v540_v47, %v1313_v25  ;;  %v519_v1 = vmul.f32 0.044715, %v1334_v41  ;;  %v485_v54 = vmul.f32 0.5, %v1224_v19 }
 0x242   :  { %v610_v51 = vmul.f32 0.7978845, %v586_v23  ;;  %v653_v13 = vadd.f32 1.0, %v921_v38  ;;  %v541_v34 = vmul.f32 %v517_v43, %v1325_v17  ;;  %v518_v55 = vmul.f32 0.044715, %v1338_v42 }
 0x243   :  { %v923_v12 = vpop.eup %922  ;;  %v588_v44 = vadd.f32 %v564_v10, %v1313_v25  ;;  %v543_v56 = vmul.f32 %v519_v1, %v1334_v41  ;;  %v487_v21 = vmul.f32 0.5, %v1248_v15  ;;  %v520_v45 = vmul.f32 0.044715, %v1343_v53 }
 0x244   :  { %v655_v20 = vadd.f32 1.0, %v923_v12  ;;  %932 = vtanh.f32 %v610_v51  ;;  %v565_v24 = vmul.f32 %v541_v34, %v1325_v17  ;;  %v542_v2 = vmul.f32 %v518_v55, %v1338_v42 }
 0x245   :  { %v486_v19 = vmul.f32 0.5, %v1264_v22  ;;  %v488_v46 = vmul.f32 0.5, %v1268_v35  ;;  %v612_v48 = vmul.f32 0.7978845, %v588_v44  ;;  %v567_v49 = vmul.f32 %v543_v56, %v1334_v41 }
 0x246   :  { %v677_v31 = vmul.f32 %v653_v13, %v485_v54  ;;  %v589_v5 = vadd.f32 %v565_v24, %v1325_v17  ;;  %v566_v57 = vmul.f32 %v542_v2, %v1338_v42  ;;  %v544_v15 = vmul.f32 %v520_v45, %v1343_v53 }
 0x247   :  { %v925_v50 = vpop.eup %924  ;;  %v679_v59 = vmul.f32 %v655_v20, %v487_v21  ;;  %934 = vtanh.f32 %v612_v48  ;;  %v591_v62 = vadd.f32 %v567_v49, %v1334_v41  ;;  %v489_v29 = vmul.f32 0.5, %v1276_v32 }
 0x248   :  { %v927_v58 = vpop.eup %926  ;;  %v654_v61 = vadd.f32 1.0, %v925_v50  ;;  %v613_v35 = vmul.f32 0.7978845, %v589_v5  ;;  %v590_v60 = vadd.f32 %v566_v57, %v1338_v42  ;;  %v568_v7 = vmul.f32 %v544_v15, %v1343_v53 }
 0x249   :  { %v929_v22 = vpop.eup %928  ;;  %v656_v4 = vadd.f32 1.0, %v927_v58  ;;  %v615_v8 = vmul.f32 0.7978845, %v591_v62  ;;  %v490_v3 = vmul.f32 0.5, %v1290_v11  ;;  %v491_v36 = vmul.f32 0.5, %v1284_v37 }
 0x24a   :  { %v678_v18 = vmul.f32 %v654_v61, %v486_v19  ;;  %v657_v39 = vadd.f32 1.0, %v929_v22  ;;  %936 = vtanh.f32 %v613_v35  ;;  %v614_v40 = vmul.f32 0.7978845, %v590_v60 }
 0x24b   :  { %v680_v63 = vmul.f32 %v656_v4, %v488_v46  ;;  %v592_v14 = vadd.f32 %v568_v7, %v1343_v53  ;;  %v931_v26 = vpop.eup %930  ;;  %938 = vtanh.f32 %v615_v8  ;;  %v492_v23 = vmul.f32 0.5, %v1313_v25 }
 0x24c   :  { %v829_v28 = vpack.c.bf16 %v678_v18, %v677_v31  ;;  %940 = vtanh.f32 %v614_v40  ;;  %v681_v33 = vmul.f32 %v657_v39, %v489_v29  ;;  %v659_v0 = vadd.f32 1.0, %v931_v26 }
 0x24d   :  { %v830_v52 = vpack.c.bf16 %v680_v63, %v679_v59  ;;  %v616_v30 = vmul.f32 0.7978845, %v592_v14  ;;  %v493_v51 = vmul.f32 0.5, %v1325_v17  ;;  %v495_v34 = vmul.f32 0.5, %v1334_v41 }
 0x24e   :  { %v933_v16 = vpop.eup %932  ;;  %767 = vst [vmem:[%s1397_s5 + $0x30] sm:$0xff] %v829_v28  ;;  %v683_v38 = vmul.f32 %v659_v0, %v491_v36  ;;  %v494_v55 = vmul.f32 0.5, %v1338_v42  ;;  %v496_v21 = vmul.f32 0.5, %v1343_v53 }
 0x24f   :  { %768 = vst [vmem:[%s1397_s5 + $0x38] sm:$0xff] %v830_v52  ;;  %v658_v27 = vadd.f32 1.0, %v933_v16  ;;  %942 = vtanh.f32 %v616_v30 }
 0x251   :  { %v682_v32 = vmul.f32 %v658_v27, %v490_v3  ;;  %v935_v6 = vpop.eup %934 }
 0x252   :  { %v660_v47 = vadd.f32 1.0, %v935_v6 }
 0x253   :  { %v831_v9 = vpack.c.bf16 %v682_v32, %v681_v33 }
 0x254   :  { %v937_v43 = vpop.eup %936  ;;  %v684_v11 = vmul.f32 %v660_v47, %v492_v23 }
 0x255   :  { %769 = vst [vmem:[%s1397_s5 + $0x40] sm:$0xff] %v831_v9  ;;  %v939_v12 = vpop.eup %938  ;;  %v661_v10 = vadd.f32 1.0, %v937_v43 }
 0x256   :  { %v941_v1 = vpop.eup %940  ;;  %v832_v54 = vpack.c.bf16 %v684_v11, %v683_v38  ;;  %v663_v37 = vadd.f32 1.0, %v939_v12 }
 0x257   :  { %v685_v13 = vmul.f32 %v661_v10, %v493_v51  ;;  %v662_v25 = vadd.f32 1.0, %v941_v1 }
 0x258   :  { %770 = vst [vmem:[%s1397_s5 + $0x48] sm:$0xff] %v832_v54  ;;  %v687_v44 = vmul.f32 %v663_v37, %v495_v34 }
 0x259   :  { %v943_v20 = vpop.eup %942  ;;  %v686_v56 = vmul.f32 %v662_v25, %v494_v55 }
 0x25a   :  { %v664_v17 = vadd.f32 1.0, %v943_v20 }
 0x25b   :  { %v833_v24 = vpack.c.bf16 %v686_v56, %v685_v13 }
 0x25c   :  { %v688_v2 = vmul.f32 %v664_v17, %v496_v21 }
 0x25d   :  { %771 = vst [vmem:[%s1397_s5 + $0x50] sm:$0xff] %v833_v24 }
 0x25e   :  { %v834_v41 = vpack.c.bf16 %v688_v2, %v687_v44 }
 0x260   :  { %772 = vst [vmem:[%s1397_s5 + $0x58] sm:$0xff] %v834_v41 }

// kernel: tile.17
= control target key start
LH: loop header
LB: loop body
LE: loop exit
PB: predicated region body
PF: predicated region fallthrough
CT: control target
= control target key end

     0   :  { %s22_s0 = inlined_call_operand.vmem [shape: s32[12], index: 0, kind: input, shape index: {}]   ;;  %s23_s1 = inlined_call_operand.vmem [shape: s32[2,12], index: 1, kind: output, shape index: {}]  }
   0x1   :  { %v4_v0 = vld [vmem:[%s22_s0] ss:$0 sm:$0xff] }
   0x2   :  { %5 = vst [vmem:[%s23_s1] sm:$0x3] %v4_v0 }

// kernel: tile.19
= control target key start
LH: loop header
LB: loop body
LE: loop exit
PB: predicated region body
PF: predicated region fallthrough
CT: control target
= control target key end

     0   :  { %s85_s0 = inlined_call_operand.vmem [shape: s32[2,12], index: 0, kind: input, shape index: {}]   ;;  %s86_s1 = inlined_call_operand.hbm [shape: s32[1,24], index: 1, kind: output, shape index: {}]  }
   0x1   :  { %v5_v0 = vld [vmem:[%s85_s0] sm:$0x3] }
   0x2   :  { %6 = vst [vmem:[#allocation3] sm:$0x3] %v5_v0 }
   0x3   :  { %2 = vsyncpa [#allocation1], 0  ;;  %vm8_vm0 = vcmask 97280   ;;  %s58_s0 = smov 12   ;;  %vm14_vm1 = vcmask 195680   ;;  %s59_s8 = smov [#allocation0]  }
   0x4   :  { %s26_s9 = sshll.u32 %s59_s8, 4  ;;  %s27_s9 = int_to_ptr.vmem [resolvable:$true] %s26_s9 }
   0x5   :  { %s34_s10 = scalar_lea.vmem %s27_s9, 16  ;;  %s38_s11 = scalar_lea.vmem %s27_s9, 32 }
   0x6   :  { %p35_p0 = scmp.ne.s32.totalorder %s27_s9, %s34_s10  ;;  %p39_p1 = scmp.lt.s32.totalorder %s27_s9, %s27_s9 }
   0x7   :  { %p40_p2 = scmp.lt.s32.totalorder %s38_s11, %s34_s10 }
   0x9   :  { %v11_v1 = vld [vmem:[#allocation3 + $0x1] sm:$0x1]   ;;  %v7_v2 = vld [vmem:[#allocation3] sm:$0x1]   ;;  %p41_p3 = por %p40_p2, %p39_p1 }
   0xa   :  { %12 = vrot.lane.b32.xlu0 %v11_v1, %s58_s0  ;;  %9 = vst.msk [vmem:[#allocation2] sm:$0x1] %vm8_vm0, %v7_v2  }
   0xb   :  { %p42_p4 = pnand %p41_p3, %p35_p0 }
  0x7c   :  { %v13_v3 = vpop.permute.xlu0 %12  }
  0x7d   :  { %15 = vst.msk [vmem:[#allocation2] sm:$0x1] %vm14_vm1, %v13_v3  }
  0x84   :  { %v19_v4 = vld [vmem:[#allocation2] sm:$0x1] }
  0x85   :  { %21 = vst [vmem:[#allocation0] sm:$0x1] %v19_v4 }
  0x86   :  { %45 = shalt.err (!%p42_p4)
}
  0x87   :  { %s46_s14 = scalar_lea.hbm %s86_s1, 16 }
  0x88   :  { %p47_p5 = scmp.ne.s32.totalorder %s86_s1, %s46_s14  ;;  %p50_p6 = scmp.lt.u32.totalorder %s46_s14, %s86_s1 }
  0x8a   :  { %p52_p7 = pnand %p50_p6, %p47_p5 }
  0x8c   :  { %55 = shalt.err (!%p52_p7)
}
  0x8d   :  { %29 = dma.vmem_to_hbm [thread:$0]  %s27_s9, 16, %s86_s1, [#allocation1]  }
  0x8e   :  { %56 = dma.done.wait [#allocation1], 16  }
  0x8f   :  { %57 = vsyncadd [#allocation1], 4294967280 }
  0x90   :  { %31 = vsyncpa [#allocation1], 1 }

// kernel: gpt2_target_likelihood.22
= control target key start
LH: loop header
LB: loop body
LE: loop exit
PB: predicated region body
PF: predicated region fallthrough
CT: control target
= control target key end

     0   :  { %s243_s0 = inlined_call_operand.vmem [shape: f32[48,128], index: 0, kind: input, shape index: {}]   ;;  %s244_s1 = inlined_call_operand.vmem [shape: f32[1,128], index: 1, kind: input, shape index: {}]   ;;  %s245_s2 = inlined_call_operand.vmem [shape: f32[1,128], index: 2, kind: input, shape index: {}]   ;;  %s246_s3 = inlined_call_operand.vmem [shape: bf16[48,128], index: 3, kind: output, shape index: {}]  }
   0x1   :  { %v14_v0 = vld [vmem:[%s243_s0] sm:$0xff]  ;;  %v16_v1 = vld [vmem:[%s243_s0 + $0x10] sm:$0xff]  ;;  %v15_v2 = vld [vmem:[%s243_s0 + $0x8] sm:$0xff] }
   0x2   :  { %20 = vadd.xlane.f32.xlu0 %v14_v0  ;;  %24 = vadd.xlane.f32.xlu1 %v16_v1  ;;  %v17_v3 = vld [vmem:[%s243_s0 + $0x18] sm:$0xff]  ;;  %v18_v4 = vld [vmem:[%s243_s0 + $0x20] sm:$0xff]  ;;  %v19_v5 = vld [vmem:[%s243_s0 + $0x28] sm:$0xff] }
   0x3   :  { %v147_v50 = vld [vmem:[%s244_s1] ss:$0 sm:$0xff] }
   0x4   :  { %v148_v55 = vld [vmem:[%s245_s2] ss:$0 sm:$0xff] }
   0x6   :  { %22 = vadd.xlane.f32.xlu0 %v15_v2  ;;  %26 = vadd.xlane.f32.xlu1 %v17_v3 }
   0xa   :  { %28 = vadd.xlane.f32.xlu0 %v18_v4  ;;  %30 = vadd.xlane.f32.xlu1 %v19_v5 }
  0x8f   :  { %v21_v6 = vpop.xlane.xlu0 %20  ;;  %v25_v7 = vpop.xlane.xlu1 %24 }
  0x90   :  { %v33_v8 = vmul.f32 0.0078125, %v21_v6  ;;  %v35_v9 = vmul.f32 0.0078125, %v25_v7 }
  0x92   :  { %v39_v10 = vsub.f32 %v14_v0, %v33_v8  ;;  %v41_v11 = vsub.f32 %v16_v1, %v35_v9 }
  0x93   :  { %v23_v12 = vpop.xlane.xlu0 %22  ;;  %v27_v13 = vpop.xlane.xlu1 %26 }
  0x94   :  { %v34_v14 = vmul.f32 0.0078125, %v23_v12  ;;  %v45_v15 = vmul.f32 %v39_v10, %v39_v10  ;;  %v36_v16 = vmul.f32 0.0078125, %v27_v13  ;;  %v47_v19 = vmul.f32 %v41_v11, %v41_v11 }
  0x96   :  { %v40_v17 = vsub.f32 %v15_v2, %v34_v14  ;;  %51 = vadd.xlane.f32.xlu0 %v45_v15  ;;  %v42_v18 = vsub.f32 %v17_v3, %v36_v16 }
  0x97   :  { %v29_v20 = vpop.xlane.xlu0 %28  ;;  %v31_v21 = vpop.xlane.xlu1 %30 }
  0x98   :  { %v37_v22 = vmul.f32 0.0078125, %v29_v20  ;;  %v46_v23 = vmul.f32 %v40_v17, %v40_v17  ;;  %v38_v24 = vmul.f32 0.0078125, %v31_v21  ;;  %v48_v27 = vmul.f32 %v42_v18, %v42_v18 }
  0x9a   :  { %v43_v25 = vsub.f32 %v18_v4, %v37_v22  ;;  %55 = vadd.xlane.f32.xlu0 %v47_v19  ;;  %53 = vadd.xlane.f32.xlu1 %v46_v23  ;;  %v44_v26 = vsub.f32 %v19_v5, %v38_v24 }
  0x9c   :  { %v49_v28 = vmul.f32 %v43_v25, %v43_v25  ;;  %v50_v29 = vmul.f32 %v44_v26, %v44_v26 }
  0x9e   :  { %57 = vadd.xlane.f32.xlu1 %v48_v27  ;;  %59 = vadd.xlane.f32.xlu0 %v49_v28 }
  0xa2   :  { %61 = vadd.xlane.f32.xlu1 %v50_v29 }
 0x123   :  { %v52_v30 = vpop.xlane.xlu0 %51 }
 0x124   :  { %v63_v31 = vmul.f32 0.0078125, %v52_v30 }
 0x126   :  { %v69_v32 = vadd.f32 1e-05, %v63_v31 }
 0x127   :  { %v54_v33 = vpop.xlane.xlu1 %53  ;;  %v56_v34 = vpop.xlane.xlu0 %55 }
 0x128   :  { %178 = vrsqrt.f32 %v69_v32  ;;  %v64_v35 = vmul.f32 0.0078125, %v54_v33  ;;  %v65_v36 = vmul.f32 0.0078125, %v56_v34 }
 0x12a   :  { %v70_v37 = vadd.f32 1e-05, %v64_v35  ;;  %v71_v38 = vadd.f32 1e-05, %v65_v36 }
 0x12b   :  { %v58_v39 = vpop.xlane.xlu1 %57  ;;  %v60_v40 = vpop.xlane.xlu0 %59 }
 0x12c   :  { %180 = vrsqrt.f32 %v70_v37  ;;  %v66_v41 = vmul.f32 0.0078125, %v58_v39  ;;  %v67_v42 = vmul.f32 0.0078125, %v60_v40 }
 0x12d   :  { %182 = vrsqrt.f32 %v71_v38 }
 0x12e   :  { %v72_v43 = vadd.f32 1e-05, %v66_v41  ;;  %v73_v44 = vadd.f32 1e-05, %v67_v42 }
 0x12f   :  { %v62_v45 = vpop.xlane.xlu1 %61 }
 0x130   :  { %184 = vrsqrt.f32 %v72_v43  ;;  %v68_v46 = vmul.f32 0.0078125, %v62_v45 }
 0x131   :  { %186 = vrsqrt.f32 %v73_v44 }
 0x132   :  { %v179_v47 = vpop.eup %178  ;;  %v74_v48 = vadd.f32 1e-05, %v68_v46 }
 0x133   :  { %v81_v49 = vmul.f32 %v179_v47, %v39_v10 }
 0x134   :  { %188 = vrsqrt.f32 %v74_v48 }
 0x135   :  { %v94_v53 = vmul.f32 %v147_v50, %v81_v49 }
 0x136   :  { %v181_v51 = vpop.eup %180 }
 0x137   :  { %v183_v52 = vpop.eup %182  ;;  %v82_v54 = vmul.f32 %v181_v51, %v40_v17  ;;  %v107_v60 = vadd.f32 %v148_v55, %v94_v53 }
 0x138   :  { %v83_v56 = vmul.f32 %v183_v52, %v41_v11 }
 0x139   :  { %v95_v57 = vmul.f32 %v147_v50, %v82_v54 }
 0x13a   :  { %v185_v58 = vpop.eup %184  ;;  %v96_v62 = vmul.f32 %v147_v50, %v83_v56 }
 0x13b   :  { %v187_v59 = vpop.eup %186  ;;  %v108_v61 = vadd.f32 %v148_v55, %v95_v57  ;;  %v84_v63 = vmul.f32 %v185_v58, %v42_v18 }
 0x13c   :  { %v85_v0 = vmul.f32 %v187_v59, %v43_v25  ;;  %v109_v4 = vadd.f32 %v148_v55, %v96_v62 }
 0x13d   :  { %v164_v1 = vpack.c.bf16 %v108_v61, %v107_v60  ;;  %v97_v2 = vmul.f32 %v147_v50, %v84_v63 }
 0x13e   :  { %v189_v3 = vpop.eup %188  ;;  %v98_v6 = vmul.f32 %v147_v50, %v85_v0 }
 0x13f   :  { %165 = vst [vmem:[%s246_s3] sm:$0xff] %v164_v1   ;;  %v110_v5 = vadd.f32 %v148_v55, %v97_v2  ;;  %v86_v7 = vmul.f32 %v189_v3, %v44_v26 }
 0x140   :  { %v111_v10 = vadd.f32 %v148_v55, %v98_v6 }
 0x141   :  { %v169_v8 = vpack.c.bf16 %v110_v5, %v109_v4  ;;  %v99_v9 = vmul.f32 %v147_v50, %v86_v7 }
 0x143   :  { %176 = vst [vmem:[%s246_s3 + $0x8] sm:$0xff] %v169_v8   ;;  %v112_v11 = vadd.f32 %v148_v55, %v99_v9 }
 0x145   :  { %v174_v12 = vpack.c.bf16 %v112_v11, %v111_v10 }
 0x147   :  { %177 = vst [vmem:[%s246_s3 + $0x10] sm:$0xff] %v174_v12  }

// kernel: gpt2_target_likelihood.16
= control target key start
LH: loop header
LB: loop body
LE: loop exit
PB: predicated region body
PF: predicated region fallthrough
CT: control target
= control target key end

     0   :  { %s854_s1 = inlined_call_operand.vmem [shape: bf16[512,128], index: 1, kind: input, shape index: {}]   ;;  %s855_s0 = inlined_call_operand.vmem [shape: bf16[48,512], index: 0, kind: input, shape index: {}]   ;;  %s856_s3 = inlined_call_operand.vmem [shape: f32[48,128], index: 3, kind: input, shape index: {}]   ;;  %s857_s2 = inlined_call_operand.vmem [shape: f32[1,128], index: 2, kind: input, shape index: {}]   ;;  %s858_s4 = inlined_call_operand.vmem [shape: f32[48,128], index: 4, kind: output, shape index: {}]  }
   0x1   :  { %v608_v0 = vld [vmem:[%s854_s1 + $0x40] sm:$0xff]   ;;  %v612_v4 = vld [vmem:[%s854_s1 + $0x48] sm:$0xff]   ;;  %v616_v8 = vld [vmem:[%s854_s1 + $0x50] sm:$0xff]  }
   0x2   :  { %v609_v1 = vld [vmem:[%s854_s1 + $0xc0] sm:$0xff]   ;;  %540 = vmatprep.subr.bf16.mxu0 %v608_v0  ;;  %v613_v5 = vld [vmem:[%s854_s1 + $0xc8] sm:$0xff]   ;;  %v617_v9 = vld [vmem:[%s854_s1 + $0xd0] sm:$0xff]  }
   0x3   :  { %v610_v2 = vld [vmem:[%s854_s1] sm:$0xff]   ;;  %574 = vmatprep.subr.bf16.mxu1 %v609_v1  ;;  %v614_v6 = vld [vmem:[%s854_s1 + $0x8] sm:$0xff]   ;;  %v618_v10 = vld [vmem:[%s854_s1 + $0x10] sm:$0xff]  }
   0x4   :  { %v611_v3 = vld [vmem:[%s854_s1 + $0x80] sm:$0xff]   ;;  %541 = vmatpush3.bf16.msra.mxu0 %v610_v2  ;;  %v615_v7 = vld [vmem:[%s854_s1 + $0x88] sm:$0xff]   ;;  %v619_v11 = vld [vmem:[%s854_s1 + $0x90] sm:$0xff]  }
   0x5   :  { %575 = vmatpush3.bf16.msra.mxu1 %v611_v3  ;;  %542 = vmatprep.subr.bf16.mxu0 %v612_v4  ;;  %v620_v12 = vld [vmem:[%s854_s1 + $0x58] sm:$0xff]   ;;  %v624_v16 = vld [vmem:[%s854_s1 + $0x60] sm:$0xff]   ;;  %v628_v20 = vld [vmem:[%s854_s1 + $0x68] sm:$0xff]  }
   0x6   :  { %576 = vmatprep.subr.bf16.mxu1 %v613_v5  ;;  %v621_v13 = vld [vmem:[%s854_s1 + $0xd8] sm:$0xff]   ;;  %v625_v17 = vld [vmem:[%s854_s1 + $0xe0] sm:$0xff]   ;;  %v629_v21 = vld [vmem:[%s854_s1 + $0xe8] sm:$0xff]  }
   0x7   :  { %v622_v14 = vld [vmem:[%s854_s1 + $0x18] sm:$0xff]   ;;  %v626_v18 = vld [vmem:[%s854_s1 + $0x20] sm:$0xff]   ;;  %v630_v22 = vld [vmem:[%s854_s1 + $0x28] sm:$0xff]  }
   0x8   :  { %543 = vmatpush3.bf16.msra.mxu0 %v614_v6  ;;  %v623_v15 = vld [vmem:[%s854_s1 + $0x98] sm:$0xff]   ;;  %v627_v19 = vld [vmem:[%s854_s1 + $0xa0] sm:$0xff]   ;;  %v631_v23 = vld [vmem:[%s854_s1 + $0xa8] sm:$0xff]  }
   0x9   :  { %577 = vmatpush3.bf16.msra.mxu1 %v615_v7  ;;  %544 = vmatprep.subr.bf16.mxu0 %v616_v8  ;;  %v632_v24 = vld [vmem:[%s854_s1 + $0x70] sm:$0xff]   ;;  %v636_v28 = vld [vmem:[%s854_s1 + $0x78] sm:$0xff]   ;;  %v460_v53 = vld [vmem:[%s856_s3] sm:$0xff] }
   0xa   :  { %578 = vmatprep.subr.bf16.mxu1 %v617_v9  ;;  %v633_v25 = vld [vmem:[%s854_s1 + $0xf0] sm:$0xff]   ;;  %v637_v29 = vld [vmem:[%s854_s1 + $0xf8] sm:$0xff]   ;;  %v539_v58 = vld [vmem:[%s857_s2] ss:$0 sm:$0xff] }
   0xb   :  { %v634_v26 = vld [vmem:[%s854_s1 + $0x30] sm:$0xff]   ;;  %v638_v30 = vld [vmem:[%s854_s1 + $0x38] sm:$0xff]   ;;  %v461_v59 = vld [vmem:[%s856_s3 + $0x8] sm:$0xff] }
   0xc   :  { %545 = vmatpush3.bf16.msra.mxu0 %v618_v10  ;;  %v635_v27 = vld [vmem:[%s854_s1 + $0xb0] sm:$0xff]   ;;  %v639_v31 = vld [vmem:[%s854_s1 + $0xb8] sm:$0xff]  }
   0xd   :  { %579 = vmatpush3.bf16.msra.mxu1 %v619_v11  ;;  %546 = vmatprep.subr.bf16.mxu0 %v620_v12  ;;  %v640_v32 = vld [vmem:[%s855_s0] ss:$16 sps:$4 sm:$0xff]   ;;  %v642_v33 = vld [vmem:[%s855_s0 + $0x4] ss:$16 sps:$4 sm:$0xff]   ;;  %v643_v34 = vld [vmem:[%s855_s0 + $0x8] ss:$16 sps:$4 sm:$0xff]  }
   0xe   :  { %580 = vmatprep.subr.bf16.mxu1 %v621_v13  ;;  %v645_v35 = vld [vmem:[%s855_s0 + $0xc] ss:$16 sps:$4 sm:$0xff]   ;;  %378 = vmatprep.mubr.bf16.mxu0 %v642_v33  ;;  %v646_v36 = vld [vmem:[%s855_s0 + $0x24] ss:$16 sps:$4 sm:$0xff]   ;;  %v650_v38 = vld [vmem:[%s855_s0 + $0x20] ss:$16 sps:$4 sm:$0xff]  }
   0xf   :  { %435 = vmatprep.mubr.bf16.mxu1 %v645_v35  ;;  %v648_v37 = vld [vmem:[%s855_s0 + $0x2c] ss:$16 sps:$4 sm:$0xff]   ;;  %v651_v39 = vld [vmem:[%s855_s0 + $0x28] ss:$16 sps:$4 sm:$0xff]   ;;  %v652_v40 = vld [vmem:[%s855_s0 + $0x44] ss:$16 sps:$4 sm:$0xff]  }
  0x10   :  { %547 = vmatpush3.bf16.msra.mxu0 %v622_v14  ;;  %v654_v41 = vld [vmem:[%s855_s0 + $0x4c] ss:$16 sps:$4 sm:$0xff]   ;;  %v656_v42 = vld [vmem:[%s855_s0 + $0x40] ss:$16 sps:$4 sm:$0xff]   ;;  %v657_v43 = vld [vmem:[%s855_s0 + $0x48] ss:$16 sps:$4 sm:$0xff]  }
  0x11   :  { %581 = vmatpush3.bf16.msra.mxu1 %v623_v15  ;;  %548 = vmatprep.subr.bf16.mxu0 %v624_v16  ;;  %v462_v10 = vld [vmem:[%s856_s3 + $0x10] sm:$0xff]  ;;  %v463_v15 = vld [vmem:[%s856_s3 + $0x18] sm:$0xff]  ;;  %v465_v35 = vld [vmem:[%s856_s3 + $0x28] sm:$0xff] }
  0x12   :  { %582 = vmatprep.subr.bf16.mxu1 %v625_v17 }
  0x14   :  { %549 = vmatpush3.bf16.msra.mxu0 %v626_v18 }
  0x15   :  { %583 = vmatpush3.bf16.msra.mxu1 %v627_v19  ;;  %550 = vmatprep.subr.bf16.mxu0 %v628_v20 }
  0x16   :  { %584 = vmatprep.subr.bf16.mxu1 %v629_v21 }
  0x18   :  { %551 = vmatpush3.bf16.msra.mxu0 %v630_v22 }
  0x19   :  { %585 = vmatpush3.bf16.msra.mxu1 %v631_v23  ;;  %552 = vmatprep.subr.bf16.mxu0 %v632_v24 }
  0x1a   :  { %586 = vmatprep.subr.bf16.mxu1 %v633_v25 }
  0x1c   :  { %553 = vmatpush3.bf16.msra.mxu0 %v634_v26 }
  0x1d   :  { %587 = vmatpush3.bf16.msra.mxu1 %v635_v27  ;;  %554 = vmatprep.subr.bf16.mxu0 %v636_v28 }
  0x1e   :  { %588 = vmatprep.subr.bf16.mxu1 %v637_v29 }
  0x20   :  { %555 = vmatpush3.bf16.msra.mxu0 %v638_v30  ;;  %v464_v30 = vld [vmem:[%s856_s3 + $0x20] sm:$0xff] }
  0x21   :  { %589 = vmatpush3.bf16.msra.mxu1 %v639_v31 }
  0x23   :  { %379 = vmatmul.mubr.bf16.vlgmr.msra.gmra.mrb[0].mxu0 %v640_v32 }
  0x24   :  { %436 = vmatmul.mubr.bf16.vlgmr.msra.gmra.mrb[0].mxu1 %v643_v34  ;;  %386 = vmatprep.mubr.bf16.mxu0 %v646_v36 }
  0x25   :  { %443 = vmatprep.mubr.bf16.mxu1 %v648_v37 }
  0x2b   :  { %387 = vmatmul.mubr.bf16.gmra.mrb[4].mxu0 %v650_v38 }
  0x2c   :  { %444 = vmatmul.mubr.bf16.gmra.mrb[4].mxu1 %v651_v39  ;;  %394 = vmatprep.mubr.bf16.mxu0 %v652_v40 }
  0x2d   :  { %451 = vmatprep.mubr.bf16.mxu1 %v654_v41 }
  0x33   :  { %395 = vmatmul.mubr.bf16.gmra.mrb[8].mxu0 %v656_v42 }
  0x34   :  { %452 = vmatmul.mubr.bf16.gmra.mrb[8].mxu1 %v657_v43 }
  0xf6   :  { %v556_v44 = vpop.f32.mrb[0].mxu0 }
  0xf7   :  { %v590_v45 = vpop.f32.mrb[0].mxu1  ;;  %v557_v46 = vpop.f32.mrb[1].mxu0 }
  0xf8   :  { %v558_v47 = vadd.f32 %v557_v46, %v556_v44  ;;  %v591_v48 = vpop.f32.mrb[1].mxu1  ;;  %v559_v49 = vpop.f32.mrb[2].mxu0 }
  0xf9   :  { %v592_v50 = vadd.f32 %v591_v48, %v590_v45  ;;  %v593_v51 = vpop.f32.mrb[2].mxu1  ;;  %v560_v52 = vpop.f32.mrb[3].mxu0 }
  0xfa   :  { %v561_v54 = vadd.f32 %v560_v52, %v559_v49  ;;  %v594_v55 = vpop.f32.mrb[3].mxu1 }
  0xfb   :  { %v438_v56 = vadd.f32 %v592_v50, %v558_v47  ;;  %v595_v57 = vadd.f32 %v594_v55, %v593_v51 }
  0xfd   :  { %v466_v60 = vadd.f32 %v460_v53, %v438_v56  ;;  %v441_v61 = vadd.f32 %v595_v57, %v561_v54 }
  0xfe   :  { %v562_v62 = vpop.f32.mrb[4].mxu0 }
  0xff   :  { %v479_v63 = vadd.f32 %v539_v58, %v466_v60  ;;  %v467_v0 = vadd.f32 %v461_v59, %v441_v61  ;;  %v596_v1 = vpop.f32.mrb[4].mxu1  ;;  %v563_v2 = vpop.f32.mrb[5].mxu0 }
 0x100   :  { %v564_v3 = vadd.f32 %v563_v2, %v562_v62  ;;  %v597_v4 = vpop.f32.mrb[5].mxu1  ;;  %v565_v5 = vpop.f32.mrb[6].mxu0 }
 0x101   :  { %485 = vst [vmem:[%s858_s4] sm:$0xff] %v479_v63  ;;  %v480_v6 = vadd.f32 %v539_v58, %v467_v0  ;;  %v598_v7 = vadd.f32 %v597_v4, %v596_v1  ;;  %v599_v8 = vpop.f32.mrb[6].mxu1  ;;  %v566_v9 = vpop.f32.mrb[7].mxu0 }
 0x102   :  { %v567_v11 = vadd.f32 %v566_v9, %v565_v5  ;;  %v600_v12 = vpop.f32.mrb[7].mxu1 }
 0x103   :  { %486 = vst [vmem:[%s858_s4 + $0x8] sm:$0xff] %v480_v6  ;;  %v446_v13 = vadd.f32 %v598_v7, %v564_v3  ;;  %v601_v14 = vadd.f32 %v600_v12, %v599_v8 }
 0x105   :  { %v468_v16 = vadd.f32 %v462_v10, %v446_v13  ;;  %v449_v17 = vadd.f32 %v601_v14, %v567_v11 }
 0x106   :  { %v568_v18 = vpop.f32.mrb[8].mxu0 }
 0x107   :  { %v481_v19 = vadd.f32 %v539_v58, %v468_v16  ;;  %v469_v20 = vadd.f32 %v463_v15, %v449_v17  ;;  %v602_v21 = vpop.f32.mrb[8].mxu1  ;;  %v569_v22 = vpop.f32.mrb[9].mxu0 }
 0x108   :  { %v570_v23 = vadd.f32 %v569_v22, %v568_v18  ;;  %v603_v24 = vpop.f32.mrb[9].mxu1  ;;  %v571_v25 = vpop.f32.mrb[10].mxu0 }
 0x109   :  { %487 = vst [vmem:[%s858_s4 + $0x10] sm:$0xff] %v481_v19  ;;  %v482_v26 = vadd.f32 %v539_v58, %v469_v20  ;;  %v604_v27 = vadd.f32 %v603_v24, %v602_v21  ;;  %v605_v28 = vpop.f32.mrb[10].mxu1  ;;  %v572_v29 = vpop.f32.mrb[11].mxu0 }
 0x10a   :  { %v573_v31 = vadd.f32 %v572_v29, %v571_v25  ;;  %v606_v32 = vpop.f32.mrb[11].mxu1 }
 0x10b   :  { %488 = vst [vmem:[%s858_s4 + $0x18] sm:$0xff] %v482_v26  ;;  %v454_v33 = vadd.f32 %v604_v27, %v570_v23  ;;  %v607_v34 = vadd.f32 %v606_v32, %v605_v28 }
 0x10d   :  { %v470_v36 = vadd.f32 %v464_v30, %v454_v33  ;;  %v457_v37 = vadd.f32 %v607_v34, %v573_v31 }
 0x10f   :  { %v483_v38 = vadd.f32 %v539_v58, %v470_v36  ;;  %v471_v39 = vadd.f32 %v465_v35, %v457_v37 }
 0x111   :  { %489 = vst [vmem:[%s858_s4 + $0x20] sm:$0xff] %v483_v38  ;;  %v484_v40 = vadd.f32 %v539_v58, %v471_v39 }
 0x113   :  { %490 = vst [vmem:[%s858_s4 + $0x28] sm:$0xff] %v484_v40 }

// kernel: gpt2_target_likelihood.23
= control target key start
LH: loop header
LB: loop body
LE: loop exit
PB: predicated region body
PF: predicated region fallthrough
CT: control target
= control target key end

     0   :  { %11 = vsyncpa [#allocation3], 0  ;;  %s1987_s0 = inlined_call_operand.hbm [shape: bf16[128,24], index: 0, kind: input, shape index: {}]   ;;  %s1988_s1 = inlined_call_operand.hbm [shape: bf16[256,128], index: 1, kind: input, shape index: {}]   ;;  %s1989_s2 = inlined_call_operand.hbm [shape: s32[1,24], index: 2, kind: input, shape index: {}]   ;;  %s1990_s3 = inlined_call_operand.hbm [shape: f32[1,1,24], index: 3, kind: output, shape index: {0}]   ;;  %s1991_s4 = inlined_call_operand.hbm [shape: f32[1,1,24], index: 4, kind: output, shape index: {1}]   ;;  %s1992_s5 = inlined_call_operand.hbm [shape: f32[1,1,24], index: 5, kind: output, shape index: {2}]  }
   0x1   :  { %12 = vsyncpa [#allocation6], 0 }
   0x2   :  { %13 = vsyncpa [#allocation4], 0 }
   0x3   :  { %14 = vsyncpa [#allocation10], 0  ;;  %s1379_s18 = smov [#allocation5]   ;;  %s1380_s20 = smov [#allocation2]  }
   0x4   :  { %s36_s19 = sshll.u32 %s1379_s18, 4  ;;  %s20_s21 = sshll.u32 %s1380_s20, 4  ;;  %s37_s19 = int_to_ptr.vmem [resolvable:$true] %s36_s19  ;;  %s1419_s21 = int_to_ptr.vmem [resolvable:$true] %s20_s21 }
   0x5   :  { %s1239_s24 = scalar_lea.hbm %s1988_s1, 2048 }
   0x6   :  { %p1240_p0 = scmp.ne.s32.totalorder %s1988_s1, %s1239_s24  ;;  %p1243_p1 = scmp.lt.u32.totalorder %s1239_s24, %s1988_s1 }
   0x8   :  { %p1245_p2 = pnand %p1243_p1, %p1240_p0 }
   0xa   :  { %1248 = shalt.err (!%p1245_p2)
}
   0xb   :  { %s1249_s29 = scalar_lea.vmem %s37_s19, 2048  ;;  %p1254_p4 = scmp.lt.s32.totalorder %s37_s19, %s37_s19 }
   0xc   :  { %p1250_p3 = scmp.ne.s32.totalorder %s37_s19, %s1249_s29  ;;  %p1255_p5 = scmp.lt.s32.totalorder %s1249_s29, %s1249_s29 }
   0xe   :  { %p1256_p6 = por %p1255_p5, %p1254_p4 }
  0x10   :  { %p1257_p7 = pnand %p1256_p6, %p1250_p3 }
  0x12   :  { %1260 = shalt.err (!%p1257_p7)
}
  0x13   :  { %s1381_s30 = smov 64   ;;  %s1382_s6 = smov 4  }
  0x14   :  { %42 = dma.hbm_to_vmem [thread:$0]  %s1988_s1, 2048, %s37_s19, [#allocation6], %s1381_s30, %s1381_s30, %s1382_s6  }
  0x15   :  { %s1261_s11 = scalar_lea.hbm %s1987_s0, 1024 }
  0x16   :  { %p1262_p8 = scmp.ne.s32.totalorder %s1987_s0, %s1261_s11  ;;  %p1265_p9 = scmp.lt.u32.totalorder %s1261_s11, %s1987_s0 }
  0x18   :  { %p1267_p10 = pnand %p1265_p9, %p1262_p8 }
  0x1a   :  { %1270 = shalt.err (!%p1267_p10)
}
  0x1b   :  { %s1271_s16 = scalar_lea.vmem %s1419_s21, 1024  ;;  %p1276_p12 = scmp.lt.s32.totalorder %s1419_s21, %s1419_s21 }
  0x1c   :  { %p1272_p11 = scmp.ne.s32.totalorder %s1419_s21, %s1271_s16  ;;  %p1277_p13 = scmp.lt.s32.totalorder %s1271_s16, %s1271_s16 }
  0x1e   :  { %p1278_p0 = por %p1277_p13, %p1276_p12 }
  0x20   :  { %p1279_p1 = pnand %p1278_p0, %p1272_p11 }
  0x22   :  { %1282 = shalt.err (!%p1279_p1)
}
  0x23   :  { %26 = dma.hbm_to_vmem [thread:$0]  %s1987_s0, 1024, %s1419_s21, [#allocation3], %s1381_s30, %s1381_s30, %s1382_s6  }
  0x24   :  { %s1383_s18 = smov [#allocation7]   ;;  %s1283_s23 = scalar_lea.hbm %s1989_s2, 16 }
  0x25   :  { %s49_s19 = sshll.u32 %s1383_s18, 4  ;;  %p1284_p2 = scmp.ne.s32.totalorder %s1989_s2, %s1283_s23  ;;  %s50_s19 = int_to_ptr.vmem [resolvable:$true] %s49_s19 }
  0x26   :  { %p1287_p3 = scmp.lt.u32.totalorder %s1283_s23, %s1989_s2 }
  0x28   :  { %p1289_p4 = pnand %p1287_p3, %p1284_p2 }
  0x2a   :  { %1292 = shalt.err (!%p1289_p4)
}
  0x2b   :  { %s1293_s28 = scalar_lea.vmem %s50_s19, 16  ;;  %s1297_s0 = scalar_lea.vmem %s50_s19, 32 }
  0x2c   :  { %p1294_p5 = scmp.ne.s32.totalorder %s50_s19, %s1293_s28  ;;  %p1298_p6 = scmp.lt.s32.totalorder %s50_s19, %s50_s19 }
  0x2d   :  { %p1299_p7 = scmp.lt.s32.totalorder %s1297_s0, %s1293_s28 }
  0x2f   :  { %p1300_p8 = por %p1299_p7, %p1298_p6 }
  0x31   :  { %p1301_p9 = pnand %p1300_p8, %p1294_p5 }
  0x33   :  { %1304 = shalt.err (!%p1301_p9)
}
  0x34   :  { %52 = dma.hbm_to_vmem [thread:$0]  %s1989_s2, 16, %s50_s19, [#allocation6]  }
  0x35   :  { %1371 = dma.done.wait [#allocation3], 1024  }
  0x36   :  { %1372 = vsyncadd [#allocation3], 4294966272 }
  0x37   :  { %1373 = dma.done.wait [#allocation6], 2064  }
  0x38   :  { %1374 = vsyncadd [#allocation6], 4294965232  ;;  %v1149_v0 = vld [vmem:[#allocation2] sm:$0xff]   ;;  %v1150_v1 = vld [vmem:[#allocation2 + $0x8] sm:$0xff]   ;;  %vm69_vm0 = vcmask 188416   ;;  %v1385_v25 = vmov 0.0   ;;  %v428_v26 = vlaneseq }
  0x39   :  { %1075 = vmatprep.subr.bf16.mxu0 %v1149_v0  ;;  %1123 = vmatprep.subr.bf16.mxu1 %v1149_v0  ;;  %v1151_v2 = vld [vmem:[#allocation2 + $0x10] sm:$0xff]   ;;  %v1152_v3 = vld [vmem:[#allocation2 + $0x18] sm:$0xff]   ;;  %v1157_v4 = vld [vmem:[#allocation5] sm:$0xff]   ;;  %v1384_v24 = vmov -1e+30   ;;  %vm596_vm2 = vcmask 195584  }
  0x3a   :  { %1076 = vmatpush3.bf16.msra.mxu0 %v1149_v0  ;;  %1131 = vmatpush3.bf16.msra.mxu1 %v1149_v0  ;;  %v1159_v5 = vld [vmem:[#allocation5 + $0x40] sm:$0xff]   ;;  %v1154_v7 = vld [vmem:[#allocation2 + $0x28] sm:$0xff]   ;;  %v1155_v8 = vld [vmem:[#allocation2 + $0x30] sm:$0xff]   ;;  %70 = vst.msk [vmem:[#allocation8] sm:$0x1] %vm69_vm0, %v1384_v24  ;;  %v1465_v27 = vshrl.u32 %v428_v26, 7 }
  0x3b   :  { %1077 = vmatprep.subr.bf16.mxu0 %v1150_v1  ;;  %1124 = vmatprep.subr.bf16.mxu1 %v1150_v1  ;;  %v1153_v6 = vld [vmem:[#allocation2 + $0x20] sm:$0xff]   ;;  %v1156_v9 = vld [vmem:[#allocation2 + $0x38] sm:$0xff]   ;;  %v1158_v10 = vld [vmem:[#allocation5 + $0x8] sm:$0xff]   ;;  %71 = vst.msk [vmem:[#allocation9] sm:$0x1] %vm69_vm0, %v1385_v25  ;;  %s1386_s2 = smov [#allocation8]  }
  0x3c   :  { %1091 = vmatprep.mubr.bf16.mxu0 %v1157_v4  ;;  %1107 = vmatprep.mubr.bf16.mxu1 %v1159_v5  ;;  %v1160_v11 = vld [vmem:[#allocation5 + $0x48] sm:$0xff]   ;;  %v1161_v12 = vld [vmem:[#allocation5 + $0x10] sm:$0xff]   ;;  %v1162_v14 = vld [vmem:[#allocation5 + $0x18] sm:$0xff]   ;;  %72 = vst.msk [vmem:[#allocation11] sm:$0x1] %vm69_vm0, %v1385_v25  ;;  %v431_v29 = vadd.s32 16, %v1465_v27 }
  0x3d   :  { %v1163_v13 = vld [vmem:[#allocation5 + $0x50] sm:$0xff]   ;;  %v1164_v15 = vld [vmem:[#allocation5 + $0x58] sm:$0xff]   ;;  %v1165_v16 = vld [vmem:[#allocation5 + $0x20] sm:$0xff]   ;;  %v430_v30 = vadd.s32 8, %v1465_v27  ;;  %v432_v31 = vadd.s32 24, %v1465_v27  ;;  %v435_v32 = vadd.s32 48, %v1465_v27 }
  0x3e   :  { %1078 = vmatpush3.bf16.msra.mxu0 %v1150_v1  ;;  %1132 = vmatpush3.bf16.msra.mxu1 %v1150_v1  ;;  %v1167_v17 = vld [vmem:[#allocation5 + $0x60] sm:$0xff]   ;;  %v1166_v18 = vld [vmem:[#allocation5 + $0x28] sm:$0xff]   ;;  %v1169_v20 = vld [vmem:[#allocation5 + $0x30] sm:$0xff]   ;;  %v433_v33 = vadd.s32 32, %v1465_v27  ;;  %v1481_v36 = vadd.s32 56, %v1465_v27  ;;  %v434_v37 = vadd.s32 40, %v1465_v27 }
  0x3f   :  { %1079 = vmatprep.subr.bf16.mxu0 %v1151_v2  ;;  %1125 = vmatprep.subr.bf16.mxu1 %v1151_v2  ;;  %v1168_v19 = vld [vmem:[#allocation5 + $0x68] sm:$0xff]   ;;  %v1171_v21 = vld [vmem:[#allocation5 + $0x70] sm:$0xff]   ;;  %v1170_v22 = vld [vmem:[#allocation5 + $0x38] sm:$0xff]   ;;  %v1517_v55 = vadd.s32 80, %v1465_v27  ;;  %v437_v58 = vadd.s32 64, %v1465_v27  ;;  %v1524_v59 = vadd.s32 88, %v1465_v27 }
  0x40   :  { %v1172_v23 = vld [vmem:[#allocation5 + $0x78] sm:$0xff]   ;;  %v1467_v28 = vld [vmem:[#allocation7] ss:$0 sm:$0xff]  ;;  %v1533_v1 = vadd.s32 72, %v1465_v27  ;;  %s989_s30 = sshll.u32 %s1386_s2, 4  ;;  %s990_s30 = int_to_ptr.vmem [resolvable:$true] %s989_s30 }
  0x41   :  { %vm532_vm1 = vcmp.eq.s32.totalorder %v1465_v27, %v1467_v28  ;;  %vm534_vm3 = vcmp.eq.s32.totalorder %v431_v29, %v1467_v28  ;;  %vm533_vm4 = vcmp.eq.s32.totalorder %v430_v30, %v1467_v28  ;;  %vm535_vm5 = vcmp.eq.s32.totalorder %v432_v31, %v1467_v28  ;;  %s1305_s6 = scalar_lea.vmem %s990_s30, 16  ;;  %s1309_s7 = scalar_lea.vmem %s990_s30, 32 }
  0x42   :  { %1080 = vmatpush3.bf16.msra.mxu0 %v1151_v2  ;;  %1133 = vmatpush3.bf16.msra.mxu1 %v1151_v2  ;;  %vm538_vm6 = vcmp.eq.s32.totalorder %v435_v32, %v1467_v28  ;;  %vm536_vm7 = vcmp.eq.s32.totalorder %v433_v33, %v1467_v28  ;;  %vm539_vm8 = vcmp.eq.s32.totalorder %v1481_v36, %v1467_v28  ;;  %v1579_v30 = vadd.s32 144, %v1465_v27  ;;  %p1306_p10 = scmp.ne.s32.totalorder %s990_s30, %s1305_s6  ;;  %p1310_p11 = scmp.lt.s32.totalorder %s990_s30, %s990_s30 }
  0x43   :  { %1081 = vmatprep.subr.bf16.mxu0 %v1152_v3  ;;  %1126 = vmatprep.subr.bf16.mxu1 %v1152_v3  ;;  %vm537_vm9 = vcmp.eq.s32.totalorder %v434_v37, %v1467_v28  ;;  %vm542_vm10 = vcmp.eq.s32.totalorder %v1517_v55, %v1467_v28  ;;  %vm540_vm11 = vcmp.eq.s32.totalorder %v437_v58, %v1467_v28  ;;  %p1311_p12 = scmp.lt.s32.totalorder %s1309_s7, %s1305_s6 }
  0x44   :  { %vm543_vm12 = vcmp.eq.s32.totalorder %v1524_v59, %v1467_v28  ;;  %vm541_vm13 = vcmp.eq.s32.totalorder %v1533_v1, %v1467_v28 }
  0x45   :  { %p1312_p13 = por %p1311_p12, %p1310_p11 }
  0x46   :  { %1082 = vmatpush3.bf16.msra.mxu0 %v1152_v3  ;;  %1134 = vmatpush3.bf16.msra.mxu1 %v1152_v3 }
  0x47   :  { %1083 = vmatprep.subr.bf16.mxu0 %v1153_v6  ;;  %1127 = vmatprep.subr.bf16.mxu1 %v1153_v6  ;;  %p1313_p0 = pnand %p1312_p13, %p1306_p10 }
  0x4a   :  { %1084 = vmatpush3.bf16.msra.mxu0 %v1153_v6  ;;  %1135 = vmatpush3.bf16.msra.mxu1 %v1153_v6 }
  0x4b   :  { %1085 = vmatprep.subr.bf16.mxu0 %v1154_v7  ;;  %1128 = vmatprep.subr.bf16.mxu1 %v1154_v7 }
  0x4e   :  { %1086 = vmatpush3.bf16.msra.mxu0 %v1154_v7  ;;  %1136 = vmatpush3.bf16.msra.mxu1 %v1154_v7 }
  0x4f   :  { %1087 = vmatprep.subr.bf16.mxu0 %v1155_v8  ;;  %1129 = vmatprep.subr.bf16.mxu1 %v1155_v8 }
  0x52   :  { %1088 = vmatpush3.bf16.msra.mxu0 %v1155_v8  ;;  %1137 = vmatpush3.bf16.msra.mxu1 %v1155_v8 }
  0x53   :  { %1089 = vmatprep.subr.bf16.mxu0 %v1156_v9  ;;  %1130 = vmatprep.subr.bf16.mxu1 %v1156_v9 }
  0x56   :  { %1090 = vmatpush3.bf16.msra.mxu0 %v1156_v9  ;;  %1138 = vmatpush3.bf16.msra.mxu1 %v1156_v9 }
  0x59   :  { %1092 = vmatmul.mubr.bf16.vlgmr.msra.gmra.mrb[0].mxu0 %v1158_v10  ;;  %1108 = vmatmul.mubr.bf16.vlgmr.msra.gmra.mrb[0].mxu1 %v1160_v11 }
  0x5a   :  { %1095 = vmatprep.mubr.bf16.mxu0 %v1161_v12  ;;  %1111 = vmatprep.mubr.bf16.mxu1 %v1163_v13 }
  0x61   :  { %1096 = vmatmul.mubr.bf16.gmra.mrb[4].mxu0 %v1162_v14  ;;  %1112 = vmatmul.mubr.bf16.gmra.mrb[4].mxu1 %v1164_v15 }
  0x62   :  { %1099 = vmatprep.mubr.bf16.mxu0 %v1165_v16  ;;  %1115 = vmatprep.mubr.bf16.mxu1 %v1167_v17 }
  0x69   :  { %1100 = vmatmul.mubr.bf16.gmra.mrb[8].mxu0 %v1166_v18  ;;  %1116 = vmatmul.mubr.bf16.gmra.mrb[8].mxu1 %v1168_v19 }
  0x6a   :  { %1103 = vmatprep.mubr.bf16.mxu0 %v1169_v20  ;;  %1119 = vmatprep.mubr.bf16.mxu1 %v1171_v21 }
  0x71   :  { %1104 = vmatmul.mubr.bf16.gmra.mrb[12].mxu0 %v1170_v22  ;;  %1120 = vmatmul.mubr.bf16.gmra.mrb[12].mxu1 %v1172_v23 }
 0x12c   :  { %v1476_v34 = vpop.f32.mrb[0].mxu0  ;;  %v1478_v35 = vpop.f32.mrb[0].mxu1 }
 0x12d   :  { %v1485_v38 = vpop.f32.mrb[1].mxu0  ;;  %v1488_v39 = vpop.f32.mrb[1].mxu1  ;;  %v734_v44 = vsel %vm596_vm2, %v1478_v35, -inf  ;;  %v566_v46 = vsel %vm534_vm3, %v1476_v34, 0.0  ;;  %v704_v60 = vsel %vm596_vm2, %v1476_v34, -inf }
 0x12e   :  { %v564_v40 = vsel %vm532_vm1, %v1485_v38, 0.0  ;;  %v1491_v41 = vpop.f32.mrb[2].mxu0  ;;  %v1493_v42 = vpop.f32.mrb[2].mxu1  ;;  %v730_v50 = vsel %vm596_vm2, %v1488_v39, -inf  ;;  %v600_v56 = vsel %vm596_vm2, %v566_v46, 0.0  ;;  %v702_v2 = vsel %vm596_vm2, %v1485_v38, -inf }
 0x12f   :  { %v1496_v43 = vpop.f32.mrb[3].mxu0  ;;  %v1501_v45 = vpop.f32.mrb[3].mxu1  ;;  %v597_v48 = vsel %vm596_vm2, %v564_v40, 0.0  ;;  %v736_v51 = vsel %vm596_vm2, %v1493_v42, -inf  ;;  %v567_v52 = vsel %vm535_vm5, %v1491_v41, 0.0  ;;  %v735_v54 = vmax.f32 %v730_v50, %v734_v44 }
 0x130   :  { %v565_v47 = vsel %vm533_vm4, %v1496_v43, 0.0  ;;  %v732_v57 = vsel %vm596_vm2, %v1501_v45, -inf  ;;  %v602_v3 = vsel %vm596_vm2, %v567_v52, 0.0  ;;  %v1540_v4 = vsel %vm596_vm2, %v1491_v41, -inf }
 0x131   :  { %v598_v49 = vsel %vm596_vm2, %v565_v47, 0.0  ;;  %v731_v62 = vmax.f32 %v736_v51, %v735_v54  ;;  %v703_v8 = vsel %vm596_vm2, %v1496_v43, -inf }
 0x132   :  { %v599_v53 = vadd.f32 %v598_v49, %v597_v48 }
 0x133   :  { %v737_v10 = vmax.f32 %v732_v57, %v731_v62 }
 0x134   :  { %v601_v61 = vadd.f32 %v600_v56, %v599_v53  ;;  %v1528_v63 = vpop.f32.mrb[4].mxu0  ;;  %v1530_v0 = vpop.f32.mrb[4].mxu1 }
 0x135   :  { %v710_v5 = vsel %vm596_vm2, %v1528_v63, -inf  ;;  %v1544_v6 = vpop.f32.mrb[5].mxu0  ;;  %v1546_v7 = vpop.f32.mrb[5].mxu1  ;;  %v742_v18 = vsel %vm596_vm2, %v1530_v0, -inf  ;;  %v570_v20 = vsel %vm538_vm6, %v1528_v63, 0.0  ;;  %vm550_vm6 = vcmp.eq.s32.totalorder %v1579_v30, %v1467_v28 }
 0x136   :  { %v711_v9 = vmax.f32 %v704_v60, %v710_v5  ;;  %v568_v11 = vsel %vm536_vm7, %v1544_v6, 0.0  ;;  %v1553_v12 = vpop.f32.mrb[6].mxu0  ;;  %v1555_v13 = vpop.f32.mrb[6].mxu1  ;;  %v603_v14 = vadd.f32 %v602_v3, %v601_v61  ;;  %v706_v16 = vsel %vm596_vm2, %v1544_v6, -inf }
 0x137   :  { %v604_v15 = vsel %vm596_vm2, %v568_v11, 0.0  ;;  %v1560_v17 = vpop.f32.mrb[7].mxu0  ;;  %v1564_v19 = vpop.f32.mrb[7].mxu1  ;;  %v707_v21 = vmax.f32 %v702_v2, %v706_v16  ;;  %v712_v22 = vsel %vm596_vm2, %v1553_v12, -inf  ;;  %v733_v32 = vmax.f32 %v742_v18, %v737_v10 }
 0x138   :  { %v569_v23 = vsel %vm537_vm9, %v1560_v17, 0.0  ;;  %v605_v24 = vadd.f32 %v604_v15, %v603_v14  ;;  %v713_v25 = vmax.f32 %v1540_v4, %v712_v22  ;;  %v708_v29 = vsel %vm596_vm2, %v1560_v17, -inf }
 0x139   :  { %v606_v26 = vsel %vm596_vm2, %v569_v23, 0.0  ;;  %v709_v31 = vmax.f32 %v703_v8, %v708_v29  ;;  %v571_v33 = vsel %vm539_vm8, %v1553_v12, 0.0  ;;  %v738_v40 = vsel %vm596_vm2, %v1546_v7, -inf }
 0x13a   :  { %v607_v37 = vadd.f32 %v606_v26, %v605_v24  ;;  %v608_v44 = vsel %vm596_vm2, %v570_v20, 0.0  ;;  %v743_v46 = vmax.f32 %v738_v40, %v733_v32  ;;  %v744_v47 = vsel %vm596_vm2, %v1555_v13, -inf }
 0x13b   :  { %v610_v53 = vsel %vm596_vm2, %v571_v33, 0.0  ;;  %v441_v60 = vadd.s32 96, %v1465_v27  ;;  %v740_v61 = vsel %vm596_vm2, %v1564_v19, -inf  ;;  %v443_v26 = vadd.s32 112, %v1465_v27 }
 0x13c   :  { %v1592_v48 = vpop.f32.mrb[8].mxu0  ;;  %v1595_v49 = vpop.f32.mrb[8].mxu1  ;;  %v609_v36 = vadd.f32 %v608_v44, %v607_v37  ;;  %v751_v54 = vmax.f32 %v743_v46, %v744_v47  ;;  %v445_v37 = vadd.s32 128, %v1465_v27  ;;  %v444_v47 = vadd.s32 120, %v1465_v27 }
 0x13d   :  { %v718_v50 = vsel %vm596_vm2, %v1592_v48, -inf  ;;  %v1599_v51 = vpop.f32.mrb[9].mxu0  ;;  %v1605_v52 = vpop.f32.mrb[9].mxu1  ;;  %v574_v8 = vsel %vm542_vm10, %v1592_v48, 0.0  ;;  %v750_v24 = vsel %vm596_vm2, %v1595_v49, -inf  ;;  %vm544_vm14 = vcmp.eq.s32.totalorder %v441_v60, %v1467_v28 }
 0x13e   :  { %v719_v56 = vmax.f32 %v711_v9, %v718_v50  ;;  %v1608_v57 = vpop.f32.mrb[10].mxu0  ;;  %v1610_v58 = vpop.f32.mrb[10].mxu1  ;;  %v572_v62 = vsel %vm540_vm11, %v1599_v51, 0.0  ;;  %v611_v2 = vadd.f32 %v610_v53, %v609_v36  ;;  %v714_v3 = vsel %vm596_vm2, %v1599_v51, -inf }
 0x13f   :  { %v1618_v4 = vpop.f32.mrb[11].mxu0  ;;  %v1620_v5 = vpop.f32.mrb[11].mxu1  ;;  %v759_v9 = vmax.f32 %v751_v54, %v740_v61  ;;  %v612_v10 = vsel %vm596_vm2, %v572_v62, 0.0  ;;  %v715_v11 = vmax.f32 %v707_v21, %v714_v3  ;;  %v720_v15 = vsel %vm596_vm2, %v1608_v57, -inf }
 0x140   :  { %v613_v14 = vadd.f32 %v612_v10, %v611_v2  ;;  %v573_v16 = vsel %vm541_vm13, %v1618_v4, 0.0  ;;  %v716_v18 = vsel %vm596_vm2, %v1618_v4, -inf  ;;  %v1635_v20 = vmax.f32 %v713_v25, %v720_v15 }
 0x141   :  { %v614_v55 = vsel %vm596_vm2, %v573_v16, 0.0  ;;  %v1638_v22 = vmax.f32 %v709_v31, %v716_v18  ;;  %v442_v21 = vadd.s32 104, %v1465_v27  ;;  %v616_v1 = vsel %vm596_vm2, %v574_v8, 0.0 }
 0x142   :  { %v615_v23 = vadd.f32 %v614_v55, %v613_v14  ;;  %v575_v25 = vsel %vm543_vm12, %v1608_v57, 0.0  ;;  %v739_v29 = vmax.f32 %v750_v24, %v759_v9  ;;  %v746_v31 = vsel %vm596_vm2, %v1605_v52, -inf }
 0x143   :  { %v752_v44 = vsel %vm596_vm2, %v1610_v58, -inf  ;;  %v446_v36 = vadd.s32 136, %v1465_v27  ;;  %vm545_vm15 = vcmp.eq.s32.totalorder %v442_v21, %v1467_v28  ;;  %v618_v62 = vsel %vm596_vm2, %v575_v25, 0.0 }
 0x144   :  { %v1652_v32 = vpop.f32.mrb[12].mxu0  ;;  %v1654_v33 = vpop.f32.mrb[12].mxu1  ;;  %v617_v40 = vadd.f32 %v616_v1, %v615_v23  ;;  %v747_v50 = vmax.f32 %v739_v29, %v746_v31  ;;  %vm546_vm1 = vcmp.eq.s32.totalorder %v443_v26, %v1467_v28  ;;  %vm547_vm3 = vcmp.eq.s32.totalorder %v444_v47, %v1467_v28 }
 0x145   :  { %v1659_v46 = vpop.f32.mrb[13].mxu0  ;;  %v1662_v59 = vpop.f32.mrb[13].mxu1  ;;  %v726_v53 = vsel %vm596_vm2, %v1652_v32, -inf  ;;  %v578_v55 = vsel %vm546_vm1, %v1652_v32, 0.0  ;;  %vm548_vm4 = vcmp.eq.s32.totalorder %v445_v37, %v1467_v28  ;;  %v748_v26 = vsel %vm596_vm2, %v1620_v5, -inf }
 0x146   :  { %v1667_v54 = vpop.f32.mrb[14].mxu0  ;;  %v1670_v61 = vpop.f32.mrb[14].mxu1  ;;  %v727_v2 = vmax.f32 %v719_v56, %v726_v53  ;;  %v576_v3 = vsel %vm544_vm14, %v1659_v46, 0.0  ;;  %v755_v10 = vmax.f32 %v747_v50, %v752_v44  ;;  %v619_v14 = vadd.f32 %v618_v62, %v617_v40 }
 0x147   :  { %v1677_v8 = vpop.f32.mrb[15].mxu0  ;;  %v1679_v9 = vpop.f32.mrb[15].mxu1  ;;  %v620_v15 = vsel %vm596_vm2, %v576_v3, 0.0  ;;  %v722_v16 = vsel %vm596_vm2, %v1659_v46, -inf  ;;  %v728_v56 = vsel %vm596_vm2, %v1667_v54, -inf  ;;  %v579_v29 = vsel %vm547_vm3, %v1667_v54, 0.0 }
 0x148   :  { %v723_v18 = vmax.f32 %v715_v11, %v722_v16  ;;  %v577_v60 = vsel %vm545_vm15, %v1677_v8, 0.0  ;;  %v745_v21 = vmax.f32 %v727_v2, %v755_v10  ;;  %v621_v23 = vadd.f32 %v620_v15, %v619_v14 }
 0x149   :  { %v729_v24 = vmax.f32 %v1635_v20, %v728_v56  ;;  %v622_v11 = vsel %vm596_vm2, %v577_v60, 0.0  ;;  %v724_v1 = vsel %vm596_vm2, %v1677_v8, -inf  ;;  %v448_v44 = vadd.s32 152, %v1465_v27 }
 0x14a   :  { %v753_v25 = vmax.f32 %v745_v21, %v748_v26  ;;  %v623_v31 = vadd.f32 %v622_v11, %v621_v23  ;;  %v725_v40 = vmax.f32 %v1638_v22, %v724_v1  ;;  %vm549_vm5 = vcmp.eq.s32.totalorder %v446_v36, %v1467_v28 }
 0x14b   :  { %v624_v20 = vsel %vm596_vm2, %v578_v55, 0.0  ;;  %v580_v37 = vsel %vm548_vm4, %v1488_v39, 0.0  ;;  %v449_v53 = vadd.s32 160, %v1465_v27  ;;  %v626_v62 = vsel %vm596_vm2, %v579_v29, 0.0 }
 0x14c   :  { %v761_v47 = vmax.f32 %v753_v25, %v723_v18  ;;  %v625_v50 = vadd.f32 %v624_v20, %v623_v31  ;;  %v581_v2 = vsel %vm549_vm5, %v1501_v45, 0.0  ;;  %v628_v10 = vsel %vm596_vm2, %v580_v37, 0.0 }
 0x14d   :  { %vm551_vm7 = vcmp.eq.s32.totalorder %v448_v44, %v1467_v28  ;;  %v450_v36 = vadd.s32 168, %v1465_v27  ;;  %v758_v14 = vsel %vm596_vm2, %v1654_v33, -inf  ;;  %v582_v15 = vsel %vm550_vm6, %v1478_v35, 0.0 }
 0x14e   :  { %v763_v22 = vmax.f32 %v729_v24, %v761_v47  ;;  %v627_v3 = vadd.f32 %v626_v62, %v625_v50  ;;  %v630_v18 = vsel %vm596_vm2, %v581_v2, 0.0  ;;  %v451_v56 = vadd.s32 176, %v1465_v27 }
 0x14f   :  { %vm552_vm8 = vcmp.eq.s32.totalorder %v449_v53, %v1467_v28  ;;  %v583_v60 = vsel %vm551_vm7, %v1493_v42, 0.0  ;;  %v632_v23 = vsel %vm596_vm2, %v582_v15, 0.0  ;;  %v452_v24 = vadd.s32 184, %v1465_v27 }
 0x150   :  { %v629_v30 = vadd.f32 %v628_v10, %v627_v3  ;;  %v741_v16 = vmax.f32 %v725_v40, %v763_v22  ;;  %vm553_vm9 = vcmp.eq.s32.totalorder %v450_v36, %v1467_v28  ;;  %v754_v26 = vsel %vm596_vm2, %v1662_v59, -inf }
 0x151   :  { %v584_v11 = vsel %vm552_vm8, %v1546_v7, 0.0  ;;  %v634_v29 = vsel %vm596_vm2, %v583_v60, 0.0  ;;  %vm554_vm10 = vcmp.eq.s32.totalorder %v451_v56, %v1467_v28  ;;  %v453_v31 = vadd.s32 192, %v1465_v27 }
 0x152   :  { %v631_v55 = vadd.f32 %v630_v18, %v629_v30  ;;  %v749_v21 = vmax.f32 %v741_v16, %v758_v14  ;;  %v760_v40 = vsel %vm596_vm2, %v1670_v61, -inf  ;;  %v585_v44 = vsel %vm553_vm9, %v1564_v19, 0.0 }
 0x153   :  { %v636_v47 = vsel %vm596_vm2, %v584_v11, 0.0  ;;  %vm555_vm11 = vcmp.eq.s32.totalorder %v452_v24, %v1467_v28  ;;  %v454_v50 = vadd.s32 200, %v1465_v27  ;;  %v756_v53 = vsel %vm596_vm2, %v1679_v9, -inf }
 0x154   :  { %v633_v1 = vadd.f32 %v632_v23, %v631_v55  ;;  %v757_v25 = vmax.f32 %v749_v21, %v754_v26  ;;  %v586_v62 = vsel %vm554_vm10, %v1530_v0, 0.0  ;;  %v638_v3 = vsel %vm596_vm2, %v585_v44, 0.0 }
 0x155   :  { %v455_v10 = vadd.s32 208, %v1465_v27  ;;  %vm556_vm12 = vcmp.eq.s32.totalorder %v453_v31, %v1467_v28  ;;  %v587_v36 = vsel %vm555_vm11, %v1555_v13, 0.0  ;;  %v640_v30 = vsel %vm596_vm2, %v586_v62, 0.0  ;;  %v1760_v62 = vld [vmem:[#allocation8] sm:$0x1] }
 0x156   :  { %v635_v20 = vadd.f32 %v634_v29, %v633_v1  ;;  %v762_v37 = vmax.f32 %v760_v40, %v757_v25  ;;  %v456_v16 = vadd.s32 216, %v1465_v27  ;;  %vm557_vm13 = vcmp.eq.s32.totalorder %v454_v50, %v1467_v28 }
 0x157   :  { %v588_v18 = vsel %vm556_vm12, %v1605_v52, 0.0  ;;  %v642_v55 = vsel %vm596_vm2, %v587_v36, 0.0  ;;  %vm558_vm14 = vcmp.eq.s32.totalorder %v455_v10, %v1467_v28  ;;  %v457_v21 = vadd.s32 224, %v1465_v27 }
 0x158   :  { %v637_v2 = vadd.f32 %v636_v47, %v635_v20  ;;  %v764_v22 = vmax.f32 %v762_v37, %v756_v53  ;;  %v589_v23 = vsel %vm557_vm13, %v1620_v5, 0.0  ;;  %v459_v24 = vadd.s32 240, %v1465_v27 }
 0x159   :  { %v644_v1 = vsel %vm596_vm2, %v588_v18, 0.0  ;;  %vm559_vm15 = vcmp.eq.s32.totalorder %v456_v16, %v1467_v28  ;;  %v460_v25 = vadd.s32 248, %v1465_v27  ;;  %v458_v29 = vadd.s32 232, %v1465_v27 }
 0x15a   :  { %v639_v14 = vadd.f32 %v638_v3, %v637_v2  ;;  %v765_v15 = vrot.slane %v764_v22, 4  ;;  %v590_v31 = vsel %vm558_vm14, %v1595_v49, 0.0  ;;  %v646_v20 = vsel %vm596_vm2, %v589_v23, 0.0 }
 0x15b   :  { %vm560_vm1 = vcmp.eq.s32.totalorder %v457_v21, %v1467_v28  ;;  %v591_v37 = vsel %vm559_vm15, %v1610_v58, 0.0  ;;  %vm562_vm3 = vcmp.eq.s32.totalorder %v459_v24, %v1467_v28  ;;  %v648_v53 = vsel %vm596_vm2, %v590_v31, 0.0 }
 0x15c   :  { %v641_v56 = vadd.f32 %v640_v30, %v639_v14  ;;  %v766_v60 = vmax.f32 %v764_v22, %v765_v15  ;;  %vm563_vm4 = vcmp.eq.s32.totalorder %v460_v25, %v1467_v28  ;;  %vm561_vm5 = vcmp.eq.s32.totalorder %v458_v29, %v1467_v28 }
 0x15d   :  { %v592_v2 = vsel %vm560_vm1, %v1662_v59, 0.0  ;;  %v775_v10 = vsub.s32 0, %v1465_v27  ;;  %v650_v36 = vsel %vm596_vm2, %v591_v37, 0.0  ;;  %v594_v14 = vsel %vm562_vm3, %v1654_v33, 0.0 }
 0x15e   :  { %v643_v26 = vadd.f32 %v642_v55, %v641_v56  ;;  %v767_v11 = vrot.slane %v766_v60, 2  ;;  %v595_v30 = vsel %vm563_vm4, %v1670_v61, 0.0  ;;  %v593_v16 = vsel %vm561_vm5, %v1679_v9, 0.0 }
 0x15f   :  { %v652_v18 = vsel %vm596_vm2, %v592_v2, 0.0  ;;  %v656_v55 = vsel %vm596_vm2, %v594_v14, 0.0  ;;  %v658_v21 = vsel %vm596_vm2, %v595_v30, 0.0  ;;  %v654_v23 = vsel %vm596_vm2, %v593_v16, 0.0 }
 0x160   :  { %v645_v40 = vadd.f32 %v644_v1, %v643_v26  ;;  %v768_v44 = vmax.f32 %v766_v60, %v767_v11 }
 0x162   :  { %v647_v47 = vadd.f32 %v646_v20, %v645_v40  ;;  %v769_v50 = vrot.slane %v768_v44, 1 }
 0x164   :  { %v649_v22 = vadd.f32 %v648_v53, %v647_v47  ;;  %v770_v3 = vmax.f32 %v768_v44, %v769_v50 }
 0x166   :  { %v651_v15 = vadd.f32 %v650_v36, %v649_v22  ;;  %v1769_v28 = vmax.f32 %v1760_v62, %v770_v3 }
 0x168   :  { %v653_v56 = vadd.f32 %v652_v18, %v651_v15  ;;  %v1773_v60 = vrot.slane %v1769_v28, %v775_v10  ;;  %982 = vst.msk [vmem:[#allocation8] sm:$0x1] %vm69_vm0, %v1769_v28 }
 0x169   :  { %1316 = shalt.err (!%p1313_p0)
}
 0x16a   :  { %s1317_s10 = scalar_lea.hbm %s1990_s3, 16 }
 0x16b   :  { %p1318_p1 = scmp.ne.s32.totalorder %s1990_s3, %s1317_s10  ;;  %p1321_p2 = scmp.lt.u32.totalorder %s1317_s10, %s1990_s3 }
 0x16d   :  { %p1323_p3 = pnand %p1321_p2, %p1318_p1 }
 0x16f   :  { %1326 = shalt.err (!%p1323_p3)
}
 0x170   :  { %992 = dma.vmem_to_hbm [thread:$0]  %s990_s30, 16, %s1990_s3, [#allocation4]   ;;  %v655_v24 = vadd.f32 %v654_v23, %v653_v56  ;;  %v778_v26 = vsub.f32 %v1485_v38, %v1773_v60  ;;  %v779_v11 = vsub.f32 %v1496_v43, %v1773_v60  ;;  %v780_v1 = vsub.f32 %v1476_v34, %v1773_v60  ;;  %v527_v56 = vld [vmem:[#allocation11] sm:$0x1] }
 0x171   :  { %v781_v25 = vsub.f32 %v1491_v41, %v1773_v60  ;;  %v782_v29 = vsub.f32 %v1544_v6, %v1773_v60  ;;  %v783_v31 = vsub.f32 %v1560_v17, %v1773_v60  ;;  %v784_v40 = vsub.f32 %v1528_v63, %v1773_v60  ;;  %s1387_s3 = smov [#allocation9]   ;;  %s1388_s17 = smov [#allocation11]  }
 0x172   :  { %v657_v44 = vadd.f32 %v656_v55, %v655_v24  ;;  %v785_v38 = vsub.f32 %v1553_v12, %v1773_v60  ;;  %v786_v43 = vsub.f32 %v1599_v51, %v1773_v60  ;;  %v787_v34 = vsub.f32 %v1618_v4, %v1773_v60  ;;  %s999_s1 = sshll.u32 %s1387_s3, 4  ;;  %s1009_s18 = sshll.u32 %s1388_s17, 4  ;;  %s1000_s1 = int_to_ptr.vmem [resolvable:$true] %s999_s1  ;;  %s1954_s18 = int_to_ptr.vmem [resolvable:$true] %s1009_s18 }
 0x173   :  { %v788_v41 = vsub.f32 %v1592_v48, %v1773_v60  ;;  %v789_v6 = vsub.f32 %v1608_v57, %v1773_v60  ;;  %v790_v17 = vsub.f32 %v1659_v46, %v1773_v60  ;;  %v791_v63 = vsub.f32 %v1677_v8, %v1773_v60  ;;  %s1327_s19 = scalar_lea.vmem %s1000_s1, 16  ;;  %s1331_s20 = scalar_lea.vmem %s1000_s1, 32 }
 0x174   :  { %v659_v20 = vadd.f32 %v658_v21, %v657_v44  ;;  %v792_v12 = vsub.f32 %v1652_v32, %v1773_v60  ;;  %v793_v51 = vsub.f32 %v1667_v54, %v1773_v60  ;;  %v794_v4 = vsub.f32 %v1488_v39, %v1773_v60  ;;  %p1328_p4 = scmp.ne.s32.totalorder %s1000_s1, %s1327_s19  ;;  %p1332_p5 = scmp.lt.s32.totalorder %s1000_s1, %s1000_s1 }
 0x175   :  { %v795_v48 = vsub.f32 %v1501_v45, %v1773_v60  ;;  %v796_v57 = vsub.f32 %v1478_v35, %v1773_v60  ;;  %v797_v37 = vsub.f32 %v1493_v42, %v1773_v60  ;;  %v798_v47 = vsub.f32 %v1546_v7, %v1773_v60  ;;  %p1333_p6 = scmp.lt.s32.totalorder %s1331_s20, %s1327_s19 }
 0x176   :  { %v660_v50 = vrot.slane %v659_v20, 4  ;;  %v799_v53 = vsub.f32 %v1564_v19, %v1773_v60  ;;  %v800_v2 = vsub.f32 %v1530_v0, %v1773_v60  ;;  %v801_v22 = vsub.f32 %v1555_v13, %v1773_v60 }
 0x177   :  { %v802_v3 = vsub.f32 %v1605_v52, %v1773_v60  ;;  %v803_v10 = vsub.f32 %v1620_v5, %v1773_v60  ;;  %v804_v36 = vsub.f32 %v1595_v49, %v1773_v60  ;;  %v810_v55 = vmul.f32 1.442695, %v778_v26  ;;  %p1334_p7 = por %p1333_p6, %p1332_p5 }
 0x178   :  { %v661_v15 = vadd.f32 %v660_v50, %v659_v20  ;;  %v812_v21 = vmul.f32 1.442695, %v779_v11  ;;  %v814_v23 = vmul.f32 1.442695, %v780_v1  ;;  %v816_v44 = vmul.f32 1.442695, %v781_v25 }
 0x179   :  { %1173 = vpow2.f32 %v810_v55  ;;  %v818_v20 = vmul.f32 1.442695, %v782_v29  ;;  %v820_v27 = vmul.f32 1.442695, %v783_v31  ;;  %v822_v16 = vmul.f32 1.442695, %v784_v40  ;;  %p1335_p8 = pnand %p1334_p7, %p1328_p4 }
 0x17a   :  { %v662_v24 = vrot.slane %v661_v15, 2  ;;  %1175 = vpow2.f32 %v812_v21  ;;  %v824_v18 = vmul.f32 1.442695, %v785_v38  ;;  %v826_v14 = vmul.f32 1.442695, %v786_v43 }
 0x17b   :  { %1177 = vpow2.f32 %v814_v23  ;;  %v828_v25 = vmul.f32 1.442695, %v787_v34  ;;  %v830_v40 = vmul.f32 1.442695, %v788_v41  ;;  %v832_v43 = vmul.f32 1.442695, %v789_v6 }
 0x17c   :  { %v663_v50 = vadd.f32 %v662_v24, %v661_v15  ;;  %1179 = vpow2.f32 %v816_v44  ;;  %v836_v24 = vmul.f32 1.442695, %v791_v63 }
 0x17d   :  { %1181 = vpow2.f32 %v818_v20 }
 0x17e   :  { %v664_v30 = vrot.slane %v663_v50, 1  ;;  %1183 = vpow2.f32 %v820_v27 }
 0x17f   :  { %1185 = vpow2.f32 %v822_v16 }
 0x180   :  { %v665_v11 = vadd.f32 %v664_v30, %v663_v50  ;;  %1187 = vpow2.f32 %v824_v18  ;;  %v834_v18 = vmul.f32 1.442695, %v790_v17  ;;  %v838_v50 = vmul.f32 1.442695, %v792_v12 }
 0x181   :  { %1189 = vpow2.f32 %v826_v14 }
 0x182   :  { %v666_v21 = vadd.f32 %v665_v11, %v527_v56  ;;  %1191 = vpow2.f32 %v828_v25  ;;  %v840_v11 = vmul.f32 1.442695, %v793_v51  ;;  %v842_v25 = vmul.f32 1.442695, %v794_v4 }
 0x183   :  { %v1174_v26 = vpop.eup %1173  ;;  %1193 = vpow2.f32 %v830_v40  ;;  %v848_v40 = vmul.f32 1.442695, %v797_v37 }
 0x184   :  { %v1176_v1 = vpop.eup %1175  ;;  %v911_v55 = vsel %vm596_vm2, %v1174_v26, 0.0  ;;  %668 = vst.msk [vmem:[#allocation11] sm:$0x1] %vm69_vm0, %v666_v21  ;;  %1195 = vpow2.f32 %v832_v43  ;;  %v846_v21 = vmul.f32 1.442695, %v796_v57 }
 0x185   :  { %v1178_v29 = vpop.eup %1177  ;;  %v912_v15 = vsel %vm596_vm2, %v1176_v1, 0.0  ;;  %1197 = vpow2.f32 %v834_v18  ;;  %v852_v43 = vmul.f32 1.442695, %v799_v53  ;;  %v856_v18 = vmul.f32 1.442695, %v801_v22 }
 0x186   :  { %v1180_v31 = vpop.eup %1179  ;;  %v913_v23 = vadd.f32 %v912_v15, %v911_v55  ;;  %v914_v27 = vsel %vm596_vm2, %v1178_v29, 0.0  ;;  %1199 = vpow2.f32 %v836_v24  ;;  %v844_v29 = vmul.f32 1.442695, %v795_v48 }
 0x187   :  { %v1182_v38 = vpop.eup %1181  ;;  %v916_v34 = vsel %vm596_vm2, %v1180_v31, 0.0  ;;  %1201 = vpow2.f32 %v838_v50  ;;  %v860_v24 = vmul.f32 1.442695, %v803_v10  ;;  %v1993_v50 = vsub.f32 %v1610_v58, %v1773_v60 }
 0x188   :  { %v915_v30 = vadd.f32 %v914_v27, %v913_v23  ;;  %v1184_v16 = vpop.eup %1183  ;;  %v918_v41 = vsel %vm596_vm2, %v1182_v38, 0.0  ;;  %1203 = vpow2.f32 %v840_v11  ;;  %v850_v27 = vmul.f32 1.442695, %v798_v47 }
 0x189   :  { %v1186_v14 = vpop.eup %1185  ;;  %v920_v6 = vsel %vm596_vm2, %v1184_v16, 0.0  ;;  %1205 = vpow2.f32 %v842_v25 }
 0x18a   :  { %v917_v56 = vadd.f32 %v916_v34, %v915_v30  ;;  %v1188_v20 = vpop.eup %1187  ;;  %v922_v17 = vsel %vm596_vm2, %v1186_v14, 0.0  ;;  %1207 = vpow2.f32 %v844_v29  ;;  %v854_v34 = vmul.f32 1.442695, %v800_v2 }
 0x18b   :  { %v1190_v26 = vpop.eup %1189  ;;  %v924_v63 = vsel %vm596_vm2, %v1188_v20, 0.0  ;;  %1209 = vpow2.f32 %v846_v21 }
 0x18c   :  { %v919_v44 = vadd.f32 %v918_v41, %v917_v56  ;;  %v1192_v1 = vpop.eup %1191  ;;  %v926_v12 = vsel %vm596_vm2, %v1190_v26, 0.0  ;;  %1211 = vpow2.f32 %v848_v40  ;;  %v858_v41 = vmul.f32 1.442695, %v802_v3 }
 0x18d   :  { %v1194_v55 = vpop.eup %1193  ;;  %v928_v51 = vsel %vm596_vm2, %v1192_v1, 0.0  ;;  %1213 = vpow2.f32 %v850_v27  ;;  %v1994_v26 = vsub.f32 %v1662_v59, %v1773_v60 }
 0x18e   :  { %v921_v46 = vadd.f32 %v920_v6, %v919_v44  ;;  %v1196_v15 = vpop.eup %1195  ;;  %v930_v4 = vsel %vm596_vm2, %v1194_v55, 0.0  ;;  %1215 = vpow2.f32 %v852_v43  ;;  %v862_v6 = vmul.f32 1.442695, %v804_v36 }
 0x18f   :  { %v1198_v31 = vpop.eup %1197  ;;  %v932_v48 = vsel %vm596_vm2, %v1196_v15, 0.0  ;;  %1217 = vpow2.f32 %v854_v34  ;;  %v866_v11 = vmul.f32 1.442695, %v1994_v26  ;;  %v1998_v34 = vsub.f32 %v1760_v62, %v1769_v28 }
 0x190   :  { %v923_v8 = vadd.f32 %v922_v17, %v921_v46  ;;  %v1200_v23 = vpop.eup %1199  ;;  %v934_v57 = vsel %vm596_vm2, %v1198_v31, 0.0  ;;  %1219 = vpow2.f32 %v856_v18  ;;  %v864_v46 = vmul.f32 1.442695, %v1993_v50 }
 0x191   :  { %v1202_v38 = vpop.eup %1201  ;;  %v936_v37 = vsel %vm596_vm2, %v1200_v23, 0.0  ;;  %1221 = vpow2.f32 %v858_v41 }
 0x192   :  { %v925_v32 = vadd.f32 %v924_v63, %v923_v8  ;;  %v1204_v30 = vpop.eup %1203  ;;  %v938_v47 = vsel %vm596_vm2, %v1202_v38, 0.0  ;;  %1223 = vpow2.f32 %v860_v24  ;;  %v1995_v63 = vsub.f32 %v1679_v9, %v1773_v60 }
 0x193   :  { %v1206_v16 = vpop.eup %1205  ;;  %v940_v53 = vsel %vm596_vm2, %v1204_v30, 0.0  ;;  %1225 = vpow2.f32 %v862_v6 }
 0x194   :  { %v927_v54 = vadd.f32 %v926_v12, %v925_v32  ;;  %v1208_v56 = vpop.eup %1207  ;;  %v942_v2 = vsel %vm596_vm2, %v1206_v16, 0.0  ;;  %1227 = vpow2.f32 %v864_v46  ;;  %v868_v1 = vmul.f32 1.442695, %v1995_v63 }
 0x195   :  { %v1210_v14 = vpop.eup %1209  ;;  %v944_v22 = vsel %vm596_vm2, %v1208_v56, 0.0  ;;  %1229 = vpow2.f32 %v866_v11  ;;  %v1996_v12 = vsub.f32 %v1654_v33, %v1773_v60 }
 0x196   :  { %v929_v39 = vadd.f32 %v928_v51, %v927_v54  ;;  %v1212_v44 = vpop.eup %1211  ;;  %v946_v3 = vsel %vm596_vm2, %v1210_v14, 0.0  ;;  %1231 = vpow2.f32 %v868_v1  ;;  %v1997_v51 = vsub.f32 %v1670_v61, %v1773_v60 }
 0x197   :  { %v1214_v20 = vpop.eup %1213  ;;  %v948_v10 = vsel %vm596_vm2, %v1212_v44, 0.0  ;;  %v870_v55 = vmul.f32 1.442695, %v1996_v12 }
 0x198   :  { %v931_v45 = vadd.f32 %v930_v4, %v929_v39  ;;  %v1216_v17 = vpop.eup %1215  ;;  %v950_v36 = vsel %vm596_vm2, %v1214_v20, 0.0  ;;  %v872_v15 = vmul.f32 1.442695, %v1997_v51 }
 0x199   :  { %v1218_v8 = vpop.eup %1217  ;;  %v952_v25 = vsel %vm596_vm2, %v1216_v17, 0.0  ;;  %1233 = vpow2.f32 %v870_v55 }
 0x19a   :  { %v933_v35 = vadd.f32 %v932_v48, %v931_v45  ;;  %v1220_v32 = vpop.eup %1219  ;;  %v954_v29 = vsel %vm596_vm2, %v1218_v8, 0.0  ;;  %1235 = vpow2.f32 %v872_v15 }
 0x19b   :  { %v1222_v54 = vpop.eup %1221  ;;  %v956_v21 = vsel %vm596_vm2, %v1220_v32, 0.0 }
 0x19c   :  { %v935_v42 = vadd.f32 %v934_v57, %v933_v35  ;;  %v1224_v39 = vpop.eup %1223  ;;  %v958_v31 = vsel %vm596_vm2, %v1222_v54, 0.0 }
 0x19d   :  { %v1226_v40 = vpop.eup %1225  ;;  %v960_v45 = vsel %vm596_vm2, %v1224_v39, 0.0 }
 0x19e   :  { %v937_v7 = vadd.f32 %v936_v37, %v935_v42  ;;  %v1228_v48 = vpop.eup %1227  ;;  %v962_v27 = vsel %vm596_vm2, %v1226_v40, 0.0 }
 0x19f   :  { %v1230_v35 = vpop.eup %1229  ;;  %v964_v60 = vsel %vm596_vm2, %v1228_v48, 0.0 }
 0x1a0   :  { %v939_v19 = vadd.f32 %v938_v47, %v937_v7  ;;  %v1232_v57 = vpop.eup %1231  ;;  %v966_v43 = vsel %vm596_vm2, %v1230_v35, 0.0  ;;  %v908_v7 = vmul.f32 1.442695, %v1998_v34 }
 0x1a1   :  { %v968_v30 = vsel %vm596_vm2, %v1232_v57, 0.0 }
 0x1a2   :  { %v941_v0 = vadd.f32 %v940_v53, %v939_v19  ;;  %1237 = vpow2.f32 %v908_v7 }
 0x1a3   :  { %v1234_v42 = vpop.eup %1233 }
 0x1a4   :  { %v943_v13 = vadd.f32 %v942_v2, %v941_v0  ;;  %v1236_v47 = vpop.eup %1235  ;;  %v970_v18 = vsel %vm596_vm2, %v1234_v42, 0.0 }
 0x1a5   :  { %v972_v53 = vsel %vm596_vm2, %v1236_v47, 0.0 }
 0x1a6   :  { %v945_v52 = vadd.f32 %v944_v22, %v943_v13  ;;  %v906_v13 = vld [vmem:[#allocation9] sm:$0x1] }
 0x1a8   :  { %v947_v5 = vadd.f32 %v946_v3, %v945_v52 }
 0x1aa   :  { %v949_v49 = vadd.f32 %v948_v10, %v947_v5 }
 0x1ac   :  { %v951_v58 = vadd.f32 %v950_v36, %v949_v49  ;;  %v1238_v24 = vpop.eup %1237 }
 0x1ad   :  { %v910_v62 = vmul.f32 %v1238_v24, %v906_v13 }
 0x1ae   :  { %v953_v59 = vadd.f32 %v952_v25, %v951_v58 }
 0x1b0   :  { %v955_v9 = vadd.f32 %v954_v29, %v953_v59 }
 0x1b2   :  { %v957_v4 = vadd.f32 %v956_v21, %v955_v9 }
 0x1b4   :  { %v959_v33 = vadd.f32 %v958_v31, %v957_v4 }
 0x1b6   :  { %v961_v23 = vadd.f32 %v960_v45, %v959_v33 }
 0x1b8   :  { %v963_v61 = vadd.f32 %v962_v27, %v961_v23 }
 0x1ba   :  { %v965_v38 = vadd.f32 %v964_v60, %v963_v61 }
 0x1bc   :  { %v967_v37 = vadd.f32 %v966_v43, %v965_v38 }
 0x1be   :  { %v969_v16 = vadd.f32 %v968_v30, %v967_v37 }
 0x1c0   :  { %v971_v19 = vadd.f32 %v970_v18, %v969_v16 }
 0x1c2   :  { %v973_v56 = vadd.f32 %v972_v53, %v971_v19 }
 0x1c4   :  { %v974_v41 = vrot.slane %v973_v56, 4 }
 0x1c6   :  { %v975_v0 = vadd.f32 %v974_v41, %v973_v56 }
 0x1c8   :  { %v976_v2 = vrot.slane %v975_v0, 2 }
 0x1ca   :  { %v977_v14 = vadd.f32 %v976_v2, %v975_v0 }
 0x1cc   :  { %v978_v22 = vrot.slane %v977_v14, 1 }
 0x1ce   :  { %v979_v28 = vadd.f32 %v978_v22, %v977_v14 }
 0x1d0   :  { %v980_v44 = vadd.f32 %v979_v28, %v910_v62 }
 0x1d2   :  { %981 = vst.msk [vmem:[#allocation9] sm:$0x1] %vm69_vm0, %v980_v44 }
 0x1d3   :  { %1338 = shalt.err (!%p1335_p8)
}
 0x1d4   :  { %s1339_s24 = scalar_lea.hbm %s1991_s4, 16 }
 0x1d5   :  { %p1340_p9 = scmp.ne.s32.totalorder %s1991_s4, %s1339_s24  ;;  %p1343_p10 = scmp.lt.u32.totalorder %s1339_s24, %s1991_s4 }
 0x1d7   :  { %p1345_p11 = pnand %p1343_p10, %p1340_p9 }
 0x1d9   :  { %1348 = shalt.err (!%p1345_p11)
}
 0x1da   :  { %1002 = dma.vmem_to_hbm [thread:$0]  %s1000_s1, 16, %s1991_s4, [#allocation10]  }
 0x1db   :  { %s1349_s29 = scalar_lea.vmem %s1954_s18, 16  ;;  %s1353_s2 = scalar_lea.vmem %s1954_s18, 32 }
 0x1dc   :  { %p1350_p12 = scmp.ne.s32.totalorder %s1954_s18, %s1349_s29  ;;  %p1354_p13 = scmp.lt.s32.totalorder %s1954_s18, %s1954_s18 }
 0x1dd   :  { %p1355_p0 = scmp.lt.s32.totalorder %s1353_s2, %s1349_s29 }
 0x1df   :  { %p1356_p1 = por %p1355_p0, %p1354_p13 }
 0x1e1   :  { %p1357_p2 = pnand %p1356_p1, %p1350_p12 }
 0x1e3   :  { %1360 = shalt.err (!%p1357_p2)
}
 0x1e4   :  { %s1361_s7 = scalar_lea.hbm %s1992_s5, 16 }
 0x1e5   :  { %p1362_p3 = scmp.ne.s32.totalorder %s1992_s5, %s1361_s7  ;;  %p1365_p4 = scmp.lt.u32.totalorder %s1361_s7, %s1992_s5 }
 0x1e7   :  { %p1367_p5 = pnand %p1365_p4, %p1362_p3 }
 0x1e9   :  { %1370 = shalt.err (!%p1367_p5)
}
 0x1ea   :  { %1012 = dma.vmem_to_hbm [thread:$0]  %s1954_s18, 16, %s1992_s5, [#allocation10]  }
 0x1eb   :  { %1375 = dma.done.wait [#allocation4], 16  }
 0x1ec   :  { %1376 = vsyncadd [#allocation4], 4294967280 }
 0x1ed   :  { %1377 = dma.done.wait [#allocation10], 32  }
 0x1ee   :  { %1378 = vsyncadd [#allocation10], 4294967264 }
 0x1ef   :  { %1022 = vsyncpa [#allocation3], 1 }
 0x1f0   :  { %1023 = vsyncpa [#allocation6], 1 }
 0x1f1   :  { %1024 = vsyncpa [#allocation4], 1 }
 0x1f2   :  { %1025 = vsyncpa [#allocation10], 1 }

</bundles_post_ra>
